<compile_context>
chip_gen: v7x
topology: tpu7x:2x2x1
jax: 0.10.0
libtpu: 0.0.40
codegen_flags: <defaults>
</compile_context>

<pallas_src>
import functools

import jax
import jax.numpy as jnp
from jax import lax
from jax.experimental import pallas as pl
from jax.experimental.pallas import tpu as pltpu


# ---------------------------------------------------------------------------
# Fused kernel: whole progressive multitask forward + softmax
# ---------------------------------------------------------------------------
def _fused_progressive_kernel(x_ref, w_ref, b_ref, logits_ref, proba_ref, *,
                              meta, n_tasks, n_layers, n_classes, out_pad,
                              compute_dtype):
    f32 = jnp.float32

    def wslice(off, rows, cols):
        # Static, lane-aligned slice of the packed weight slab.
        return w_ref[pl.ds(off, rows), pl.ds(0, cols)]

    def bslice(idx, cols):
        return b_ref[pl.ds(idx, 1), pl.ds(0, cols)].astype(f32)

    def linear(a, lm):
        y = jnp.dot(a, wslice(lm["w_off"], lm["w_rows"], lm["w_cols"]),
                    preferred_element_type=f32)
        return y + bslice(lm["b_idx"], lm["w_cols"])

    def lateral(am, prev_acts, task):
        # One large-K matmul against the concatenated previous-column
        # activations (alpha already folded into Wu wrapper-side).
        cat = prev_acts[0] if task == 1 else jnp.concatenate(
            prev_acts[:task], axis=-1)
        h = jnp.dot(cat, wslice(am["wu_off"], am["wu_rows"], am["wu_cols"]),
                    preferred_element_type=f32)
        h = jnp.maximum(h + bslice(am["bu_idx"], am["wu_cols"]), 0.0)
        return jnp.dot(h.astype(compute_dtype),
                       wslice(am["wv_off"], am["wv_rows"], am["wv_cols"]),
                       preferred_element_type=f32)

    x = x_ref[...].astype(compute_dtype)
    tile_b = x.shape[0]

    # ---- hidden layers, layer-major: only layer i-1 activations stay live ----
    acts = [x] * n_tasks
    for i in range(n_layers):
        new_acts = []
        for task in range(n_tasks):
            y = linear(acts[task], meta["layers"][task][i])
            if task > 0 and i > 0:
                y = y + lateral(meta["adapters"][task - 1][i - 1], acts, task)
            # relu; dropout = identity (inference mode)
            new_acts.append(jnp.maximum(y, 0.0).astype(compute_dtype))
        acts = new_acts

    # ---- output head + fused, lane-masked softmax (f32 math) -----------------
    lane = lax.broadcasted_iota(jnp.int32, (tile_b, out_pad), 1)
    class_mask = lane < n_classes
    for task in range(n_tasks):
        y = linear(acts[task], meta["layers"][task][n_layers])
        if task > 0:
            y = y + lateral(meta["adapters"][task - 1][n_layers - 1], acts, task)
        # lane-dense, unmasked 128-wide store into the task's lane slice
        logits_ref[:, pl.ds(task * out_pad, out_pad)] = y.astype(logits_ref.dtype)

        ymask = jnp.where(class_mask, y, -1e30)          # keep masking in f32
        m = jnp.max(ymask, axis=-1, keepdims=True)
        e = jnp.exp(ymask - m)                           # padded lanes -> 0
        s = jnp.sum(e, axis=-1, keepdims=True)
        inv = pl.reciprocal(s, approx=True)              # EUP vrcp
        inv = inv * (2.0 - s * inv)                      # Newton step -> ~f32
        proba_ref[:, pl.ds(task * out_pad, out_pad)] = (e * inv).astype(
            proba_ref.dtype)


# ---------------------------------------------------------------------------
# Wrapper-side parameter packing (one-time, plain JAX)
# ---------------------------------------------------------------------------
def _pack_params(params, n_tasks, n_features, layer_sizes, n_classes,
                 compute_dtype):
    """Transpose to (in,out), fold alpha into Wu, zero-pad everything to
    128-lane widths, and pack into one weight slab + one bias slab."""
    n_layers = len(layer_sizes)
    pad128 = lambda n: ((n + 127) // 128) * 128
    f_pad = pad128(n_features)
    h_pads = [pad128(s) for s in layer_sizes]
    out_pad = pad128(n_classes)

    in_dims = [n_features] + list(layer_sizes)
    out_dims = list(layer_sizes) + [n_classes]
    in_pads = [f_pad] + h_pads
    out_pads = h_pads + [out_pad]
    c_max = max(h_pads + [out_pad])

    w_blocks, b_rows = [], []
    row_cursor = 0

    def add_w(Wt):                       # Wt: (rows, cols), rows/cols lane-padded
        nonlocal row_cursor
        rows, cols = Wt.shape
        w_blocks.append(jnp.pad(Wt, ((0, 0), (0, c_max - cols))))
        off = row_cursor
        row_cursor += rows
        return off, rows, cols

    def add_b(b):                        # b: (1, cols)
        cols = b.shape[1]
        b_rows.append(jnp.pad(b, ((0, 0), (0, c_max - cols))))
        return len(b_rows) - 1

    layer_meta = []
    for task in range(n_tasks):
        per = []
        for i in range(n_layers + 1):
            W, b = params["layers"][task][i]          # W: (out,in), b: (1,out)
            Wt = jnp.asarray(W, jnp.float32).T        # (in, out)
            Wt = jnp.pad(Wt, ((0, in_pads[i] - in_dims[i]),
                              (0, out_pads[i] - out_dims[i])))
            bb = jnp.pad(jnp.asarray(b, jnp.float32),
                         ((0, 0), (0, out_pads[i] - out_dims[i])))
            w_off, w_rows, w_cols = add_w(Wt.astype(compute_dtype))
            per.append(dict(w_off=w_off, w_rows=w_rows, w_cols=w_cols,
                            b_idx=add_b(bb)))
        layer_meta.append(per)

    adapter_meta = []
    for task in range(1, n_tasks):
        per = []
        for li in range(1, n_layers + 1):             # adapter for layer li
            alpha, Wu, bu, Wv = params["adapters"][task - 1][li - 1]
            prev_d, prev_p = layer_sizes[li - 1], h_pads[li - 1]
            out_d, out_p = out_dims[li], out_pads[li]
            # alpha folded: (alpha*cat) @ Wu^T == cat @ (alpha*Wu)^T
            Wu_t = (jnp.asarray(alpha, jnp.float32)[0, 0] *
                    jnp.asarray(Wu, jnp.float32)).T   # (prev_d*task, prev_d)
            chunks = []                               # pad in-rows per column chunk
            for t in range(task):
                ch = Wu_t[t * prev_d:(t + 1) * prev_d, :]
                chunks.append(jnp.pad(ch, ((0, prev_p - prev_d),
                                           (0, prev_p - prev_d))))
            Wu_p = jnp.concatenate(chunks, axis=0)    # (task*prev_p, prev_p)
            bu_p = jnp.pad(jnp.asarray(bu, jnp.float32),
                           ((0, 0), (0, prev_p - prev_d)))
            Wv_p = jnp.pad(jnp.asarray(Wv, jnp.float32).T,
                           ((0, prev_p - prev_d), (0, out_p - out_d)))
            wu_off, wu_rows, wu_cols = add_w(Wu_p.astype(compute_dtype))
            bu_idx = add_b(bu_p)
            wv_off, wv_rows, wv_cols = add_w(Wv_p.astype(compute_dtype))
            per.append(dict(wu_off=wu_off, wu_rows=wu_rows, wu_cols=wu_cols,
                            bu_idx=bu_idx,
                            wv_off=wv_off, wv_rows=wv_rows, wv_cols=wv_cols))
        adapter_meta.append(per)

    w_slab = jnp.concatenate(w_blocks, axis=0)        # (R, c_max), R % 128 == 0
    b_slab = jnp.concatenate(b_rows, axis=0)          # (n_bias, c_max), f32
    meta = dict(layers=layer_meta, adapters=adapter_meta)
    return w_slab, b_slab, meta, f_pad, out_pad


def _pick_tile_b(batch, bytes_per_row):
    # Cap so the per-step live block stays well under VMEM (v7x: 64 MiB total).
    cap = max(8, min(batch, (12 << 20) // max(bytes_per_row, 1)))
    # Megacore: ensure >= 2 grid steps when batch allows so the "parallel"
    # batch axis can be split across TensorCores.
    if batch >= 16:
        cap = min(cap, batch // 2)
    for t in (1024, 512, 256, 128, 64, 32, 16, 8):
        if t <= cap and batch % t == 0:
            return t
    return batch


# ---------------------------------------------------------------------------
# Forward pass (matches ProgressiveMultitask.forward semantics)
# ---------------------------------------------------------------------------
def progressive_multitask_forward(x, params, *, n_tasks, layer_sizes, n_classes,
                                  mode="classification"):
    batch, n_features = x.shape
    n_layers = len(layer_sizes)

    # bf16 matmul operands only pay off at MXU-native widths; toy widths stay f32.
    max_width = max([n_features, n_classes] + list(layer_sizes))
    compute_dtype = jnp.bfloat16 if max_width >= 256 else jnp.float32

    w_slab, b_slab, meta, f_pad, out_pad = _pack_params(
        params, n_tasks, n_features, layer_sizes, n_classes, compute_dtype)

    xf = x.astype(jnp.float32)
    if f_pad != n_features:
        xf = jnp.pad(xf, ((0, 0), (0, f_pad - n_features)))

    max_hpad = max([((s + 127) // 128) * 128 for s in layer_sizes] + [out_pad])
    bytes_per_row = (2 * f_pad * 4 + 4 * n_tasks * out_pad * 4
                     + 4 * n_tasks * max_hpad * 4)
    tile_b = _pick_tile_b(batch, bytes_per_row)
    grid = (batch // tile_b,)

    w_bytes = int(w_slab.size) * w_slab.dtype.itemsize
    b_bytes = int(b_slab.size) * b_slab.dtype.itemsize
    est = w_bytes + b_bytes + tile_b * bytes_per_row
    vmem_limit = int(min(max(3 * est, 32 << 20), 56 << 20))

    out_w = n_tasks * out_pad
    x_spec = pl.BlockSpec((tile_b, f_pad), lambda b: (b, 0))
    out_spec = pl.BlockSpec((tile_b, out_w), lambda b: (b, 0))

    kernel = functools.partial(
        _fused_progressive_kernel, meta=meta, n_tasks=n_tasks,
        n_layers=n_layers, n_classes=n_classes, out_pad=out_pad,
        compute_dtype=compute_dtype)

    def run(single_buffer_weights):
        if single_buffer_weights and hasattr(pl, "Buffered"):
            # Grid-invariant slabs: single-buffer them (no 2x VMEM).
            w_spec = pl.BlockSpec(w_slab.shape, lambda b: (0, 0),
                                  pipeline_mode=pl.Buffered(1))
            b_spec = pl.BlockSpec(b_slab.shape, lambda b: (0, 0),
                                  pipeline_mode=pl.Buffered(1))
        else:
            w_spec = pl.BlockSpec(w_slab.shape, lambda b: (0, 0))
            b_spec = pl.BlockSpec(b_slab.shape, lambda b: (0, 0))
        return pl.pallas_call(
            kernel,
            grid=grid,
            in_specs=[x_spec, w_spec, b_spec],
            out_specs=(out_spec, out_spec),
            out_shape=(jax.ShapeDtypeStruct((batch, out_w), jnp.float32),
                       jax.ShapeDtypeStruct((batch, out_w), jnp.float32)),
            compiler_params=pltpu.CompilerParams(
                dimension_semantics=("parallel",),
                vmem_limit_bytes=vmem_limit),
        )(xf, w_slab, b_slab)

    try:
        logits_pad, proba_pad = run(True)
    except Exception:
        # pipeline_mode=Buffered(1) unsupported on this jax build -> default.
        logits_pad, proba_pad = run(False)

    # (B, n_tasks*out_pad) -> free reshape -> (B, n_tasks, n_classes)
    logits = logits_pad.reshape(batch, n_tasks, out_pad)[:, :, :n_classes]
    proba = proba_pad.reshape(batch, n_tasks, out_pad)[:, :, :n_classes]

    if mode == "classification":
        if n_tasks == 1:
            logits = logits.reshape(batch, n_classes)
            proba = proba.reshape(batch, n_classes)
        return proba, logits
    return logits   # regression: raw (B, n_tasks, n_classes) outputs


# ---------------------------------------------------------------------------
# Deterministic parameter initialization (mirrors __init__ shapes)
# ---------------------------------------------------------------------------
def init_params(key, n_tasks, n_features, layer_sizes, n_classes,
                weight_init_stddev=0.02, bias_init_const=1.0,
                alpha_init_stddev=0.02):
    n_layers = len(layer_sizes)
    keys = iter(jax.random.split(key, 4096))

    layers = []    # layers[task][i] = (W (out,in), b (1,out)); i in 0..n_layers
    adapters = []  # adapters[task-1][i-1] = (alpha, Wu, bu, Wv); i in 1..n_layers
    for task in range(n_tasks):
        task_layers = []
        prev = n_features
        all_sizes = list(layer_sizes) + [n_classes]
        for size in all_sizes:
            W = jax.random.normal(next(keys), (size, prev), jnp.float32) * weight_init_stddev
            b = jnp.full((1, size), bias_init_const, jnp.float32)
            task_layers.append((W, b))
            prev = size
        layers.append(task_layers)

        if task > 0:
            task_adapters = []
            for i in range(1, n_layers + 1):
                prev_size = layer_sizes[i - 1]
                size = layer_sizes[i] if i < n_layers else n_classes
                Wu = (jax.random.normal(next(keys), (prev_size, prev_size * task),
                                        jnp.float32) * weight_init_stddev)
                bu = jnp.full((1, prev_size), bias_init_const, jnp.float32)
                Wv = (jax.random.normal(next(keys), (size, prev_size),
                                        jnp.float32) * weight_init_stddev)
                alpha = (jax.random.normal(next(keys), (1, 1), jnp.float32)
                         * alpha_init_stddev)
                task_adapters.append((alpha, Wu, bu, Wv))
            adapters.append(task_adapters)

    return {"layers": layers, "adapters": adapters}


# ---------------------------------------------------------------------------
# Pure-JAX reference (mirrors the PyTorch forward) for validation
# ---------------------------------------------------------------------------
def _reference_forward(x, params, *, n_tasks, layer_sizes, n_classes):
    mm = functools.partial(jnp.matmul, precision=lax.Precision.HIGHEST)
    n_layers = len(layer_sizes)
    task_outputs, layer_logits = [], []
    for task in range(n_tasks):
        x_ = x
        outs = []
        for i in range(n_layers):
            W, b = params["layers"][task][i]
            y = mm(x_, W.T) + b
            if task > 0 and i > 0:
                alpha, Wu, bu, Wv = params["adapters"][task - 1][i - 1]
                cat = jnp.concatenate([layer_logits[t][i - 1] for t in range(task)], axis=-1)
                h = jnp.maximum(mm(alpha[0, 0] * cat, Wu.T) + bu, 0.0)
                y = y + mm(h, Wv.T)
            x_ = jnp.maximum(y, 0.0)
            outs.append(x_)
        W, b = params["layers"][task][n_layers]
        y = mm(x_, W.T) + b
        if task > 0:
            alpha, Wu, bu, Wv = params["adapters"][task - 1][n_layers - 1]
            cat = jnp.concatenate([layer_logits[t][n_layers - 1] for t in range(task)], axis=-1)
            h = jnp.maximum(mm(alpha[0, 0] * cat, Wu.T) + bu, 0.0)
            y = y + mm(h, Wv.T)
        layer_logits.append(outs)
        task_outputs.append(y)
    logits = jnp.stack(task_outputs, axis=1)           # (B, n_tasks, n_classes)
    return jax.nn.softmax(logits, axis=-1), logits


# ---------------------------------------------------------------------------
if __name__ == "__main__":
    n_tasks = 3
    n_features = 32
    layer_sizes = [32, 32]
    n_classes = 2
    batch = 8

    key = jax.random.PRNGKey(0)
    k_param, k_x = jax.random.split(key)
    params = init_params(k_param, n_tasks, n_features, layer_sizes, n_classes)
    x = jax.random.normal(k_x, (batch, n_features), jnp.float32)

    proba, logits = progressive_multitask_forward(
        x, params, n_tasks=n_tasks, layer_sizes=layer_sizes,
        n_classes=n_classes, mode="classification")
    proba = jax.block_until_ready(proba)
    logits = jax.block_until_ready(logits)

    assert proba.shape == (batch, n_tasks, n_classes)
    assert logits.shape == (batch, n_tasks, n_classes)
    assert proba.dtype == jnp.float32 and logits.dtype == jnp.float32
    # softmax rows sum to 1
    assert bool(jnp.allclose(jnp.sum(proba, axis=-1), 1.0, atol=1e-5))

    # compare against a pure-JAX reference of the PyTorch forward
    ref_proba, ref_logits = _reference_forward(
        x, params, n_tasks=n_tasks, layer_sizes=layer_sizes, n_classes=n_classes)
    assert bool(jnp.allclose(logits, ref_logits, atol=2e-3, rtol=2e-3))
    assert bool(jnp.allclose(proba, ref_proba, atol=2e-3, rtol=2e-3))

    print("KERNEL_OK")
</pallas_src>

<mosaic_0001>
module attributes {stable_mosaic.version = 11 : i64} {
  func.func @_fused_progressive_kernel(%arg0: i32, %arg1: memref<8x128xf32, #tpu.memory_space<vmem>>, %arg2: memref<2432x128xf32, #tpu.memory_space<vmem>>, %arg3: memref<13x128xf32, #tpu.memory_space<vmem>>, %arg4: memref<8x384xf32, #tpu.memory_space<vmem>>, %arg5: memref<8x384xf32, #tpu.memory_space<vmem>>) attributes {dimension_semantics = [#tpu.dimension_semantics<parallel>], iteration_bounds = array<i64: 1>, scalar_prefetch = 0 : i64, scratch_operands = 0 : i64, tpu.core_type = #tpu.core_type<tc>, window_params = [{transform_indices = @transform_0, window_bounds = array<i64: 8, 128>}, {pipeline_mode = #tpu.pipeline_mode<synchronous>, transform_indices = @transform_1, window_bounds = array<i64: 2432, 128>}, {pipeline_mode = #tpu.pipeline_mode<synchronous>, transform_indices = @transform_2, window_bounds = array<i64: 13, 128>}, {transform_indices = @transform_3, window_bounds = array<i64: 8, 384>}, {transform_indices = @transform_4, window_bounds = array<i64: 8, 384>}]} {
    %c0 = arith.constant 0 : index
    %c0_0 = arith.constant 0 : index
    %0 = vector.load %arg1[%c0, %c0_0] : memref<8x128xf32, #tpu.memory_space<vmem>>, vector<8x128xf32>
    %c0_1 = arith.constant 0 : index
    %c0_2 = arith.constant 0 : index
    %1 = vector.load %arg2[%c0_1, %c0_2] : memref<2432x128xf32, #tpu.memory_space<vmem>>, vector<128x128xf32>
    %cst = arith.constant dense<0.000000e+00> : vector<8x128xf32>
    %2 = tpu.matmul %0, %1, %cst {dimension_numbers = #tpu.dot_dimension_numbers<[1], [0], [0], [1], [0, 0, 1, 1], [], []>} : vector<8x128xf32>, vector<128x128xf32>, vector<8x128xf32> -> vector<8x128xf32>
    %c0_3 = arith.constant 0 : index
    %c0_4 = arith.constant 0 : index
    %3 = vector.load %arg3[%c0_3, %c0_4] : memref<13x128xf32, #tpu.memory_space<vmem>>, vector<1x128xf32>
    %4 = vector.broadcast %3 : vector<1x128xf32> to vector<8x128xf32>
    %5 = arith.addf %2, %4 : vector<8x128xf32>
    %cst_5 = arith.constant 0.000000e+00 : f32
    %6 = vector.broadcast %cst_5 : f32 to vector<8x128xf32>
    %7 = arith.maximumf %5, %6 : vector<8x128xf32>
    %c384 = arith.constant 384 : index
    %c0_6 = arith.constant 0 : index
    %8 = vector.load %arg2[%c384, %c0_6] : memref<2432x128xf32, #tpu.memory_space<vmem>>, vector<128x128xf32>
    %cst_7 = arith.constant dense<0.000000e+00> : vector<8x128xf32>
    %9 = tpu.matmul %0, %8, %cst_7 {dimension_numbers = #tpu.dot_dimension_numbers<[1], [0], [0], [1], [0, 0, 1, 1], [], []>} : vector<8x128xf32>, vector<128x128xf32>, vector<8x128xf32> -> vector<8x128xf32>
    %c3 = arith.constant 3 : index
    %c0_8 = arith.constant 0 : index
    %10 = vector.load %arg3[%c3, %c0_8] : memref<13x128xf32, #tpu.memory_space<vmem>>, vector<1x128xf32>
    %11 = vector.broadcast %10 : vector<1x128xf32> to vector<8x128xf32>
    %12 = arith.addf %9, %11 : vector<8x128xf32>
    %cst_9 = arith.constant 0.000000e+00 : f32
    %13 = vector.broadcast %cst_9 : f32 to vector<8x128xf32>
    %14 = arith.maximumf %12, %13 : vector<8x128xf32>
    %c768 = arith.constant 768 : index
    %c0_10 = arith.constant 0 : index
    %15 = vector.load %arg2[%c768, %c0_10] : memref<2432x128xf32, #tpu.memory_space<vmem>>, vector<128x128xf32>
    %cst_11 = arith.constant dense<0.000000e+00> : vector<8x128xf32>
    %16 = tpu.matmul %0, %15, %cst_11 {dimension_numbers = #tpu.dot_dimension_numbers<[1], [0], [0], [1], [0, 0, 1, 1], [], []>} : vector<8x128xf32>, vector<128x128xf32>, vector<8x128xf32> -> vector<8x128xf32>
    %c6 = arith.constant 6 : index
    %c0_12 = arith.constant 0 : index
    %17 = vector.load %arg3[%c6, %c0_12] : memref<13x128xf32, #tpu.memory_space<vmem>>, vector<1x128xf32>
    %18 = vector.broadcast %17 : vector<1x128xf32> to vector<8x128xf32>
    %19 = arith.addf %16, %18 : vector<8x128xf32>
    %cst_13 = arith.constant 0.000000e+00 : f32
    %20 = vector.broadcast %cst_13 : f32 to vector<8x128xf32>
    %21 = arith.maximumf %19, %20 : vector<8x128xf32>
    %c128 = arith.constant 128 : index
    %c0_14 = arith.constant 0 : index
    %22 = vector.load %arg2[%c128, %c0_14] : memref<2432x128xf32, #tpu.memory_space<vmem>>, vector<128x128xf32>
    %cst_15 = arith.constant dense<0.000000e+00> : vector<8x128xf32>
    %23 = tpu.matmul %7, %22, %cst_15 {dimension_numbers = #tpu.dot_dimension_numbers<[1], [0], [0], [1], [0, 0, 1, 1], [], []>} : vector<8x128xf32>, vector<128x128xf32>, vector<8x128xf32> -> vector<8x128xf32>
    %c1 = arith.constant 1 : index
    %c0_16 = arith.constant 0 : index
    %24 = vector.load %arg3[%c1, %c0_16] : memref<13x128xf32, #tpu.memory_space<vmem>>, vector<1x128xf32>
    %25 = vector.broadcast %24 : vector<1x128xf32> to vector<8x128xf32>
    %26 = arith.addf %23, %25 : vector<8x128xf32>
    %cst_17 = arith.constant 0.000000e+00 : f32
    %27 = vector.broadcast %cst_17 : f32 to vector<8x128xf32>
    %28 = arith.maximumf %26, %27 : vector<8x128xf32>
    %c512 = arith.constant 512 : index
    %c0_18 = arith.constant 0 : index
    %29 = vector.load %arg2[%c512, %c0_18] : memref<2432x128xf32, #tpu.memory_space<vmem>>, vector<128x128xf32>
    %cst_19 = arith.constant dense<0.000000e+00> : vector<8x128xf32>
    %30 = tpu.matmul %14, %29, %cst_19 {dimension_numbers = #tpu.dot_dimension_numbers<[1], [0], [0], [1], [0, 0, 1, 1], [], []>} : vector<8x128xf32>, vector<128x128xf32>, vector<8x128xf32> -> vector<8x128xf32>
    %c4 = arith.constant 4 : index
    %c0_20 = arith.constant 0 : index
    %31 = vector.load %arg3[%c4, %c0_20] : memref<13x128xf32, #tpu.memory_space<vmem>>, vector<1x128xf32>
    %32 = vector.broadcast %31 : vector<1x128xf32> to vector<8x128xf32>
    %33 = arith.addf %30, %32 : vector<8x128xf32>
    %c1152 = arith.constant 1152 : index
    %c0_21 = arith.constant 0 : index
    %34 = vector.load %arg2[%c1152, %c0_21] : memref<2432x128xf32, #tpu.memory_space<vmem>>, vector<128x128xf32>
    %cst_22 = arith.constant dense<0.000000e+00> : vector<8x128xf32>
    %35 = tpu.matmul %7, %34, %cst_22 {dimension_numbers = #tpu.dot_dimension_numbers<[1], [0], [0], [1], [0, 0, 1, 1], [], []>} : vector<8x128xf32>, vector<128x128xf32>, vector<8x128xf32> -> vector<8x128xf32>
    %c9 = arith.constant 9 : index
    %c0_23 = arith.constant 0 : index
    %36 = vector.load %arg3[%c9, %c0_23] : memref<13x128xf32, #tpu.memory_space<vmem>>, vector<1x128xf32>
    %37 = vector.broadcast %36 : vector<1x128xf32> to vector<8x128xf32>
    %38 = arith.addf %35, %37 : vector<8x128xf32>
    %cst_24 = arith.constant 0.000000e+00 : f32
    %39 = vector.broadcast %cst_24 : f32 to vector<8x128xf32>
    %40 = arith.maximumf %38, %39 : vector<8x128xf32>
    %c1280 = arith.constant 1280 : index
    %c0_25 = arith.constant 0 : index
    %41 = vector.load %arg2[%c1280, %c0_25] : memref<2432x128xf32, #tpu.memory_space<vmem>>, vector<128x128xf32>
    %cst_26 = arith.constant dense<0.000000e+00> : vector<8x128xf32>
    %42 = tpu.matmul %40, %41, %cst_26 {dimension_numbers = #tpu.dot_dimension_numbers<[1], [0], [0], [1], [0, 0, 1, 1], [], []>} : vector<8x128xf32>, vector<128x128xf32>, vector<8x128xf32> -> vector<8x128xf32>
    %43 = arith.addf %33, %42 : vector<8x128xf32>
    %cst_27 = arith.constant 0.000000e+00 : f32
    %44 = vector.broadcast %cst_27 : f32 to vector<8x128xf32>
    %45 = arith.maximumf %43, %44 : vector<8x128xf32>
    %c896 = arith.constant 896 : index
    %c0_28 = arith.constant 0 : index
    %46 = vector.load %arg2[%c896, %c0_28] : memref<2432x128xf32, #tpu.memory_space<vmem>>, vector<128x128xf32>
    %cst_29 = arith.constant dense<0.000000e+00> : vector<8x128xf32>
    %47 = tpu.matmul %21, %46, %cst_29 {dimension_numbers = #tpu.dot_dimension_numbers<[1], [0], [0], [1], [0, 0, 1, 1], [], []>} : vector<8x128xf32>, vector<128x128xf32>, vector<8x128xf32> -> vector<8x128xf32>
    %c7 = arith.constant 7 : index
    %c0_30 = arith.constant 0 : index
    %48 = vector.load %arg3[%c7, %c0_30] : memref<13x128xf32, #tpu.memory_space<vmem>>, vector<1x128xf32>
    %49 = vector.broadcast %48 : vector<1x128xf32> to vector<8x128xf32>
    %50 = arith.addf %47, %49 : vector<8x128xf32>
    %51 = tpu.concatenate %7, %14 in 1 : vector<8x128xf32>, vector<8x128xf32> -> vector<8x256xf32>
    %c1664 = arith.constant 1664 : index
    %c0_31 = arith.constant 0 : index
    %52 = vector.load %arg2[%c1664, %c0_31] : memref<2432x128xf32, #tpu.memory_space<vmem>>, vector<256x128xf32>
    %cst_32 = arith.constant dense<0.000000e+00> : vector<8x128xf32>
    %53 = tpu.matmul %51, %52, %cst_32 {dimension_numbers = #tpu.dot_dimension_numbers<[1], [0], [0], [1], [0, 0, 1, 1], [], []>} : vector<8x256xf32>, vector<256x128xf32>, vector<8x128xf32> -> vector<8x128xf32>
    %c11 = arith.constant 11 : index
    %c0_33 = arith.constant 0 : index
    %54 = vector.load %arg3[%c11, %c0_33] : memref<13x128xf32, #tpu.memory_space<vmem>>, vector<1x128xf32>
    %55 = vector.broadcast %54 : vector<1x128xf32> to vector<8x128xf32>
    %56 = arith.addf %53, %55 : vector<8x128xf32>
    %cst_34 = arith.constant 0.000000e+00 : f32
    %57 = vector.broadcast %cst_34 : f32 to vector<8x128xf32>
    %58 = arith.maximumf %56, %57 : vector<8x128xf32>
    %c1920 = arith.constant 1920 : index
    %c0_35 = arith.constant 0 : index
    %59 = vector.load %arg2[%c1920, %c0_35] : memref<2432x128xf32, #tpu.memory_space<vmem>>, vector<128x128xf32>
    %cst_36 = arith.constant dense<0.000000e+00> : vector<8x128xf32>
    %60 = tpu.matmul %58, %59, %cst_36 {dimension_numbers = #tpu.dot_dimension_numbers<[1], [0], [0], [1], [0, 0, 1, 1], [], []>} : vector<8x128xf32>, vector<128x128xf32>, vector<8x128xf32> -> vector<8x128xf32>
    %61 = arith.addf %50, %60 : vector<8x128xf32>
    %cst_37 = arith.constant 0.000000e+00 : f32
    %62 = vector.broadcast %cst_37 : f32 to vector<8x128xf32>
    %63 = arith.maximumf %61, %62 : vector<8x128xf32>
    %64 = tpu.iota {dimensions = array<i32: 1>} : vector<8x128xi32>
    %c2_i32 = arith.constant 2 : i32
    %65 = vector.broadcast %c2_i32 : i32 to vector<8x128xi32>
    %66 = arith.cmpi slt, %64, %65 : vector<8x128xi32>
    %c256 = arith.constant 256 : index
    %c0_38 = arith.constant 0 : index
    %67 = vector.load %arg2[%c256, %c0_38] : memref<2432x128xf32, #tpu.memory_space<vmem>>, vector<128x128xf32>
    %cst_39 = arith.constant dense<0.000000e+00> : vector<8x128xf32>
    %68 = tpu.matmul %28, %67, %cst_39 {dimension_numbers = #tpu.dot_dimension_numbers<[1], [0], [0], [1], [0, 0, 1, 1], [], []>} : vector<8x128xf32>, vector<128x128xf32>, vector<8x128xf32> -> vector<8x128xf32>
    %c2 = arith.constant 2 : index
    %c0_40 = arith.constant 0 : index
    %69 = vector.load %arg3[%c2, %c0_40] : memref<13x128xf32, #tpu.memory_space<vmem>>, vector<1x128xf32>
    %70 = vector.broadcast %69 : vector<1x128xf32> to vector<8x128xf32>
    %71 = arith.addf %68, %70 : vector<8x128xf32>
    %c0_41 = arith.constant 0 : index
    %c0_42 = arith.constant 0 : index
    %72 = vector.load %arg4[%c0_41, %c0_42] : memref<8x384xf32, #tpu.memory_space<vmem>>, vector<8x128xf32>
    tpu.vector_store %arg4[%c0_41, %c0_42], %71 {strides = array<i32>} : memref<8x384xf32, #tpu.memory_space<vmem>>, vector<8x128xf32>,
    %cst_43 = arith.constant -1.000000e+30 : f32
    %73 = vector.broadcast %cst_43 : f32 to vector<8x128xf32>
    %74 = arith.select %66, %71, %73 : vector<8x128xi1>, vector<8x128xf32>
    %cst_44 = arith.constant dense<0xFF800000> : vector<8xf32>
    %75 = vector.multi_reduction <maximumf>, %74, %cst_44 [1] : vector<8x128xf32> to vector<8xf32>
    %76 = vector.shape_cast %75 : vector<8xf32> to vector<8x1xf32>
    %77 = vector.broadcast %76 : vector<8x1xf32> to vector<8x128xf32>
    %78 = arith.subf %74, %77 : vector<8x128xf32>
    %79 = math.exp %78 : vector<8x128xf32>
    %cst_45 = arith.constant dense<0.000000e+00> : vector<8xf32>
    %80 = vector.multi_reduction <add>, %79, %cst_45 [1] : vector<8x128xf32> to vector<8xf32>
    %81 = vector.shape_cast %80 : vector<8xf32> to vector<8x1xf32>
    %82 = tpu.reciprocal %81 {approx = true} : vector<8x1xf32> -> vector<8x1xf32>
    %83 = arith.mulf %81, %82 : vector<8x1xf32>
    %cst_46 = arith.constant 2.000000e+00 : f32
    %84 = vector.broadcast %cst_46 : f32 to vector<8x1xf32>
    %85 = arith.subf %84, %83 : vector<8x1xf32>
    %86 = arith.mulf %82, %85 : vector<8x1xf32>
    %87 = vector.broadcast %86 : vector<8x1xf32> to vector<8x128xf32>
    %88 = arith.mulf %79, %87 : vector<8x128xf32>
    %c0_47 = arith.constant 0 : index
    %c0_48 = arith.constant 0 : index
    %89 = vector.load %arg5[%c0_47, %c0_48] : memref<8x384xf32, #tpu.memory_space<vmem>>, vector<8x128xf32>
    tpu.vector_store %arg5[%c0_47, %c0_48], %88 {strides = array<i32>} : memref<8x384xf32, #tpu.memory_space<vmem>>, vector<8x128xf32>,
    %c640 = arith.constant 640 : index
    %c0_49 = arith.constant 0 : index
    %90 = vector.load %arg2[%c640, %c0_49] : memref<2432x128xf32, #tpu.memory_space<vmem>>, vector<128x128xf32>
    %cst_50 = arith.constant dense<0.000000e+00> : vector<8x128xf32>
    %91 = tpu.matmul %45, %90, %cst_50 {dimension_numbers = #tpu.dot_dimension_numbers<[1], [0], [0], [1], [0, 0, 1, 1], [], []>} : vector<8x128xf32>, vector<128x128xf32>, vector<8x128xf32> -> vector<8x128xf32>
    %c5 = arith.constant 5 : index
    %c0_51 = arith.constant 0 : index
    %92 = vector.load %arg3[%c5, %c0_51] : memref<13x128xf32, #tpu.memory_space<vmem>>, vector<1x128xf32>
    %93 = vector.broadcast %92 : vector<1x128xf32> to vector<8x128xf32>
    %94 = arith.addf %91, %93 : vector<8x128xf32>
    %c1408 = arith.constant 1408 : index
    %c0_52 = arith.constant 0 : index
    %95 = vector.load %arg2[%c1408, %c0_52] : memref<2432x128xf32, #tpu.memory_space<vmem>>, vector<128x128xf32>
    %cst_53 = arith.constant dense<0.000000e+00> : vector<8x128xf32>
    %96 = tpu.matmul %28, %95, %cst_53 {dimension_numbers = #tpu.dot_dimension_numbers<[1], [0], [0], [1], [0, 0, 1, 1], [], []>} : vector<8x128xf32>, vector<128x128xf32>, vector<8x128xf32> -> vector<8x128xf32>
    %c10 = arith.constant 10 : index
    %c0_54 = arith.constant 0 : index
    %97 = vector.load %arg3[%c10, %c0_54] : memref<13x128xf32, #tpu.memory_space<vmem>>, vector<1x128xf32>
    %98 = vector.broadcast %97 : vector<1x128xf32> to vector<8x128xf32>
    %99 = arith.addf %96, %98 : vector<8x128xf32>
    %cst_55 = arith.constant 0.000000e+00 : f32
    %100 = vector.broadcast %cst_55 : f32 to vector<8x128xf32>
    %101 = arith.maximumf %99, %100 : vector<8x128xf32>
    %c1536 = arith.constant 1536 : index
    %c0_56 = arith.constant 0 : index
    %102 = vector.load %arg2[%c1536, %c0_56] : memref<2432x128xf32, #tpu.memory_space<vmem>>, vector<128x128xf32>
    %cst_57 = arith.constant dense<0.000000e+00> : vector<8x128xf32>
    %103 = tpu.matmul %101, %102, %cst_57 {dimension_numbers = #tpu.dot_dimension_numbers<[1], [0], [0], [1], [0, 0, 1, 1], [], []>} : vector<8x128xf32>, vector<128x128xf32>, vector<8x128xf32> -> vector<8x128xf32>
    %104 = arith.addf %94, %103 : vector<8x128xf32>
    %c0_58 = arith.constant 0 : index
    %c128_59 = arith.constant 128 : index
    %105 = vector.load %arg4[%c0_58, %c128_59] : memref<8x384xf32, #tpu.memory_space<vmem>>, vector<8x128xf32>
    tpu.vector_store %arg4[%c0_58, %c128_59], %104 {strides = array<i32>} : memref<8x384xf32, #tpu.memory_space<vmem>>, vector<8x128xf32>,
    %cst_60 = arith.constant -1.000000e+30 : f32
    %106 = vector.broadcast %cst_60 : f32 to vector<8x128xf32>
    %107 = arith.select %66, %104, %106 : vector<8x128xi1>, vector<8x128xf32>
    %cst_61 = arith.constant dense<0xFF800000> : vector<8xf32>
    %108 = vector.multi_reduction <maximumf>, %107, %cst_61 [1] : vector<8x128xf32> to vector<8xf32>
    %109 = vector.shape_cast %108 : vector<8xf32> to vector<8x1xf32>
    %110 = vector.broadcast %109 : vector<8x1xf32> to vector<8x128xf32>
    %111 = arith.subf %107, %110 : vector<8x128xf32>
    %112 = math.exp %111 : vector<8x128xf32>
    %cst_62 = arith.constant dense<0.000000e+00> : vector<8xf32>
    %113 = vector.multi_reduction <add>, %112, %cst_62 [1] : vector<8x128xf32> to vector<8xf32>
    %114 = vector.shape_cast %113 : vector<8xf32> to vector<8x1xf32>
    %115 = tpu.reciprocal %114 {approx = true} : vector<8x1xf32> -> vector<8x1xf32>
    %116 = arith.mulf %114, %115 : vector<8x1xf32>
    %cst_63 = arith.constant 2.000000e+00 : f32
    %117 = vector.broadcast %cst_63 : f32 to vector<8x1xf32>
    %118 = arith.subf %117, %116 : vector<8x1xf32>
    %119 = arith.mulf %115, %118 : vector<8x1xf32>
    %120 = vector.broadcast %119 : vector<8x1xf32> to vector<8x128xf32>
    %121 = arith.mulf %112, %120 : vector<8x128xf32>
    %c0_64 = arith.constant 0 : index
    %c128_65 = arith.constant 128 : index
    %122 = vector.load %arg5[%c0_64, %c128_65] : memref<8x384xf32, #tpu.memory_space<vmem>>, vector<8x128xf32>
    tpu.vector_store %arg5[%c0_64, %c128_65], %121 {strides = array<i32>} : memref<8x384xf32, #tpu.memory_space<vmem>>, vector<8x128xf32>,
    %c1024 = arith.constant 1024 : index
    %c0_66 = arith.constant 0 : index
    %123 = vector.load %arg2[%c1024, %c0_66] : memref<2432x128xf32, #tpu.memory_space<vmem>>, vector<128x128xf32>
    %cst_67 = arith.constant dense<0.000000e+00> : vector<8x128xf32>
    %124 = tpu.matmul %63, %123, %cst_67 {dimension_numbers = #tpu.dot_dimension_numbers<[1], [0], [0], [1], [0, 0, 1, 1], [], []>} : vector<8x128xf32>, vector<128x128xf32>, vector<8x128xf32> -> vector<8x128xf32>
    %c8 = arith.constant 8 : index
    %c0_68 = arith.constant 0 : index
    %125 = vector.load %arg3[%c8, %c0_68] : memref<13x128xf32, #tpu.memory_space<vmem>>, vector<1x128xf32>
    %126 = vector.broadcast %125 : vector<1x128xf32> to vector<8x128xf32>
    %127 = arith.addf %124, %126 : vector<8x128xf32>
    %128 = tpu.concatenate %28, %45 in 1 : vector<8x128xf32>, vector<8x128xf32> -> vector<8x256xf32>
    %c2048 = arith.constant 2048 : index
    %c0_69 = arith.constant 0 : index
    %129 = vector.load %arg2[%c2048, %c0_69] : memref<2432x128xf32, #tpu.memory_space<vmem>>, vector<256x128xf32>
    %cst_70 = arith.constant dense<0.000000e+00> : vector<8x128xf32>
    %130 = tpu.matmul %128, %129, %cst_70 {dimension_numbers = #tpu.dot_dimension_numbers<[1], [0], [0], [1], [0, 0, 1, 1], [], []>} : vector<8x256xf32>, vector<256x128xf32>, vector<8x128xf32> -> vector<8x128xf32>
    %c12 = arith.constant 12 : index
    %c0_71 = arith.constant 0 : index
    %131 = vector.load %arg3[%c12, %c0_71] : memref<13x128xf32, #tpu.memory_space<vmem>>, vector<1x128xf32>
    %132 = vector.broadcast %131 : vector<1x128xf32> to vector<8x128xf32>
    %133 = arith.addf %130, %132 : vector<8x128xf32>
    %cst_72 = arith.constant 0.000000e+00 : f32
    %134 = vector.broadcast %cst_72 : f32 to vector<8x128xf32>
    %135 = arith.maximumf %133, %134 : vector<8x128xf32>
    %c2304 = arith.constant 2304 : index
    %c0_73 = arith.constant 0 : index
    %136 = vector.load %arg2[%c2304, %c0_73] : memref<2432x128xf32, #tpu.memory_space<vmem>>, vector<128x128xf32>
    %cst_74 = arith.constant dense<0.000000e+00> : vector<8x128xf32>
    %137 = tpu.matmul %135, %136, %cst_74 {dimension_numbers = #tpu.dot_dimension_numbers<[1], [0], [0], [1], [0, 0, 1, 1], [], []>} : vector<8x128xf32>, vector<128x128xf32>, vector<8x128xf32> -> vector<8x128xf32>
    %138 = arith.addf %127, %137 : vector<8x128xf32>
    %c0_75 = arith.constant 0 : index
    %c256_76 = arith.constant 256 : index
    %139 = vector.load %arg4[%c0_75, %c256_76] : memref<8x384xf32, #tpu.memory_space<vmem>>, vector<8x128xf32>
    tpu.vector_store %arg4[%c0_75, %c256_76], %138 {strides = array<i32>} : memref<8x384xf32, #tpu.memory_space<vmem>>, vector<8x128xf32>,
    %cst_77 = arith.constant -1.000000e+30 : f32
    %140 = vector.broadcast %cst_77 : f32 to vector<8x128xf32>
    %141 = arith.select %66, %138, %140 : vector<8x128xi1>, vector<8x128xf32>
    %cst_78 = arith.constant dense<0xFF800000> : vector<8xf32>
    %142 = vector.multi_reduction <maximumf>, %141, %cst_78 [1] : vector<8x128xf32> to vector<8xf32>
    %143 = vector.shape_cast %142 : vector<8xf32> to vector<8x1xf32>
    %144 = vector.broadcast %143 : vector<8x1xf32> to vector<8x128xf32>
    %145 = arith.subf %141, %144 : vector<8x128xf32>
    %146 = math.exp %145 : vector<8x128xf32>
    %cst_79 = arith.constant dense<0.000000e+00> : vector<8xf32>
    %147 = vector.multi_reduction <add>, %146, %cst_79 [1] : vector<8x128xf32> to vector<8xf32>
    %148 = vector.shape_cast %147 : vector<8xf32> to vector<8x1xf32>
    %149 = tpu.reciprocal %148 {approx = true} : vector<8x1xf32> -> vector<8x1xf32>
    %150 = arith.mulf %148, %149 : vector<8x1xf32>
    %cst_80 = arith.constant 2.000000e+00 : f32
    %151 = vector.broadcast %cst_80 : f32 to vector<8x1xf32>
    %152 = arith.subf %151, %150 : vector<8x1xf32>
    %153 = arith.mulf %149, %152 : vector<8x1xf32>
    %154 = vector.broadcast %153 : vector<8x1xf32> to vector<8x128xf32>
    %155 = arith.mulf %146, %154 : vector<8x128xf32>
    %c0_81 = arith.constant 0 : index
    %c256_82 = arith.constant 256 : index
    %156 = vector.load %arg5[%c0_81, %c256_82] : memref<8x384xf32, #tpu.memory_space<vmem>>, vector<8x128xf32>
    tpu.vector_store %arg5[%c0_81, %c256_82], %155 {strides = array<i32>} : memref<8x384xf32, #tpu.memory_space<vmem>>, vector<8x128xf32>,
    return
  }
  func.func @transform_0(%arg0: i32) -> (i32, i32) {
    %c0_i32 = arith.constant 0 : i32
    %c0_i32_0 = arith.constant 0 : i32
    return %arg0, %c0_i32 : i32, i32
  }
  func.func @transform_1(%arg0: i32) -> (i32, i32) {
    %c0_i32 = arith.constant 0 : i32
    %c0_i32_0 = arith.constant 0 : i32
    %c0_i32_1 = arith.constant 0 : i32
    return %c0_i32, %c0_i32_0 : i32, i32
  }
  func.func @transform_2(%arg0: i32) -> (i32, i32) {
    %c0_i32 = arith.constant 0 : i32
    %c0_i32_0 = arith.constant 0 : i32
    %c0_i32_1 = arith.constant 0 : i32
    return %c0_i32, %c0_i32_0 : i32, i32
  }
  func.func @transform_3(%arg0: i32) -> (i32, i32) {
    %c0_i32 = arith.constant 0 : i32
    %c0_i32_0 = arith.constant 0 : i32
    return %arg0, %c0_i32 : i32, i32
  }
  func.func @transform_4(%arg0: i32) -> (i32, i32) {
    %c0_i32 = arith.constant 0 : i32
    %c0_i32_0 = arith.constant 0 : i32
    return %arg0, %c0_i32 : i32, i32
  }
}

module attributes {stable_mosaic.version = 11 : i64} {
  func.func @_fused_progressive_kernel(%arg0: i32, %arg1: memref<8x128xf32, #tpu.memory_space<vmem>>, %arg2: memref<2432x128xf32, #tpu.memory_space<vmem>>, %arg3: memref<13x128xf32, #tpu.memory_space<vmem>>, %arg4: memref<8x384xf32, #tpu.memory_space<vmem>>, %arg5: memref<8x384xf32, #tpu.memory_space<vmem>>) attributes {dimension_semantics = [#tpu.dimension_semantics<parallel>], iteration_bounds = array<i64: 1>, scalar_prefetch = 0 : i64, scratch_operands = 0 : i64, tpu.core_type = #tpu.core_type<tc>, window_params = [{transform_indices = @transform_0, window_bounds = array<i64: 8, 128>}, {pipeline_mode = #tpu.pipeline_mode<synchronous>, transform_indices = @transform_1, window_bounds = array<i64: 2432, 128>}, {pipeline_mode = #tpu.pipeline_mode<synchronous>, transform_indices = @transform_2, window_bounds = array<i64: 13, 128>}, {transform_indices = @transform_3, window_bounds = array<i64: 8, 384>}, {transform_indices = @transform_4, window_bounds = array<i64: 8, 384>}]} {
    %c0 = arith.constant 0 : index
    %c0_0 = arith.constant 0 : index
    %0 = vector.load %arg1[%c0, %c0_0] : memref<8x128xf32, #tpu.memory_space<vmem>>, vector<8x128xf32>
    %c0_1 = arith.constant 0 : index
    %c0_2 = arith.constant 0 : index
    %1 = vector.load %arg2[%c0_1, %c0_2] : memref<2432x128xf32, #tpu.memory_space<vmem>>, vector<128x128xf32>
    %cst = arith.constant dense<0.000000e+00> : vector<8x128xf32>
    %2 = tpu.matmul %0, %1, %cst {dimension_numbers = #tpu.dot_dimension_numbers<[1], [0], [0], [1], [0, 0, 1, 1], [], []>} : vector<8x128xf32>, vector<128x128xf32>, vector<8x128xf32> -> vector<8x128xf32>
    %c0_3 = arith.constant 0 : index
    %c0_4 = arith.constant 0 : index
    %3 = vector.load %arg3[%c0_3, %c0_4] : memref<13x128xf32, #tpu.memory_space<vmem>>, vector<1x128xf32>
    %4 = vector.broadcast %3 : vector<1x128xf32> to vector<8x128xf32>
    %5 = arith.addf %2, %4 : vector<8x128xf32>
    %cst_5 = arith.constant 0.000000e+00 : f32
    %6 = vector.broadcast %cst_5 : f32 to vector<8x128xf32>
    %7 = arith.maximumf %5, %6 : vector<8x128xf32>
    %c384 = arith.constant 384 : index
    %c0_6 = arith.constant 0 : index
    %8 = vector.load %arg2[%c384, %c0_6] : memref<2432x128xf32, #tpu.memory_space<vmem>>, vector<128x128xf32>
    %cst_7 = arith.constant dense<0.000000e+00> : vector<8x128xf32>
    %9 = tpu.matmul %0, %8, %cst_7 {dimension_numbers = #tpu.dot_dimension_numbers<[1], [0], [0], [1], [0, 0, 1, 1], [], []>} : vector<8x128xf32>, vector<128x128xf32>, vector<8x128xf32> -> vector<8x128xf32>
    %c3 = arith.constant 3 : index
    %c0_8 = arith.constant 0 : index
    %10 = vector.load %arg3[%c3, %c0_8] : memref<13x128xf32, #tpu.memory_space<vmem>>, vector<1x128xf32>
    %11 = vector.broadcast %10 : vector<1x128xf32> to vector<8x128xf32>
    %12 = arith.addf %9, %11 : vector<8x128xf32>
    %cst_9 = arith.constant 0.000000e+00 : f32
    %13 = vector.broadcast %cst_9 : f32 to vector<8x128xf32>
    %14 = arith.maximumf %12, %13 : vector<8x128xf32>
    %c768 = arith.constant 768 : index
    %c0_10 = arith.constant 0 : index
    %15 = vector.load %arg2[%c768, %c0_10] : memref<2432x128xf32, #tpu.memory_space<vmem>>, vector<128x128xf32>
    %cst_11 = arith.constant dense<0.000000e+00> : vector<8x128xf32>
    %16 = tpu.matmul %0, %15, %cst_11 {dimension_numbers = #tpu.dot_dimension_numbers<[1], [0], [0], [1], [0, 0, 1, 1], [], []>} : vector<8x128xf32>, vector<128x128xf32>, vector<8x128xf32> -> vector<8x128xf32>
    %c6 = arith.constant 6 : index
    %c0_12 = arith.constant 0 : index
    %17 = vector.load %arg3[%c6, %c0_12] : memref<13x128xf32, #tpu.memory_space<vmem>>, vector<1x128xf32>
    %18 = vector.broadcast %17 : vector<1x128xf32> to vector<8x128xf32>
    %19 = arith.addf %16, %18 : vector<8x128xf32>
    %cst_13 = arith.constant 0.000000e+00 : f32
    %20 = vector.broadcast %cst_13 : f32 to vector<8x128xf32>
    %21 = arith.maximumf %19, %20 : vector<8x128xf32>
    %c128 = arith.constant 128 : index
    %c0_14 = arith.constant 0 : index
    %22 = vector.load %arg2[%c128, %c0_14] : memref<2432x128xf32, #tpu.memory_space<vmem>>, vector<128x128xf32>
    %cst_15 = arith.constant dense<0.000000e+00> : vector<8x128xf32>
    %23 = tpu.matmul %7, %22, %cst_15 {dimension_numbers = #tpu.dot_dimension_numbers<[1], [0], [0], [1], [0, 0, 1, 1], [], []>} : vector<8x128xf32>, vector<128x128xf32>, vector<8x128xf32> -> vector<8x128xf32>
    %c1 = arith.constant 1 : index
    %c0_16 = arith.constant 0 : index
    %24 = vector.load %arg3[%c1, %c0_16] : memref<13x128xf32, #tpu.memory_space<vmem>>, vector<1x128xf32>
    %25 = vector.broadcast %24 : vector<1x128xf32> to vector<8x128xf32>
    %26 = arith.addf %23, %25 : vector<8x128xf32>
    %cst_17 = arith.constant 0.000000e+00 : f32
    %27 = vector.broadcast %cst_17 : f32 to vector<8x128xf32>
    %28 = arith.maximumf %26, %27 : vector<8x128xf32>
    %c512 = arith.constant 512 : index
    %c0_18 = arith.constant 0 : index
    %29 = vector.load %arg2[%c512, %c0_18] : memref<2432x128xf32, #tpu.memory_space<vmem>>, vector<128x128xf32>
    %cst_19 = arith.constant dense<0.000000e+00> : vector<8x128xf32>
    %30 = tpu.matmul %14, %29, %cst_19 {dimension_numbers = #tpu.dot_dimension_numbers<[1], [0], [0], [1], [0, 0, 1, 1], [], []>} : vector<8x128xf32>, vector<128x128xf32>, vector<8x128xf32> -> vector<8x128xf32>
    %c4 = arith.constant 4 : index
    %c0_20 = arith.constant 0 : index
    %31 = vector.load %arg3[%c4, %c0_20] : memref<13x128xf32, #tpu.memory_space<vmem>>, vector<1x128xf32>
    %32 = vector.broadcast %31 : vector<1x128xf32> to vector<8x128xf32>
    %33 = arith.addf %30, %32 : vector<8x128xf32>
    %c1152 = arith.constant 1152 : index
    %c0_21 = arith.constant 0 : index
    %34 = vector.load %arg2[%c1152, %c0_21] : memref<2432x128xf32, #tpu.memory_space<vmem>>, vector<128x128xf32>
    %cst_22 = arith.constant dense<0.000000e+00> : vector<8x128xf32>
    %35 = tpu.matmul %7, %34, %cst_22 {dimension_numbers = #tpu.dot_dimension_numbers<[1], [0], [0], [1], [0, 0, 1, 1], [], []>} : vector<8x128xf32>, vector<128x128xf32>, vector<8x128xf32> -> vector<8x128xf32>
    %c9 = arith.constant 9 : index
    %c0_23 = arith.constant 0 : index
    %36 = vector.load %arg3[%c9, %c0_23] : memref<13x128xf32, #tpu.memory_space<vmem>>, vector<1x128xf32>
    %37 = vector.broadcast %36 : vector<1x128xf32> to vector<8x128xf32>
    %38 = arith.addf %35, %37 : vector<8x128xf32>
    %cst_24 = arith.constant 0.000000e+00 : f32
    %39 = vector.broadcast %cst_24 : f32 to vector<8x128xf32>
    %40 = arith.maximumf %38, %39 : vector<8x128xf32>
    %c1280 = arith.constant 1280 : index
    %c0_25 = arith.constant 0 : index
    %41 = vector.load %arg2[%c1280, %c0_25] : memref<2432x128xf32, #tpu.memory_space<vmem>>, vector<128x128xf32>
    %cst_26 = arith.constant dense<0.000000e+00> : vector<8x128xf32>
    %42 = tpu.matmul %40, %41, %cst_26 {dimension_numbers = #tpu.dot_dimension_numbers<[1], [0], [0], [1], [0, 0, 1, 1], [], []>} : vector<8x128xf32>, vector<128x128xf32>, vector<8x128xf32> -> vector<8x128xf32>
    %43 = arith.addf %33, %42 : vector<8x128xf32>
    %cst_27 = arith.constant 0.000000e+00 : f32
    %44 = vector.broadcast %cst_27 : f32 to vector<8x128xf32>
    %45 = arith.maximumf %43, %44 : vector<8x128xf32>
    %c896 = arith.constant 896 : index
    %c0_28 = arith.constant 0 : index
    %46 = vector.load %arg2[%c896, %c0_28] : memref<2432x128xf32, #tpu.memory_space<vmem>>, vector<128x128xf32>
    %cst_29 = arith.constant dense<0.000000e+00> : vector<8x128xf32>
    %47 = tpu.matmul %21, %46, %cst_29 {dimension_numbers = #tpu.dot_dimension_numbers<[1], [0], [0], [1], [0, 0, 1, 1], [], []>} : vector<8x128xf32>, vector<128x128xf32>, vector<8x128xf32> -> vector<8x128xf32>
    %c7 = arith.constant 7 : index
    %c0_30 = arith.constant 0 : index
    %48 = vector.load %arg3[%c7, %c0_30] : memref<13x128xf32, #tpu.memory_space<vmem>>, vector<1x128xf32>
    %49 = vector.broadcast %48 : vector<1x128xf32> to vector<8x128xf32>
    %50 = arith.addf %47, %49 : vector<8x128xf32>
    %51 = tpu.concatenate %7, %14 in 1 : vector<8x128xf32>, vector<8x128xf32> -> vector<8x256xf32>
    %c1664 = arith.constant 1664 : index
    %c0_31 = arith.constant 0 : index
    %52 = vector.load %arg2[%c1664, %c0_31] : memref<2432x128xf32, #tpu.memory_space<vmem>>, vector<256x128xf32>
    %cst_32 = arith.constant dense<0.000000e+00> : vector<8x128xf32>
    %53 = tpu.matmul %51, %52, %cst_32 {dimension_numbers = #tpu.dot_dimension_numbers<[1], [0], [0], [1], [0, 0, 1, 1], [], []>} : vector<8x256xf32>, vector<256x128xf32>, vector<8x128xf32> -> vector<8x128xf32>
    %c11 = arith.constant 11 : index
    %c0_33 = arith.constant 0 : index
    %54 = vector.load %arg3[%c11, %c0_33] : memref<13x128xf32, #tpu.memory_space<vmem>>, vector<1x128xf32>
    %55 = vector.broadcast %54 : vector<1x128xf32> to vector<8x128xf32>
    %56 = arith.addf %53, %55 : vector<8x128xf32>
    %cst_34 = arith.constant 0.000000e+00 : f32
    %57 = vector.broadcast %cst_34 : f32 to vector<8x128xf32>
    %58 = arith.maximumf %56, %57 : vector<8x128xf32>
    %c1920 = arith.constant 1920 : index
    %c0_35 = arith.constant 0 : index
    %59 = vector.load %arg2[%c1920, %c0_35] : memref<2432x128xf32, #tpu.memory_space<vmem>>, vector<128x128xf32>
    %cst_36 = arith.constant dense<0.000000e+00> : vector<8x128xf32>
    %60 = tpu.matmul %58, %59, %cst_36 {dimension_numbers = #tpu.dot_dimension_numbers<[1], [0], [0], [1], [0, 0, 1, 1], [], []>} : vector<8x128xf32>, vector<128x128xf32>, vector<8x128xf32> -> vector<8x128xf32>
    %61 = arith.addf %50, %60 : vector<8x128xf32>
    %cst_37 = arith.constant 0.000000e+00 : f32
    %62 = vector.broadcast %cst_37 : f32 to vector<8x128xf32>
    %63 = arith.maximumf %61, %62 : vector<8x128xf32>
    %64 = tpu.iota {dimensions = array<i32: 1>} : vector<8x128xi32>
    %c2_i32 = arith.constant 2 : i32
    %65 = vector.broadcast %c2_i32 : i32 to vector<8x128xi32>
    %66 = arith.cmpi slt, %64, %65 : vector<8x128xi32>
    %c256 = arith.constant 256 : index
    %c0_38 = arith.constant 0 : index
    %67 = vector.load %arg2[%c256, %c0_38] : memref<2432x128xf32, #tpu.memory_space<vmem>>, vector<128x128xf32>
    %cst_39 = arith.constant dense<0.000000e+00> : vector<8x128xf32>
    %68 = tpu.matmul %28, %67, %cst_39 {dimension_numbers = #tpu.dot_dimension_numbers<[1], [0], [0], [1], [0, 0, 1, 1], [], []>} : vector<8x128xf32>, vector<128x128xf32>, vector<8x128xf32> -> vector<8x128xf32>
    %c2 = arith.constant 2 : index
    %c0_40 = arith.constant 0 : index
    %69 = vector.load %arg3[%c2, %c0_40] : memref<13x128xf32, #tpu.memory_space<vmem>>, vector<1x128xf32>
    %70 = vector.broadcast %69 : vector<1x128xf32> to vector<8x128xf32>
    %71 = arith.addf %68, %70 : vector<8x128xf32>
    %c0_41 = arith.constant 0 : index
    %c0_42 = arith.constant 0 : index
    %72 = vector.load %arg4[%c0_41, %c0_42] : memref<8x384xf32, #tpu.memory_space<vmem>>, vector<8x128xf32>
    tpu.vector_store %arg4[%c0_41, %c0_42], %71 {strides = array<i32>} : memref<8x384xf32, #tpu.memory_space<vmem>>, vector<8x128xf32>,
    %cst_43 = arith.constant -1.000000e+30 : f32
    %73 = vector.broadcast %cst_43 : f32 to vector<8x128xf32>
    %74 = arith.select %66, %71, %73 : vector<8x128xi1>, vector<8x128xf32>
    %cst_44 = arith.constant dense<0xFF800000> : vector<8xf32>
    %75 = vector.multi_reduction <maximumf>, %74, %cst_44 [1] : vector<8x128xf32> to vector<8xf32>
    %76 = vector.shape_cast %75 : vector<8xf32> to vector<8x1xf32>
    %77 = vector.broadcast %76 : vector<8x1xf32> to vector<8x128xf32>
    %78 = arith.subf %74, %77 : vector<8x128xf32>
    %79 = math.exp %78 : vector<8x128xf32>
    %cst_45 = arith.constant dense<0.000000e+00> : vector<8xf32>
    %80 = vector.multi_reduction <add>, %79, %cst_45 [1] : vector<8x128xf32> to vector<8xf32>
    %81 = vector.shape_cast %80 : vector<8xf32> to vector<8x1xf32>
    %82 = tpu.reciprocal %81 {approx = true} : vector<8x1xf32> -> vector<8x1xf32>
    %83 = arith.mulf %81, %82 : vector<8x1xf32>
    %cst_46 = arith.constant 2.000000e+00 : f32
    %84 = vector.broadcast %cst_46 : f32 to vector<8x1xf32>
    %85 = arith.subf %84, %83 : vector<8x1xf32>
    %86 = arith.mulf %82, %85 : vector<8x1xf32>
    %87 = vector.broadcast %86 : vector<8x1xf32> to vector<8x128xf32>
    %88 = arith.mulf %79, %87 : vector<8x128xf32>
    %c0_47 = arith.constant 0 : index
    %c0_48 = arith.constant 0 : index
    %89 = vector.load %arg5[%c0_47, %c0_48] : memref<8x384xf32, #tpu.memory_space<vmem>>, vector<8x128xf32>
    tpu.vector_store %arg5[%c0_47, %c0_48], %88 {strides = array<i32>} : memref<8x384xf32, #tpu.memory_space<vmem>>, vector<8x128xf32>,
    %c640 = arith.constant 640 : index
    %c0_49 = arith.constant 0 : index
    %90 = vector.load %arg2[%c640, %c0_49] : memref<2432x128xf32, #tpu.memory_space<vmem>>, vector<128x128xf32>
    %cst_50 = arith.constant dense<0.000000e+00> : vector<8x128xf32>
    %91 = tpu.matmul %45, %90, %cst_50 {dimension_numbers = #tpu.dot_dimension_numbers<[1], [0], [0], [1], [0, 0, 1, 1], [], []>} : vector<8x128xf32>, vector<128x128xf32>, vector<8x128xf32> -> vector<8x128xf32>
    %c5 = arith.constant 5 : index
    %c0_51 = arith.constant 0 : index
    %92 = vector.load %arg3[%c5, %c0_51] : memref<13x128xf32, #tpu.memory_space<vmem>>, vector<1x128xf32>
    %93 = vector.broadcast %92 : vector<1x128xf32> to vector<8x128xf32>
    %94 = arith.addf %91, %93 : vector<8x128xf32>
    %c1408 = arith.constant 1408 : index
    %c0_52 = arith.constant 0 : index
    %95 = vector.load %arg2[%c1408, %c0_52] : memref<2432x128xf32, #tpu.memory_space<vmem>>, vector<128x128xf32>
    %cst_53 = arith.constant dense<0.000000e+00> : vector<8x128xf32>
    %96 = tpu.matmul %28, %95, %cst_53 {dimension_numbers = #tpu.dot_dimension_numbers<[1], [0], [0], [1], [0, 0, 1, 1], [], []>} : vector<8x128xf32>, vector<128x128xf32>, vector<8x128xf32> -> vector<8x128xf32>
    %c10 = arith.constant 10 : index
    %c0_54 = arith.constant 0 : index
    %97 = vector.load %arg3[%c10, %c0_54] : memref<13x128xf32, #tpu.memory_space<vmem>>, vector<1x128xf32>
    %98 = vector.broadcast %97 : vector<1x128xf32> to vector<8x128xf32>
    %99 = arith.addf %96, %98 : vector<8x128xf32>
    %cst_55 = arith.constant 0.000000e+00 : f32
    %100 = vector.broadcast %cst_55 : f32 to vector<8x128xf32>
    %101 = arith.maximumf %99, %100 : vector<8x128xf32>
    %c1536 = arith.constant 1536 : index
    %c0_56 = arith.constant 0 : index
    %102 = vector.load %arg2[%c1536, %c0_56] : memref<2432x128xf32, #tpu.memory_space<vmem>>, vector<128x128xf32>
    %cst_57 = arith.constant dense<0.000000e+00> : vector<8x128xf32>
    %103 = tpu.matmul %101, %102, %cst_57 {dimension_numbers = #tpu.dot_dimension_numbers<[1], [0], [0], [1], [0, 0, 1, 1], [], []>} : vector<8x128xf32>, vector<128x128xf32>, vector<8x128xf32> -> vector<8x128xf32>
    %104 = arith.addf %94, %103 : vector<8x128xf32>
    %c0_58 = arith.constant 0 : index
    %c128_59 = arith.constant 128 : index
    %105 = vector.load %arg4[%c0_58, %c128_59] : memref<8x384xf32, #tpu.memory_space<vmem>>, vector<8x128xf32>
    tpu.vector_store %arg4[%c0_58, %c128_59], %104 {strides = array<i32>} : memref<8x384xf32, #tpu.memory_space<vmem>>, vector<8x128xf32>,
    %cst_60 = arith.constant -1.000000e+30 : f32
    %106 = vector.broadcast %cst_60 : f32 to vector<8x128xf32>
    %107 = arith.select %66, %104, %106 : vector<8x128xi1>, vector<8x128xf32>
    %cst_61 = arith.constant dense<0xFF800000> : vector<8xf32>
    %108 = vector.multi_reduction <maximumf>, %107, %cst_61 [1] : vector<8x128xf32> to vector<8xf32>
    %109 = vector.shape_cast %108 : vector<8xf32> to vector<8x1xf32>
    %110 = vector.broadcast %109 : vector<8x1xf32> to vector<8x128xf32>
    %111 = arith.subf %107, %110 : vector<8x128xf32>
    %112 = math.exp %111 : vector<8x128xf32>
    %cst_62 = arith.constant dense<0.000000e+00> : vector<8xf32>
    %113 = vector.multi_reduction <add>, %112, %cst_62 [1] : vector<8x128xf32> to vector<8xf32>
    %114 = vector.shape_cast %113 : vector<8xf32> to vector<8x1xf32>
    %115 = tpu.reciprocal %114 {approx = true} : vector<8x1xf32> -> vector<8x1xf32>
    %116 = arith.mulf %114, %115 : vector<8x1xf32>
    %cst_63 = arith.constant 2.000000e+00 : f32
    %117 = vector.broadcast %cst_63 : f32 to vector<8x1xf32>
    %118 = arith.subf %117, %116 : vector<8x1xf32>
    %119 = arith.mulf %115, %118 : vector<8x1xf32>
    %120 = vector.broadcast %119 : vector<8x1xf32> to vector<8x128xf32>
    %121 = arith.mulf %112, %120 : vector<8x128xf32>
    %c0_64 = arith.constant 0 : index
    %c128_65 = arith.constant 128 : index
    %122 = vector.load %arg5[%c0_64, %c128_65] : memref<8x384xf32, #tpu.memory_space<vmem>>, vector<8x128xf32>
    tpu.vector_store %arg5[%c0_64, %c128_65], %121 {strides = array<i32>} : memref<8x384xf32, #tpu.memory_space<vmem>>, vector<8x128xf32>,
    %c1024 = arith.constant 1024 : index
    %c0_66 = arith.constant 0 : index
    %123 = vector.load %arg2[%c1024, %c0_66] : memref<2432x128xf32, #tpu.memory_space<vmem>>, vector<128x128xf32>
    %cst_67 = arith.constant dense<0.000000e+00> : vector<8x128xf32>
    %124 = tpu.matmul %63, %123, %cst_67 {dimension_numbers = #tpu.dot_dimension_numbers<[1], [0], [0], [1], [0, 0, 1, 1], [], []>} : vector<8x128xf32>, vector<128x128xf32>, vector<8x128xf32> -> vector<8x128xf32>
    %c8 = arith.constant 8 : index
    %c0_68 = arith.constant 0 : index
    %125 = vector.load %arg3[%c8, %c0_68] : memref<13x128xf32, #tpu.memory_space<vmem>>, vector<1x128xf32>
    %126 = vector.broadcast %125 : vector<1x128xf32> to vector<8x128xf32>
    %127 = arith.addf %124, %126 : vector<8x128xf32>
    %128 = tpu.concatenate %28, %45 in 1 : vector<8x128xf32>, vector<8x128xf32> -> vector<8x256xf32>
    %c2048 = arith.constant 2048 : index
    %c0_69 = arith.constant 0 : index
    %129 = vector.load %arg2[%c2048, %c0_69] : memref<2432x128xf32, #tpu.memory_space<vmem>>, vector<256x128xf32>
    %cst_70 = arith.constant dense<0.000000e+00> : vector<8x128xf32>
    %130 = tpu.matmul %128, %129, %cst_70 {dimension_numbers = #tpu.dot_dimension_numbers<[1], [0], [0], [1], [0, 0, 1, 1], [], []>} : vector<8x256xf32>, vector<256x128xf32>, vector<8x128xf32> -> vector<8x128xf32>
    %c12 = arith.constant 12 : index
    %c0_71 = arith.constant 0 : index
    %131 = vector.load %arg3[%c12, %c0_71] : memref<13x128xf32, #tpu.memory_space<vmem>>, vector<1x128xf32>
    %132 = vector.broadcast %131 : vector<1x128xf32> to vector<8x128xf32>
    %133 = arith.addf %130, %132 : vector<8x128xf32>
    %cst_72 = arith.constant 0.000000e+00 : f32
    %134 = vector.broadcast %cst_72 : f32 to vector<8x128xf32>
    %135 = arith.maximumf %133, %134 : vector<8x128xf32>
    %c2304 = arith.constant 2304 : index
    %c0_73 = arith.constant 0 : index
    %136 = vector.load %arg2[%c2304, %c0_73] : memref<2432x128xf32, #tpu.memory_space<vmem>>, vector<128x128xf32>
    %cst_74 = arith.constant dense<0.000000e+00> : vector<8x128xf32>
    %137 = tpu.matmul %135, %136, %cst_74 {dimension_numbers = #tpu.dot_dimension_numbers<[1], [0], [0], [1], [0, 0, 1, 1], [], []>} : vector<8x128xf32>, vector<128x128xf32>, vector<8x128xf32> -> vector<8x128xf32>
    %138 = arith.addf %127, %137 : vector<8x128xf32>
    %c0_75 = arith.constant 0 : index
    %c256_76 = arith.constant 256 : index
    %139 = vector.load %arg4[%c0_75, %c256_76] : memref<8x384xf32, #tpu.memory_space<vmem>>, vector<8x128xf32>
    tpu.vector_store %arg4[%c0_75, %c256_76], %138 {strides = array<i32>} : memref<8x384xf32, #tpu.memory_space<vmem>>, vector<8x128xf32>,
    %cst_77 = arith.constant -1.000000e+30 : f32
    %140 = vector.broadcast %cst_77 : f32 to vector<8x128xf32>
    %141 = arith.select %66, %138, %140 : vector<8x128xi1>, vector<8x128xf32>
    %cst_78 = arith.constant dense<0xFF800000> : vector<8xf32>
    %142 = vector.multi_reduction <maximumf>, %141, %cst_78 [1] : vector<8x128xf32> to vector<8xf32>
    %143 = vector.shape_cast %142 : vector<8xf32> to vector<8x1xf32>
    %144 = vector.broadcast %143 : vector<8x1xf32> to vector<8x128xf32>
    %145 = arith.subf %141, %144 : vector<8x128xf32>
    %146 = math.exp %145 : vector<8x128xf32>
    %cst_79 = arith.constant dense<0.000000e+00> : vector<8xf32>
    %147 = vector.multi_reduction <add>, %146, %cst_79 [1] : vector<8x128xf32> to vector<8xf32>
    %148 = vector.shape_cast %147 : vector<8xf32> to vector<8x1xf32>
    %149 = tpu.reciprocal %148 {approx = true} : vector<8x1xf32> -> vector<8x1xf32>
    %150 = arith.mulf %148, %149 : vector<8x1xf32>
    %cst_80 = arith.constant 2.000000e+00 : f32
    %151 = vector.broadcast %cst_80 : f32 to vector<8x1xf32>
    %152 = arith.subf %151, %150 : vector<8x1xf32>
    %153 = arith.mulf %149, %152 : vector<8x1xf32>
    %154 = vector.broadcast %153 : vector<8x1xf32> to vector<8x128xf32>
    %155 = arith.mulf %146, %154 : vector<8x128xf32>
    %c0_81 = arith.constant 0 : index
    %c256_82 = arith.constant 256 : index
    %156 = vector.load %arg5[%c0_81, %c256_82] : memref<8x384xf32, #tpu.memory_space<vmem>>, vector<8x128xf32>
    tpu.vector_store %arg5[%c0_81, %c256_82], %155 {strides = array<i32>} : memref<8x384xf32, #tpu.memory_space<vmem>>, vector<8x128xf32>,
    return
  }
  func.func @transform_0(%arg0: i32) -> (i32, i32) {
    %c0_i32 = arith.constant 0 : i32
    %c0_i32_0 = arith.constant 0 : i32
    return %arg0, %c0_i32 : i32, i32
  }
  func.func @transform_1(%arg0: i32) -> (i32, i32) {
    %c0_i32 = arith.constant 0 : i32
    %c0_i32_0 = arith.constant 0 : i32
    %c0_i32_1 = arith.constant 0 : i32
    return %c0_i32, %c0_i32_0 : i32, i32
  }
  func.func @transform_2(%arg0: i32) -> (i32, i32) {
    %c0_i32 = arith.constant 0 : i32
    %c0_i32_0 = arith.constant 0 : i32
    %c0_i32_1 = arith.constant 0 : i32
    return %c0_i32, %c0_i32_0 : i32, i32
  }
  func.func @transform_3(%arg0: i32) -> (i32, i32) {
    %c0_i32 = arith.constant 0 : i32
    %c0_i32_0 = arith.constant 0 : i32
    return %arg0, %c0_i32 : i32, i32
  }
  func.func @transform_4(%arg0: i32) -> (i32, i32) {
    %c0_i32 = arith.constant 0 : i32
    %c0_i32_0 = arith.constant 0 : i32
    return %arg0, %c0_i32 : i32, i32
  }
}

</mosaic_0001>

<bundles_post_ra>
// kernel: tpu_custom_call.1
= control target key start
LH: loop header
LB: loop body
LE: loop exit
PB: predicated region body
PF: predicated region fallthrough
CT: control target
= control target key end

     0   :  { %10 = vsyncpa [#allocation3], 0  ;;  %s3444_s0 = inlined_call_operand.hbm [shape: f32[8,128], index: 0, kind: input, shape index: {}]   ;;  %s3445_s1 = inlined_call_operand.hbm [shape: f32[2432,128], index: 1, kind: input, shape index: {}]   ;;  %s3446_s2 = inlined_call_operand.hbm [shape: f32[13,128], index: 2, kind: input, shape index: {}]   ;;  %s3447_s3 = inlined_call_operand.hbm [shape: f32[8,384], index: 3, kind: output, shape index: {0}]   ;;  %s3448_s4 = inlined_call_operand.hbm [shape: f32[8,384], index: 4, kind: output, shape index: {1}]  }
   0x1   :  { %11 = vsyncpa [#allocation6], 0 }
   0x2   :  { %12 = vsyncpa [#allocation4], 0 }
   0x3   :  { %13 = vsyncpa [#allocation10], 0  ;;  %s3148_s15 = smov [#allocation5]   ;;  %s3030_s19 = scalar_lea.hbm %s3445_s1, 38912 }
   0x4   :  { %s29_s16 = sshll.u32 %s3148_s15, 4  ;;  %p3031_p0 = scmp.ne.s32.totalorder %s3445_s1, %s3030_s19  ;;  %s30_s16 = int_to_ptr.vmem [resolvable:$true] %s29_s16 }
   0x5   :  { %p3034_p1 = scmp.lt.u32.totalorder %s3030_s19, %s3445_s1 }
   0x7   :  { %p3036_p2 = pnand %p3034_p1, %p3031_p0 }
   0x9   :  { %3039 = shalt.err (!%p3036_p2)
}
   0xa   :  { %s3040_s24 = scalar_lea.vmem %s30_s16, 38912  ;;  %p3045_p4 = scmp.lt.s32.totalorder %s30_s16, %s30_s16 }
   0xb   :  { %p3041_p3 = scmp.ne.s32.totalorder %s30_s16, %s3040_s24  ;;  %p3046_p5 = scmp.lt.s32.totalorder %s3040_s24, %s3040_s24 }
   0xd   :  { %p3047_p6 = por %p3046_p5, %p3045_p4 }
   0xf   :  { %p3048_p7 = pnand %p3047_p6, %p3041_p3 }
  0x11   :  { %3051 = shalt.err (!%p3048_p7)
}
  0x12   :  { %s3149_s25 = smov 128   ;;  %s3150_s26 = smov 8  }
  0x13   :  { %35 = dma.hbm_to_vmem [thread:$0]  %s3445_s1, 38912, %s30_s16, [#allocation6], %s3149_s25, %s3149_s25, %s3150_s26  }
  0x14   :  { %s3151_s29 = smov [#allocation2]   ;;  %s3152_s5 = smov [#allocation7]  }
  0x15   :  { %s20_s30 = sshll.u32 %s3151_s29, 4  ;;  %s41_s6 = sshll.u32 %s3152_s5, 4  ;;  %s21_s30 = int_to_ptr.vmem [resolvable:$true] %s20_s30  ;;  %s42_s6 = int_to_ptr.vmem [resolvable:$true] %s41_s6 }
  0x16   :  { %s3052_s9 = scalar_lea.hbm %s3444_s0, 128 }
  0x17   :  { %p3053_p8 = scmp.ne.s32.totalorder %s3444_s0, %s3052_s9  ;;  %p3056_p9 = scmp.lt.u32.totalorder %s3052_s9, %s3444_s0 }
  0x19   :  { %p3058_p10 = pnand %p3056_p9, %p3053_p8 }
  0x1b   :  { %3061 = shalt.err (!%p3058_p10)
}
  0x1c   :  { %s3062_s1 = scalar_lea.vmem %s21_s30, 128  ;;  %p3067_p12 = scmp.lt.s32.totalorder %s21_s30, %s21_s30 }
  0x1d   :  { %p3063_p11 = scmp.ne.s32.totalorder %s21_s30, %s3062_s1  ;;  %p3068_p13 = scmp.lt.s32.totalorder %s3062_s1, %s3062_s1 }
  0x1f   :  { %p3069_p0 = por %p3068_p13, %p3067_p12 }
  0x21   :  { %p3070_p1 = pnand %p3069_p0, %p3063_p11 }
  0x23   :  { %3073 = shalt.err (!%p3070_p1)
}
  0x24   :  { %23 = dma.hbm_to_vmem [thread:$0]  %s3444_s0, 128, %s21_s30, [#allocation3]  }
  0x25   :  { %s3074_s18 = scalar_lea.hbm %s3446_s2, 256 }
  0x26   :  { %p3075_p2 = scmp.ne.s32.totalorder %s3446_s2, %s3074_s18  ;;  %p3078_p3 = scmp.lt.u32.totalorder %s3074_s18, %s3446_s2 }
  0x28   :  { %p3080_p4 = pnand %p3078_p3, %p3075_p2 }
  0x2a   :  { %3083 = shalt.err (!%p3080_p4)
}
  0x2b   :  { %s3084_s23 = scalar_lea.vmem %s42_s6, 256  ;;  %p3089_p6 = scmp.lt.s32.totalorder %s42_s6, %s42_s6 }
  0x2c   :  { %p3085_p5 = scmp.ne.s32.totalorder %s42_s6, %s3084_s23  ;;  %p3090_p7 = scmp.lt.s32.totalorder %s3084_s23, %s3084_s23 }
  0x2e   :  { %p3091_p8 = por %p3090_p7, %p3089_p6 }
  0x30   :  { %p3092_p9 = pnand %p3091_p8, %p3085_p5 }
  0x32   :  { %3095 = shalt.err (!%p3092_p9)
}
  0x33   :  { %47 = dma.hbm_to_vmem [thread:$0]  %s3446_s2, 256, %s42_s6, [#allocation6], %s3149_s25, %s3149_s25, %s3150_s26  }
  0x34   :  { %3140 = dma.done.wait [#allocation3], 128  }
  0x35   :  { %3141 = vsyncadd [#allocation3], 4294967168 }
  0x36   :  { %3142 = dma.done.wait [#allocation6], 39168  }
  0x37   :  { %3143 = vsyncadd [#allocation6], 4294928128  ;;  %v3153_v0 = vmov 0.0|0.0   ;;  %vm3154_vm0 = vmmov 0   ;;  %v3155_v1 = vmov 0.0   ;;  %v58_v2 = vld [vmem:[#allocation5] sm:$0xff] }
  0x38   :  { %2572 = vmatprep.subr.bf16.mxu0 %v3153_v0  ;;  %2079 = vmatprep.mubr.msk.f32.mxu0 %vm3154_vm0, %v3155_v1  ;;  %v59_v3 = vld [vmem:[#allocation5 + $0x8] sm:$0xff]  ;;  %v60_v4 = vld [vmem:[#allocation5 + $0x10] sm:$0xff]  ;;  %v61_v6 = vld [vmem:[#allocation5 + $0x18] sm:$0xff]  ;;  %s3156_s2 = smov [#allocation8]  }
  0x39   :  { %2596 = vmatprep.subr.bf16.mxu1 %v3153_v0  ;;  %2114 = vmatprep.mubr.msk.f32.mxu1 %vm3154_vm0, %v3155_v1  ;;  %v2573_v5 = vpack.c.bf16 %v59_v3, %v58_v2  ;;  %v2576_v7 = vpack.c.bf16 %v61_v6, %v60_v4  ;;  %v62_v8 = vld [vmem:[#allocation5 + $0x20] sm:$0xff]  ;;  %v63_v9 = vld [vmem:[#allocation5 + $0x28] sm:$0xff]  ;;  %v152_v12 = vld [vmem:[#allocation5 + $0x190] sm:$0xff]  ;;  %s1685_s25 = sshll.u32 %s3156_s2, 4  ;;  %s1686_s25 = int_to_ptr.vmem [resolvable:$true] %s1685_s25 }
  0x3a   :  { %v150_v10 = vld [vmem:[#allocation5 + $0x180] sm:$0xff]  ;;  %v151_v11 = vld [vmem:[#allocation5 + $0x188] sm:$0xff]  ;;  %v153_v13 = vld [vmem:[#allocation5 + $0x198] sm:$0xff]  ;;  %v2579_v14 = vpack.c.bf16 %v63_v9, %v62_v8  ;;  %s3096_s26 = scalar_lea.vmem %s1686_s25, 384  ;;  %p3101_p11 = scmp.lt.s32.totalorder %s1686_s25, %s1686_s25 }
  0x3b   :  { %2574 = vmatpush3.bf16.msra.mxu0 %v2573_v5  ;;  %v2597_v15 = vpack.c.bf16 %v151_v11, %v150_v10  ;;  %v64_v16 = vld [vmem:[#allocation5 + $0x30] sm:$0xff]  ;;  %v65_v17 = vld [vmem:[#allocation5 + $0x38] sm:$0xff]  ;;  %v2600_v18 = vpack.c.bf16 %v153_v13, %v152_v12  ;;  %v154_v19 = vld [vmem:[#allocation5 + $0x1a0] sm:$0xff]  ;;  %p3097_p10 = scmp.ne.s32.totalorder %s1686_s25, %s3096_s26  ;;  %p3102_p12 = scmp.lt.s32.totalorder %s3096_s26, %s3096_s26 }
  0x3c   :  { %2575 = vmatprep.subr.bf16.mxu0 %v3153_v0  ;;  %v155_v20 = vld [vmem:[#allocation5 + $0x1a8] sm:$0xff]  ;;  %v2582_v21 = vpack.c.bf16 %v65_v17, %v64_v16  ;;  %v66_v22 = vld [vmem:[#allocation5 + $0x40] sm:$0xff]  ;;  %v156_v25 = vld [vmem:[#allocation5 + $0x1b0] sm:$0xff] }
  0x3d   :  { %2598 = vmatpush3.bf16.msra.mxu1 %v2597_v15  ;;  %v67_v23 = vld [vmem:[#allocation5 + $0x48] sm:$0xff]  ;;  %v2603_v24 = vpack.c.bf16 %v155_v20, %v154_v19  ;;  %v157_v26 = vld [vmem:[#allocation5 + $0x1b8] sm:$0xff]  ;;  %v68_v28 = vld [vmem:[#allocation5 + $0x50] sm:$0xff]  ;;  %p3103_p13 = por %p3102_p12, %p3101_p11 }
  0x3e   :  { %2599 = vmatprep.subr.bf16.mxu1 %v3153_v0  ;;  %v2585_v27 = vpack.c.bf16 %v67_v23, %v66_v22  ;;  %v69_v29 = vld [vmem:[#allocation5 + $0x58] sm:$0xff]  ;;  %v2606_v30 = vpack.c.bf16 %v157_v26, %v156_v25  ;;  %v158_v31 = vld [vmem:[#allocation5 + $0x1c0] sm:$0xff]  ;;  %v159_v32 = vld [vmem:[#allocation5 + $0x1c8] sm:$0xff] }
  0x3f   :  { %2577 = vmatpush3.bf16.msra.mxu0 %v2576_v7  ;;  %v2588_v33 = vpack.c.bf16 %v69_v29, %v68_v28  ;;  %v70_v34 = vld [vmem:[#allocation5 + $0x60] sm:$0xff]  ;;  %v71_v35 = vld [vmem:[#allocation5 + $0x68] sm:$0xff]  ;;  %v2609_v36 = vpack.c.bf16 %v159_v32, %v158_v31  ;;  %v160_v37 = vld [vmem:[#allocation5 + $0x1d0] sm:$0xff]  ;;  %p3104_p0 = pnand %p3103_p13, %p3097_p10 }
  0x40   :  { %2578 = vmatprep.subr.bf16.mxu0 %v3153_v0  ;;  %v161_v38 = vld [vmem:[#allocation5 + $0x1d8] sm:$0xff]  ;;  %v2591_v39 = vpack.c.bf16 %v71_v35, %v70_v34  ;;  %v72_v40 = vld [vmem:[#allocation5 + $0x70] sm:$0xff]  ;;  %v162_v43 = vld [vmem:[#allocation5 + $0x1e0] sm:$0xff] }
  0x41   :  { %2601 = vmatpush3.bf16.msra.mxu1 %v2600_v18  ;;  %v73_v41 = vld [vmem:[#allocation5 + $0x78] sm:$0xff]  ;;  %v2612_v42 = vpack.c.bf16 %v161_v38, %v160_v37  ;;  %v163_v44 = vld [vmem:[#allocation5 + $0x1e8] sm:$0xff]  ;;  %v164_v47 = vld [vmem:[#allocation5 + $0x1f0] sm:$0xff] }
  0x42   :  { %2602 = vmatprep.subr.bf16.mxu1 %v3153_v0  ;;  %v2594_v45 = vpack.c.bf16 %v73_v41, %v72_v40  ;;  %v2615_v46 = vpack.c.bf16 %v163_v44, %v162_v43  ;;  %v165_v48 = vld [vmem:[#allocation5 + $0x1f8] sm:$0xff]  ;;  %v334_v51 = vld [vmem:[#allocation5 + $0x80] sm:$0xff]  ;;  %v335_v52 = vld [vmem:[#allocation5 + $0x88] sm:$0xff] }
  0x43   :  { %2580 = vmatpush3.bf16.msra.mxu0 %v2579_v14  ;;  %v3244_v49 = vld [vmem:[#allocation2] sm:$0xff]  ;;  %v2618_v50 = vpack.c.bf16 %v165_v48, %v164_v47  ;;  %v2645_v53 = vpack.c.bf16 %v335_v52, %v334_v51  ;;  %v336_v54 = vld [vmem:[#allocation5 + $0x90] sm:$0xff]  ;;  %v338_v57 = vld [vmem:[#allocation5 + $0xa0] sm:$0xff] }
  0x44   :  { %2581 = vmatprep.subr.bf16.mxu0 %v3153_v0  ;;  %v337_v55 = vld [vmem:[#allocation5 + $0x98] sm:$0xff]  ;;  %v339_v58 = vld [vmem:[#allocation5 + $0xa8] sm:$0xff]  ;;  %v340_v60 = vld [vmem:[#allocation5 + $0xb0] sm:$0xff] }
  0x45   :  { %2604 = vmatpush3.bf16.msra.mxu1 %v2603_v24  ;;  %v2648_v56 = vpack.c.bf16 %v337_v55, %v336_v54  ;;  %v2651_v59 = vpack.c.bf16 %v339_v58, %v338_v57  ;;  %v341_v61 = vld [vmem:[#allocation5 + $0xb8] sm:$0xff]  ;;  %v342_v63 = vld [vmem:[#allocation5 + $0xc0] sm:$0xff]  ;;  %v343_v2 = vld [vmem:[#allocation5 + $0xc8] sm:$0xff] }
  0x46   :  { %2605 = vmatprep.subr.bf16.mxu1 %v3153_v0  ;;  %v2654_v62 = vpack.c.bf16 %v341_v61, %v340_v60  ;;  %v2657_v3 = vpack.c.bf16 %v343_v2, %v342_v63  ;;  %v344_v4 = vld [vmem:[#allocation5 + $0xd0] sm:$0xff]  ;;  %v345_v5 = vld [vmem:[#allocation5 + $0xd8] sm:$0xff]  ;;  %v346_v7 = vld [vmem:[#allocation5 + $0xe0] sm:$0xff] }
  0x47   :  { %2583 = vmatpush3.bf16.msra.mxu0 %v2582_v21  ;;  %v2660_v6 = vpack.c.bf16 %v345_v5, %v344_v4  ;;  %v347_v8 = vld [vmem:[#allocation5 + $0xe8] sm:$0xff]  ;;  %v348_v10 = vld [vmem:[#allocation5 + $0xf0] sm:$0xff]  ;;  %v349_v11 = vld [vmem:[#allocation5 + $0xf8] sm:$0xff] }
  0x48   :  { %2584 = vmatprep.subr.bf16.mxu0 %v3153_v0  ;;  %v2663_v9 = vpack.c.bf16 %v347_v8, %v346_v7  ;;  %v2666_v12 = vpack.c.bf16 %v349_v11, %v348_v10  ;;  %v242_v13 = vld [vmem:[#allocation5 + $0x300] sm:$0xff]  ;;  %v243_v14 = vld [vmem:[#allocation5 + $0x308] sm:$0xff]  ;;  %v244_v15 = vld [vmem:[#allocation5 + $0x310] sm:$0xff] }
  0x49   :  { %2607 = vmatpush3.bf16.msra.mxu1 %v2606_v30  ;;  %v2621_v16 = vpack.c.bf16 %v243_v14, %v242_v13  ;;  %v245_v17 = vld [vmem:[#allocation5 + $0x318] sm:$0xff]  ;;  %v246_v19 = vld [vmem:[#allocation5 + $0x320] sm:$0xff]  ;;  %v247_v20 = vld [vmem:[#allocation5 + $0x328] sm:$0xff] }
  0x4a   :  { %2608 = vmatprep.subr.bf16.mxu1 %v3153_v0  ;;  %v2624_v18 = vpack.c.bf16 %v245_v17, %v244_v15  ;;  %v2627_v21 = vpack.c.bf16 %v247_v20, %v246_v19  ;;  %v248_v22 = vld [vmem:[#allocation5 + $0x330] sm:$0xff]  ;;  %v249_v23 = vld [vmem:[#allocation5 + $0x338] sm:$0xff]  ;;  %v250_v25 = vld [vmem:[#allocation5 + $0x340] sm:$0xff] }
  0x4b   :  { %2586 = vmatpush3.bf16.msra.mxu0 %v2585_v27  ;;  %v2630_v24 = vpack.c.bf16 %v249_v23, %v248_v22  ;;  %v251_v26 = vld [vmem:[#allocation5 + $0x348] sm:$0xff]  ;;  %v252_v28 = vld [vmem:[#allocation5 + $0x350] sm:$0xff]  ;;  %v253_v29 = vld [vmem:[#allocation5 + $0x358] sm:$0xff] }
  0x4c   :  { %2587 = vmatprep.subr.bf16.mxu0 %v3153_v0  ;;  %v2633_v27 = vpack.c.bf16 %v251_v26, %v250_v25  ;;  %v2636_v30 = vpack.c.bf16 %v253_v29, %v252_v28  ;;  %v254_v31 = vld [vmem:[#allocation5 + $0x360] sm:$0xff]  ;;  %v255_v32 = vld [vmem:[#allocation5 + $0x368] sm:$0xff]  ;;  %v256_v34 = vld [vmem:[#allocation5 + $0x370] sm:$0xff] }
  0x4d   :  { %2610 = vmatpush3.bf16.msra.mxu1 %v2609_v36  ;;  %v257_v35 = vld [vmem:[#allocation5 + $0x378] sm:$0xff]  ;;  %v426_v37 = vld [vmem:[#allocation5 + $0x200] sm:$0xff]  ;;  %v427_v38 = vld [vmem:[#allocation5 + $0x208] sm:$0xff] }
  0x4e   :  { %2611 = vmatprep.subr.bf16.mxu1 %v3153_v0  ;;  %v2642_v36 = vpack.c.bf16 %v257_v35, %v256_v34  ;;  %v428_v40 = vld [vmem:[#allocation5 + $0x210] sm:$0xff]  ;;  %v429_v41 = vld [vmem:[#allocation5 + $0x218] sm:$0xff]  ;;  %v430_v43 = vld [vmem:[#allocation5 + $0x220] sm:$0xff] }
  0x4f   :  { %2589 = vmatpush3.bf16.msra.mxu0 %v2588_v33  ;;  %v2639_v33 = vpack.c.bf16 %v255_v32, %v254_v31  ;;  %v431_v44 = vld [vmem:[#allocation5 + $0x228] sm:$0xff]  ;;  %v433_v47 = vld [vmem:[#allocation5 + $0x238] sm:$0xff]  ;;  %v436_v52 = vld [vmem:[#allocation5 + $0x250] sm:$0xff] }
  0x50   :  { %2590 = vmatprep.subr.bf16.mxu0 %v3153_v0  ;;  %v438_v55 = vld [vmem:[#allocation5 + $0x260] sm:$0xff]  ;;  %v440_v58 = vld [vmem:[#allocation5 + $0x270] sm:$0xff]  ;;  %v518_v63 = vld [vmem:[#allocation5 + $0x488] sm:$0xff] }
  0x51   :  { %2613 = vmatpush3.bf16.msra.mxu1 %v2612_v42  ;;  %v2672_v42 = vpack.c.bf16 %v429_v41, %v428_v40  ;;  %v1709_v61 = vld [vmem:[#allocation7] ss:$0 sm:$0xff]  ;;  %v519_v7 = vld [vmem:[#allocation5 + $0x490] sm:$0xff]  ;;  %v520_v8 = vld [vmem:[#allocation5 + $0x498] sm:$0xff] }
  0x52   :  { %2614 = vmatprep.subr.bf16.mxu1 %v3153_v0  ;;  %v2696_v10 = vpack.c.bf16 %v520_v8, %v519_v7  ;;  %v522_v13 = vld [vmem:[#allocation5 + $0x4a8] sm:$0xff]  ;;  %v524_v19 = vld [vmem:[#allocation5 + $0x4b8] sm:$0xff] }
  0x53   :  { %2592 = vmatpush3.bf16.msra.mxu0 %v2591_v39  ;;  %v2669_v39 = vpack.c.bf16 %v427_v38, %v426_v37  ;;  %v526_v22 = vld [vmem:[#allocation5 + $0x4c8] sm:$0xff]  ;;  %v528_v25 = vld [vmem:[#allocation5 + $0x4d8] sm:$0xff] }
  0x54   :  { %2593 = vmatprep.subr.bf16.mxu0 %v3153_v0  ;;  %v530_v28 = vld [vmem:[#allocation5 + $0x4e8] sm:$0xff]  ;;  %v532_v31 = vld [vmem:[#allocation5 + $0x4f8] sm:$0xff] }
  0x55   :  { %2616 = vmatpush3.bf16.msra.mxu1 %v2615_v46  ;;  %v432_v46 = vld [vmem:[#allocation5 + $0x230] sm:$0xff]  ;;  %v610_v34 = vld [vmem:[#allocation5 + $0x508] sm:$0xff]  ;;  %v612_v37 = vld [vmem:[#allocation5 + $0x518] sm:$0xff] }
  0x56   :  { %2617 = vmatprep.subr.bf16.mxu1 %v3153_v0  ;;  %v2678_v48 = vpack.c.bf16 %v433_v47, %v432_v46  ;;  %v614_v40 = vld [vmem:[#allocation5 + $0x528] sm:$0xff] }
  0x57   :  { %2595 = vmatpush3.bf16.msra.mxu0 %v2594_v45  ;;  %v2675_v45 = vpack.c.bf16 %v431_v44, %v430_v43  ;;  %v616_v43 = vld [vmem:[#allocation5 + $0x538] sm:$0xff]  ;;  %v618_v46 = vld [vmem:[#allocation5 + $0x548] sm:$0xff] }
  0x58   :  { %2620 = vmatprep.subr.bf16.mxu0 %v3153_v0 }
  0x59   :  { %2619 = vmatpush3.bf16.msra.mxu1 %v2618_v50  ;;  %v435_v50 = vld [vmem:[#allocation5 + $0x248] sm:$0xff] }
  0x5a   :  { %2080 = vmatmul.mubr.f32.vlgmr.msra.gmra.mrb[0].mxu0 %v3244_v49  ;;  %2644 = vmatprep.subr.bf16.mxu1 %v3153_v0 }
  0x5b   :  { %2149 = vmatprep.mubr.msk.f32.mxu0 %vm3154_vm0, %v3155_v1  ;;  %2622 = vmatpush3.bf16.msra.mxu0 %v2621_v16 }
  0x5c   :  { %2115 = vmatmul.mubr.f32.vlgmr.msra.gmra.mrb[0].mxu1 %v3244_v49  ;;  %2623 = vmatprep.subr.bf16.mxu0 %v3153_v0 }
  0x5d   :  { %2646 = vmatpush3.bf16.msra.mxu1 %v2645_v53  ;;  %2184 = vmatprep.mubr.msk.f32.mxu1 %vm3154_vm0, %v3155_v1  ;;  %v437_v53 = vld [vmem:[#allocation5 + $0x258] sm:$0xff] }
  0x5e   :  { %2647 = vmatprep.subr.bf16.mxu1 %v3153_v0  ;;  %v2684_v54 = vpack.c.bf16 %v437_v53, %v436_v52  ;;  %v622_v52 = vld [vmem:[#allocation5 + $0x568] sm:$0xff] }
  0x5f   :  { %2625 = vmatpush3.bf16.msra.mxu0 %v2624_v18  ;;  %v523_v18 = vld [vmem:[#allocation5 + $0x4b0] sm:$0xff] }
  0x60   :  { %2626 = vmatprep.subr.bf16.mxu0 %v3153_v0  ;;  %v2702_v20 = vpack.c.bf16 %v524_v19, %v523_v18  ;;  %v706_v18 = vld [vmem:[#allocation5 + $0x3c8] sm:$0xff] }
  0x61   :  { %2649 = vmatpush3.bf16.msra.mxu1 %v2648_v56  ;;  %v439_v56 = vld [vmem:[#allocation5 + $0x268] sm:$0xff] }
  0x62   :  { %2650 = vmatprep.subr.bf16.mxu1 %v3153_v0  ;;  %v2687_v57 = vpack.c.bf16 %v439_v56, %v438_v55  ;;  %v624_v55 = vld [vmem:[#allocation5 + $0x578] sm:$0xff] }
  0x63   :  { %2628 = vmatpush3.bf16.msra.mxu0 %v2627_v21  ;;  %v525_v21 = vld [vmem:[#allocation5 + $0x4c0] sm:$0xff] }
  0x64   :  { %2629 = vmatprep.subr.bf16.mxu0 %v3153_v0  ;;  %v2705_v23 = vpack.c.bf16 %v526_v22, %v525_v21  ;;  %v708_v21 = vld [vmem:[#allocation5 + $0x3d8] sm:$0xff] }
  0x65   :  { %2652 = vmatpush3.bf16.msra.mxu1 %v2651_v59  ;;  %v441_v59 = vld [vmem:[#allocation5 + $0x278] sm:$0xff] }
  0x66   :  { %2653 = vmatprep.subr.bf16.mxu1 %v3153_v0  ;;  %v2690_v60 = vpack.c.bf16 %v441_v59, %v440_v58  ;;  %v805_v58 = vld [vmem:[#allocation5 + $0x708] sm:$0xff] }
  0x67   :  { %2631 = vmatpush3.bf16.msra.mxu0 %v2630_v24  ;;  %v527_v24 = vld [vmem:[#allocation5 + $0x4d0] sm:$0xff] }
  0x68   :  { %2632 = vmatprep.subr.bf16.mxu0 %v3153_v0  ;;  %v2708_v26 = vpack.c.bf16 %v528_v25, %v527_v24  ;;  %v710_v24 = vld [vmem:[#allocation5 + $0x3e8] sm:$0xff] }
  0x69   :  { %2655 = vmatpush3.bf16.msra.mxu1 %v2654_v62  ;;  %v517_v62 = vld [vmem:[#allocation5 + $0x480] sm:$0xff] }
  0x6a   :  { %2656 = vmatprep.subr.bf16.mxu1 %v3153_v0  ;;  %v2693_v5 = vpack.c.bf16 %v518_v63, %v517_v62  ;;  %v697_v62 = vld [vmem:[#allocation5 + $0x380] sm:$0xff]  ;;  %v698_v63 = vld [vmem:[#allocation5 + $0x388] sm:$0xff] }
  0x6b   :  { %2634 = vmatpush3.bf16.msra.mxu0 %v2633_v27  ;;  %v529_v27 = vld [vmem:[#allocation5 + $0x4e0] sm:$0xff] }
  0x6c   :  { %2635 = vmatprep.subr.bf16.mxu0 %v3153_v0  ;;  %v2711_v29 = vpack.c.bf16 %v530_v28, %v529_v27  ;;  %v711_v27 = vld [vmem:[#allocation5 + $0x3f0] sm:$0xff]  ;;  %v712_v28 = vld [vmem:[#allocation5 + $0x3f8] sm:$0xff] }
  0x6d   :  { %2658 = vmatpush3.bf16.msra.mxu1 %v2657_v3 }
  0x6e   :  { %2659 = vmatprep.subr.bf16.mxu1 %v3153_v0 }
  0x6f   :  { %2637 = vmatpush3.bf16.msra.mxu0 %v2636_v30  ;;  %v531_v30 = vld [vmem:[#allocation5 + $0x4f0] sm:$0xff] }
  0x70   :  { %2638 = vmatprep.subr.bf16.mxu0 %v3153_v0  ;;  %v2714_v32 = vpack.c.bf16 %v532_v31, %v531_v30  ;;  %v788_v30 = vld [vmem:[#allocation5 + $0x680] sm:$0xff]  ;;  %v789_v31 = vld [vmem:[#allocation5 + $0x688] sm:$0xff] }
  0x71   :  { %2661 = vmatpush3.bf16.msra.mxu1 %v2660_v6 }
  0x72   :  { %2662 = vmatprep.subr.bf16.mxu1 %v3153_v0 }
  0x73   :  { %2640 = vmatpush3.bf16.msra.mxu0 %v2639_v33  ;;  %v609_v33 = vld [vmem:[#allocation5 + $0x500] sm:$0xff] }
  0x74   :  { %2641 = vmatprep.subr.bf16.mxu0 %v3153_v0  ;;  %v2717_v35 = vpack.c.bf16 %v610_v34, %v609_v33  ;;  %v806_v34 = vld [vmem:[#allocation5 + $0x710] sm:$0xff] }
  0x75   :  { %2664 = vmatpush3.bf16.msra.mxu1 %v2663_v9  ;;  %v1710_v9 = vld [vmem:[#allocation7 + $0x3] ss:$0 sm:$0xff] }
  0x76   :  { %2665 = vmatprep.subr.bf16.mxu1 %v3153_v0 }
  0x77   :  { %2643 = vmatpush3.bf16.msra.mxu0 %v2642_v36  ;;  %v611_v36 = vld [vmem:[#allocation5 + $0x510] sm:$0xff] }
  0x78   :  { %2668 = vmatprep.subr.bf16.mxu0 %v3153_v0  ;;  %v2720_v38 = vpack.c.bf16 %v612_v37, %v611_v36  ;;  %v2762_v36 = vpack.c.bf16 %v712_v28, %v711_v27  ;;  %v991_v28 = vld [vmem:[#allocation5 + $0x120] sm:$0xff] }
  0x79   :  { %2667 = vmatpush3.bf16.msra.mxu1 %v2666_v12  ;;  %v521_v12 = vld [vmem:[#allocation5 + $0x4a0] sm:$0xff] }
  0x7a   :  { %2692 = vmatprep.subr.bf16.mxu1 %v3153_v0  ;;  %2150 = vmatmul.mubr.f32.vlgmr.msra.gmra.mrb[2].mxu0 %v3244_v49  ;;  %v434_v49 = vld [vmem:[#allocation5 + $0x240] sm:$0xff]  ;;  %v2699_v17 = vpack.c.bf16 %v522_v13, %v521_v12  ;;  %v703_v12 = vld [vmem:[#allocation5 + $0x3b0] sm:$0xff]  ;;  %v704_v13 = vld [vmem:[#allocation5 + $0x3b8] sm:$0xff] }
  0x7b   :  { %2670 = vmatpush3.bf16.msra.mxu0 %v2669_v39  ;;  %2219 = vmatprep.mubr.msk.f32.mxu0 %vm3154_vm0, %v3155_v1  ;;  %v2681_v51 = vpack.c.bf16 %v435_v50, %v434_v49  ;;  %v613_v39 = vld [vmem:[#allocation5 + $0x520] sm:$0xff]  ;;  %v620_v49 = vld [vmem:[#allocation5 + $0x558] sm:$0xff] }
  0x7c   :  { %2671 = vmatprep.subr.bf16.mxu0 %v3153_v0  ;;  %v2723_v41 = vpack.c.bf16 %v614_v40, %v613_v39  ;;  %v2766_v39 = vpack.c.bf16 %v789_v31, %v788_v30  ;;  %v993_v31 = vld [vmem:[#allocation5 + $0x130] sm:$0xff] }
  0x7f   :  { %2673 = vmatpush3.bf16.msra.mxu0 %v2672_v42  ;;  %v615_v42 = vld [vmem:[#allocation5 + $0x530] sm:$0xff] }
  0x80   :  { %2674 = vmatprep.subr.bf16.mxu0 %v3153_v0  ;;  %v2726_v44 = vpack.c.bf16 %v616_v43, %v615_v42  ;;  %v790_v42 = vld [vmem:[#allocation5 + $0x690] sm:$0xff]  ;;  %v791_v43 = vld [vmem:[#allocation5 + $0x698] sm:$0xff] }
  0x83   :  { %2676 = vmatpush3.bf16.msra.mxu0 %v2675_v45  ;;  %v617_v45 = vld [vmem:[#allocation5 + $0x540] sm:$0xff] }
  0x84   :  { %2677 = vmatprep.subr.bf16.mxu0 %v3153_v0  ;;  %v2729_v47 = vpack.c.bf16 %v618_v46, %v617_v45  ;;  %v808_v45 = vld [vmem:[#allocation5 + $0x720] sm:$0xff]  ;;  %v809_v46 = vld [vmem:[#allocation5 + $0x728] sm:$0xff] }
  0x87   :  { %2679 = vmatpush3.bf16.msra.mxu0 %v2678_v48  ;;  %v619_v48 = vld [vmem:[#allocation5 + $0x550] sm:$0xff] }
  0x88   :  { %2680 = vmatprep.subr.bf16.mxu0 %v3153_v0  ;;  %v2732_v50 = vpack.c.bf16 %v620_v49, %v619_v48  ;;  %v2772_v48 = vpack.c.bf16 %v809_v46, %v808_v45  ;;  %v792_v49 = vld [vmem:[#allocation5 + $0x6a0] sm:$0xff] }
  0x8b   :  { %2682 = vmatpush3.bf16.msra.mxu0 %v2681_v51  ;;  %v621_v51 = vld [vmem:[#allocation5 + $0x560] sm:$0xff] }
  0x8c   :  { %2683 = vmatprep.subr.bf16.mxu0 %v3153_v0  ;;  %v2735_v53 = vpack.c.bf16 %v622_v52, %v621_v51  ;;  %v810_v51 = vld [vmem:[#allocation5 + $0x730] sm:$0xff]  ;;  %v811_v52 = vld [vmem:[#allocation5 + $0x738] sm:$0xff] }
  0x8f   :  { %2685 = vmatpush3.bf16.msra.mxu0 %v2684_v54  ;;  %v623_v54 = vld [vmem:[#allocation5 + $0x570] sm:$0xff] }
  0x90   :  { %2686 = vmatprep.subr.bf16.mxu0 %v3153_v0  ;;  %v2738_v56 = vpack.c.bf16 %v624_v55, %v623_v54  ;;  %v2776_v54 = vpack.c.bf16 %v811_v52, %v810_v51  ;;  %v794_v55 = vld [vmem:[#allocation5 + $0x6b0] sm:$0xff]  ;;  %v1187_v52 = vld [vmem:[#allocation5 + $0x598] sm:$0xff] }
  0x91   :  { %v1186_v51 = vld [vmem:[#allocation5 + $0x590] sm:$0xff] }
  0x93   :  { %2688 = vmatpush3.bf16.msra.mxu0 %v2687_v57  ;;  %v804_v57 = vld [vmem:[#allocation5 + $0x700] sm:$0xff] }
  0x94   :  { %2689 = vmatprep.subr.bf16.mxu0 %v3153_v0  ;;  %v2764_v59 = vpack.c.bf16 %v805_v58, %v804_v57  ;;  %v812_v57 = vld [vmem:[#allocation5 + $0x740] sm:$0xff] }
  0x97   :  { %2691 = vmatpush3.bf16.msra.mxu0 %v2690_v60 }
  0x98   :  { %2716 = vmatprep.subr.bf16.mxu0 %v3153_v0 }
 0x12d   :  { %v145_v2 = vpop.f32.mrb[0].mxu0 }
 0x12e   :  { %v146_v3 = vadd.f32 %v1709_v61, %v145_v2  ;;  %v2081_v4 = vpop.f32.mrb[1].mxu0  ;;  %v699_v2 = vld [vmem:[#allocation5 + $0x390] sm:$0xff] }
 0x12f   :  { %v237_v11 = vpop.f32.mrb[0].mxu1  ;;  %v2741_v4 = vpack.c.bf16 %v698_v63, %v697_v62  ;;  %v814_v62 = vld [vmem:[#allocation5 + $0x750] sm:$0xff]  ;;  %v815_v63 = vld [vmem:[#allocation5 + $0x758] sm:$0xff] }
 0x130   :  { %v3282_v6 = vmax.f32 %v146_v3, 0.0  ;;  %v3288_v14 = vadd.f32 %v1710_v9, %v237_v11  ;;  %v2116_v15 = vpop.f32.mrb[1].mxu1  ;;  %v701_v9 = vld [vmem:[#allocation5 + $0x3a0] sm:$0xff] }
 0x131   :  { %v2750_v15 = vpack.c.bf16 %v704_v13, %v703_v12  ;;  %v801_v12 = vld [vmem:[#allocation5 + $0x6e8] sm:$0xff]  ;;  %v818_v13 = vld [vmem:[#allocation5 + $0x770] sm:$0xff] }
 0x132   :  { %2185 = vmatmul.mubr.f32.vlgmr.msra.gmra.mrb[2].mxu1 %v3282_v6  ;;  %v241_v16 = vmax.f32 %v3288_v14, 0.0  ;;  %v813_v14 = vld [vmem:[#allocation5 + $0x748] sm:$0xff] }
 0x133   :  { %2694 = vmatpush3.bf16.msra.mxu1 %v2693_v5  ;;  %2254 = vmatprep.mubr.msk.f32.mxu1 %vm3154_vm0, %v3155_v1  ;;  %v700_v5 = vld [vmem:[#allocation5 + $0x398] sm:$0xff]  ;;  %v2780_v58 = vpack.c.bf16 %v813_v14, %v812_v57 }
 0x134   :  { %2695 = vmatprep.subr.bf16.mxu1 %v3153_v0  ;;  %2220 = vmatmul.mubr.f32.vlgmr.msra.gmra.mrb[4].mxu0 %v241_v16  ;;  %v2744_v8 = vpack.c.bf16 %v700_v5, %v699_v2  ;;  %v799_v5 = vld [vmem:[#allocation5 + $0x6d8] sm:$0xff] }
 0x135   :  { %2289 = vmatprep.mubr.msk.f32.mxu0 %vm3154_vm0, %v3155_v1  ;;  %2718 = vmatpush3.bf16.msra.mxu0 %v2717_v35  ;;  %v807_v35 = vld [vmem:[#allocation5 + $0x718] sm:$0xff] }
 0x136   :  { %2719 = vmatprep.subr.bf16.mxu0 %v3153_v0  ;;  %v1191_v57 = vld [vmem:[#allocation5 + $0x5b8] sm:$0xff] }
 0x137   :  { %2697 = vmatpush3.bf16.msra.mxu1 %v2696_v10  ;;  %v702_v10 = vld [vmem:[#allocation5 + $0x3a8] sm:$0xff] }
 0x138   :  { %2698 = vmatprep.subr.bf16.mxu1 %v3153_v0  ;;  %v2747_v11 = vpack.c.bf16 %v702_v10, %v701_v9 }
 0x139   :  { %2721 = vmatpush3.bf16.msra.mxu0 %v2720_v38 }
 0x13a   :  { %2722 = vmatprep.subr.bf16.mxu0 %v3153_v0 }
 0x13b   :  { %2700 = vmatpush3.bf16.msra.mxu1 %v2699_v17  ;;  %v705_v17 = vld [vmem:[#allocation5 + $0x3c0] sm:$0xff] }
 0x13c   :  { %2701 = vmatprep.subr.bf16.mxu1 %v3153_v0  ;;  %v2753_v19 = vpack.c.bf16 %v706_v18, %v705_v17 }
 0x13d   :  { %2724 = vmatpush3.bf16.msra.mxu0 %v2723_v41  ;;  %v2768_v41 = vpack.c.bf16 %v807_v35, %v806_v34  ;;  %v996_v34 = vld [vmem:[#allocation5 + $0x148] sm:$0xff] }
 0x13e   :  { %2725 = vmatprep.subr.bf16.mxu0 %v3153_v0 }
 0x13f   :  { %2703 = vmatpush3.bf16.msra.mxu1 %v2702_v20  ;;  %v707_v20 = vld [vmem:[#allocation5 + $0x3d0] sm:$0xff] }
 0x140   :  { %2704 = vmatprep.subr.bf16.mxu1 %v3153_v0  ;;  %v2756_v22 = vpack.c.bf16 %v708_v21, %v707_v20  ;;  %v803_v20 = vld [vmem:[#allocation5 + $0x6f8] sm:$0xff] }
 0x141   :  { %2727 = vmatpush3.bf16.msra.mxu0 %v2726_v44 }
 0x142   :  { %2728 = vmatprep.subr.bf16.mxu0 %v3153_v0 }
 0x143   :  { %2706 = vmatpush3.bf16.msra.mxu1 %v2705_v23  ;;  %v709_v23 = vld [vmem:[#allocation5 + $0x3e0] sm:$0xff] }
 0x144   :  { %2707 = vmatprep.subr.bf16.mxu1 %v3153_v0  ;;  %v2759_v25 = vpack.c.bf16 %v710_v24, %v709_v23  ;;  %v988_v23 = vld [vmem:[#allocation5 + $0x108] sm:$0xff] }
 0x145   :  { %2730 = vmatpush3.bf16.msra.mxu0 %v2729_v47  ;;  %v2770_v47 = vpack.c.bf16 %v791_v43, %v790_v42  ;;  %v1001_v42 = vld [vmem:[#allocation5 + $0x170] sm:$0xff]  ;;  %v1002_v43 = vld [vmem:[#allocation5 + $0x178] sm:$0xff] }
 0x146   :  { %2731 = vmatprep.subr.bf16.mxu0 %v3153_v0  ;;  %v2842_v45 = vpack.c.bf16 %v1002_v43, %v1001_v42 }
 0x147   :  { %2709 = vmatpush3.bf16.msra.mxu1 %v2708_v26  ;;  %v1711_v26 = vld [vmem:[#allocation7 + $0x6] ss:$0 sm:$0xff] }
 0x148   :  { %2710 = vmatprep.subr.bf16.mxu1 %v3153_v0 }
 0x149   :  { %2733 = vmatpush3.bf16.msra.mxu0 %v2732_v50  ;;  %v793_v50 = vld [vmem:[#allocation5 + $0x6a8] sm:$0xff] }
 0x14a   :  { %2734 = vmatprep.subr.bf16.mxu0 %v3153_v0 }
 0x14b   :  { %2712 = vmatpush3.bf16.msra.mxu1 %v2711_v29  ;;  %v1714_v29 = vld [vmem:[#allocation7 + $0x9] ss:$0 sm:$0xff] }
 0x14c   :  { %2713 = vmatprep.subr.bf16.mxu1 %v3153_v0 }
 0x14d   :  { %2736 = vmatpush3.bf16.msra.mxu0 %v2735_v53  ;;  %v329_v3 = vpop.f32.mrb[2].mxu0  ;;  %v2774_v53 = vpack.c.bf16 %v793_v50, %v792_v49 }
 0x14e   :  { %2737 = vmatprep.subr.bf16.mxu0 %v3153_v0  ;;  %v2151_v7 = vpop.f32.mrb[3].mxu0 }
 0x14f   :  { %2715 = vmatpush3.bf16.msra.mxu1 %v2714_v32  ;;  %v330_v32 = vadd.f32 %v1711_v26, %v329_v3  ;;  %v2784_v3 = vpack.c.bf16 %v815_v63, %v814_v62  ;;  %v816_v7 = vld [vmem:[#allocation5 + $0x760] sm:$0xff]  ;;  %v990_v26 = vld [vmem:[#allocation5 + $0x118] sm:$0xff] }
 0x150   :  { %2740 = vmatprep.subr.bf16.mxu1 %v3153_v0  ;;  %v1195_v62 = vld [vmem:[#allocation5 + $0x5d8] sm:$0xff] }
 0x151   :  { %2739 = vmatpush3.bf16.msra.mxu0 %v2738_v56  ;;  %v333_v44 = vmax.f32 %v330_v32, 0.0  ;;  %v795_v56 = vld [vmem:[#allocation5 + $0x6b8] sm:$0xff] }
 0x152   :  { %2255 = vmatmul.mubr.f32.vlgmr.msra.gmra.mrb[4].mxu1 %v3282_v6  ;;  %2765 = vmatprep.subr.bf16.mxu0 %v2764_v59  ;;  %v796_v59 = vld [vmem:[#allocation5 + $0x6c0] sm:$0xff]  ;;  %v994_v32 = vld [vmem:[#allocation5 + $0x138] sm:$0xff] }
 0x153   :  { %2324 = vmatprep.mubr.msk.f32.mxu1 %vm3154_vm0, %v3155_v1  ;;  %2742 = vmatpush3.bf16.msra.mxu1 %v2741_v4  ;;  %v798_v4 = vld [vmem:[#allocation5 + $0x6d0] sm:$0xff] }
 0x154   :  { %2743 = vmatprep.subr.bf16.mxu1 %v3153_v0  ;;  %v2786_v9 = vpack.c.bf16 %v799_v5, %v798_v4  ;;  %v1198_v5 = vld [vmem:[#allocation5 + $0x5f0] sm:$0xff] }
 0x157   :  { %2745 = vmatpush3.bf16.msra.mxu1 %v2744_v8  ;;  %v817_v8 = vld [vmem:[#allocation5 + $0x768] sm:$0xff] }
 0x158   :  { %2746 = vmatprep.subr.bf16.mxu1 %v3153_v0  ;;  %v2788_v10 = vpack.c.bf16 %v817_v8, %v816_v7  ;;  %v1199_v7 = vld [vmem:[#allocation5 + $0x5f8] sm:$0xff]  ;;  %v896_v8 = vld [vmem:[#allocation5 + $0x780] sm:$0xff] }
 0x15b   :  { %2748 = vmatpush3.bf16.msra.mxu1 %v2747_v11  ;;  %v800_v11 = vld [vmem:[#allocation5 + $0x6e0] sm:$0xff] }
 0x15c   :  { %2749 = vmatprep.subr.bf16.mxu1 %v3153_v0  ;;  %v2790_v17 = vpack.c.bf16 %v801_v12, %v800_v11  ;;  %v899_v12 = vld [vmem:[#allocation5 + $0x798] sm:$0xff] }
 0x15f   :  { %2751 = vmatpush3.bf16.msra.mxu1 %v2750_v15  ;;  %v819_v15 = vld [vmem:[#allocation5 + $0x778] sm:$0xff] }
 0x160   :  { %2752 = vmatprep.subr.bf16.mxu1 %v3153_v0  ;;  %v2792_v18 = vpack.c.bf16 %v819_v15, %v818_v13  ;;  %v2890_v13 = vpack.c.bf16 %v1199_v7, %v1198_v5  ;;  %v1713_v5 = vld [vmem:[#allocation7 + $0x4] ss:$0 sm:$0xff] }
 0x163   :  { %2754 = vmatpush3.bf16.msra.mxu1 %v2753_v19  ;;  %v802_v19 = vld [vmem:[#allocation5 + $0x6f0] sm:$0xff] }
 0x164   :  { %2755 = vmatprep.subr.bf16.mxu1 %v3153_v0  ;;  %v2794_v21 = vpack.c.bf16 %v803_v20, %v802_v19  ;;  %v902_v20 = vld [vmem:[#allocation5 + $0x7b0] sm:$0xff] }
 0x167   :  { %2757 = vmatpush3.bf16.msra.mxu1 %v2756_v22  ;;  %v987_v22 = vld [vmem:[#allocation5 + $0x100] sm:$0xff] }
 0x168   :  { %2758 = vmatprep.subr.bf16.mxu1 %v3153_v0  ;;  %v2821_v24 = vpack.c.bf16 %v988_v23, %v987_v22  ;;  %v904_v23 = vld [vmem:[#allocation5 + $0x7c0] sm:$0xff] }
 0x16b   :  { %2760 = vmatpush3.bf16.msra.mxu1 %v2759_v25  ;;  %v989_v25 = vld [vmem:[#allocation5 + $0x110] sm:$0xff] }
 0x16c   :  { %2761 = vmatprep.subr.bf16.mxu1 %v3153_v0  ;;  %v2824_v27 = vpack.c.bf16 %v990_v26, %v989_v25  ;;  %v906_v26 = vld [vmem:[#allocation5 + $0x7d0] sm:$0xff] }
 0x16f   :  { %2763 = vmatpush3.bf16.msra.mxu1 %v2762_v36  ;;  %v997_v36 = vld [vmem:[#allocation5 + $0x150] sm:$0xff] }
 0x170   :  { %2796 = vmatprep.subr.bf16.mxu1 %v3153_v0 }
 0x172   :  { %2325 = vmatmul.mubr.f32.vlgmr.msra.gmra.mrb[6].mxu1 %v333_v44  ;;  %v1712_v44 = vld [vmem:[#allocation7 + $0x1] ss:$0 sm:$0xff] }
 0x173   :  { %2359 = vmatprep.mubr.msk.f32.mxu1 %vm3154_vm0, %v3155_v1 }
 0x205   :  { %v3312_v60 = vpop.f32.mrb[2].mxu1 }
 0x206   :  { %v2186_v61 = vpop.f32.mrb[3].mxu1  ;;  %v422_v46 = vadd.f32 %v1712_v44, %v3312_v60  ;;  %v1188_v60 = vld [vmem:[#allocation5 + $0x5a0] sm:$0xff] }
 0x207   :  { %v797_v61 = vld [vmem:[#allocation5 + $0x6c8] sm:$0xff] }
 0x208   :  { %v2782_v2 = vpack.c.bf16 %v797_v61, %v796_v59  ;;  %v3338_v50 = vmax.f32 %v422_v46, 0.0  ;;  %v1194_v61 = vld [vmem:[#allocation5 + $0x5d0] sm:$0xff]  ;;  %v1096_v46 = vld [vmem:[#allocation5 + $0x298] sm:$0xff] }
 0x209   :  { %v2884_v63 = vpack.c.bf16 %v1195_v62, %v1194_v61  ;;  %v1106_v61 = vld [vmem:[#allocation5 + $0x2e8] sm:$0xff] }
 0x225   :  { %v604_v33 = vpop.f32.mrb[4].mxu1 }
 0x226   :  { %v605_v37 = vadd.f32 %v1714_v29, %v604_v33  ;;  %v2256_v38 = vpop.f32.mrb[5].mxu1  ;;  %v992_v29 = vld [vmem:[#allocation5 + $0x128] sm:$0xff]  ;;  %v2830_v33 = vpack.c.bf16 %v994_v32, %v993_v31  ;;  %v910_v32 = vld [vmem:[#allocation5 + $0x7f0] sm:$0xff] }
 0x227   :  { %v2827_v30 = vpack.c.bf16 %v992_v29, %v991_v28  ;;  %v908_v29 = vld [vmem:[#allocation5 + $0x7e0] sm:$0xff] }
 0x228   :  { %v608_v40 = vmax.f32 %v605_v37, 0.0  ;;  %v998_v37 = vld [vmem:[#allocation5 + $0x158] sm:$0xff] }
 0x229   :  { %v2836_v38 = vpack.c.bf16 %v998_v37, %v997_v36  ;;  %v1716_v37 = vld [vmem:[#allocation7 + $0xb] ss:$0 sm:$0xff] }
 0x22a   :  { %2290 = vmatmul.mubr.f32.vlgmr.msra.gmra.mrb[4].mxu0 %v608_v40  ;;  %v1000_v40 = vld [vmem:[#allocation5 + $0x168] sm:$0xff] }
 0x22b   :  { %2767 = vmatpush3.bf16.msra.mxu0 %v2766_v39  ;;  %889 = vmatprep.mubr.f32.mxu0 %v241_v16  ;;  %v2778_v16 = vpack.c.bf16 %v795_v56, %v794_v55  ;;  %v999_v39 = vld [vmem:[#allocation5 + $0x160] sm:$0xff]  ;;  %v1190_v56 = vld [vmem:[#allocation5 + $0x5b0] sm:$0xff] }
 0x22c   :  { %2769 = vmatprep.subr.bf16.mxu0 %v2768_v41  ;;  %v2839_v41 = vpack.c.bf16 %v1000_v40, %v999_v39  ;;  %v2878_v14 = vpack.c.bf16 %v1191_v57, %v1190_v56  ;;  %v1093_v40 = vld [vmem:[#allocation5 + $0x280] sm:$0xff]  ;;  %v1103_v57 = vld [vmem:[#allocation5 + $0x2d0] sm:$0xff] }
 0x22f   :  { %2771 = vmatpush3.bf16.msra.mxu0 %v2770_v47  ;;  %v1184_v47 = vld [vmem:[#allocation5 + $0x580] sm:$0xff] }
 0x230   :  { %2773 = vmatprep.subr.bf16.mxu0 %v2772_v48  ;;  %v1185_v48 = vld [vmem:[#allocation5 + $0x588] sm:$0xff] }
 0x231   :  { %v2869_v49 = vpack.c.bf16 %v1185_v48, %v1184_v47  ;;  %v1097_v48 = vld [vmem:[#allocation5 + $0x2a0] sm:$0xff] }
 0x233   :  { %2775 = vmatpush3.bf16.msra.mxu0 %v2774_v53  ;;  %v2872_v53 = vpack.c.bf16 %v1187_v52, %v1186_v51  ;;  %v1099_v52 = vld [vmem:[#allocation5 + $0x2b0] sm:$0xff] }
 0x234   :  { %2777 = vmatprep.subr.bf16.mxu0 %v2776_v54  ;;  %v1189_v54 = vld [vmem:[#allocation5 + $0x5a8] sm:$0xff] }
 0x235   :  { %v2875_v55 = vpack.c.bf16 %v1189_v54, %v1188_v60  ;;  %v1101_v54 = vld [vmem:[#allocation5 + $0x2c0] sm:$0xff] }
 0x237   :  { %2779 = vmatpush3.bf16.msra.mxu0 %v2778_v16  ;;  %v1192_v16 = vld [vmem:[#allocation5 + $0x5c0] sm:$0xff] }
 0x238   :  { %2781 = vmatprep.subr.bf16.mxu0 %v2780_v58  ;;  %v1193_v58 = vld [vmem:[#allocation5 + $0x5c8] sm:$0xff] }
 0x239   :  { %v2881_v59 = vpack.c.bf16 %v1193_v58, %v1192_v16  ;;  %v984_v16 = vlaneseq }
 0x23b   :  { %2783 = vmatpush3.bf16.msra.mxu0 %v2782_v2  ;;  %v1196_v2 = vld [vmem:[#allocation5 + $0x5e0] sm:$0xff]  ;;  %v3370_v62 = vand.u32 127, %v984_v16  ;;  %v1470_v16 = vld [vmem:[#allocation5 + $0x808] sm:$0xff] }
 0x23c   :  { %2785 = vmatprep.subr.bf16.mxu0 %v2784_v3  ;;  %v1197_v3 = vld [vmem:[#allocation5 + $0x5e8] sm:$0xff] }
 0x23d   :  { %v2887_v4 = vpack.c.bf16 %v1197_v3, %v1196_v2  ;;  %v1717_v2 = vld [vmem:[#allocation7 + $0x2] ss:$0 sm:$0xff]  ;;  %v1107_v3 = vld [vmem:[#allocation5 + $0x2f0] sm:$0xff]  ;;  %vm986_vm1 = vcmp.lt.s32.totalorder %v3370_v62, 2 }
 0x23f   :  { %2787 = vmatpush3.bf16.msra.mxu0 %v2786_v9  ;;  %v897_v9 = vld [vmem:[#allocation5 + $0x788] sm:$0xff] }
 0x240   :  { %2789 = vmatprep.subr.bf16.mxu0 %v2788_v10  ;;  %v898_v10 = vld [vmem:[#allocation5 + $0x790] sm:$0xff]  ;;  %v2797_v11 = vpack.c.bf16 %v897_v9, %v896_v8 }
 0x241   :  { %v2800_v15 = vpack.c.bf16 %v899_v12, %v898_v10  ;;  %v1276_v12 = vld [vmem:[#allocation5 + $0x600] sm:$0xff] }
 0x242   :  { %2798 = vmatpush3.bf16.msra.mxu1 %v2797_v11 }
 0x243   :  { %2791 = vmatpush3.bf16.msra.mxu0 %v2790_v17  ;;  %2799 = vmatprep.subr.bf16.mxu1 %v3153_v0  ;;  %v900_v17 = vld [vmem:[#allocation5 + $0x7a0] sm:$0xff] }
 0x244   :  { %2793 = vmatprep.subr.bf16.mxu0 %v2792_v18  ;;  %v901_v18 = vld [vmem:[#allocation5 + $0x7a8] sm:$0xff] }
 0x245   :  { %v2803_v19 = vpack.c.bf16 %v901_v18, %v900_v17 }
 0x246   :  { %2801 = vmatpush3.bf16.msra.mxu1 %v2800_v15 }
 0x247   :  { %2795 = vmatpush3.bf16.msra.mxu0 %v2794_v21  ;;  %2802 = vmatprep.subr.bf16.mxu1 %v3153_v0  ;;  %v903_v21 = vld [vmem:[#allocation5 + $0x7b8] sm:$0xff] }
 0x248   :  { %2820 = vmatprep.subr.bf16.mxu0 %v3153_v0  ;;  %v2806_v22 = vpack.c.bf16 %v903_v21, %v902_v20  ;;  %v1279_v20 = vld [vmem:[#allocation5 + $0x618] sm:$0xff] }
 0x24a   :  { %890 = vmatmul.mubr.f32.vlgmr.msra.gmra.mrb[6].mxu0 %v3282_v6  ;;  %v995_v6 = vld [vmem:[#allocation5 + $0x140] sm:$0xff]  ;;  %2804 = vmatpush3.bf16.msra.mxu1 %v2803_v19  ;;  %v1278_v19 = vld [vmem:[#allocation5 + $0x610] sm:$0xff] }
 0x24b   :  { %2822 = vmatpush3.bf16.msra.mxu0 %v2821_v24  ;;  %2394 = vmatprep.mubr.msk.f32.mxu0 %vm3154_vm0, %v3155_v1  ;;  %v2833_v35 = vpack.c.bf16 %v996_v34, %v995_v6  ;;  %v905_v24 = vld [vmem:[#allocation5 + $0x7c8] sm:$0xff]  ;;  %v2896_v21 = vpack.c.bf16 %v1279_v20, %v1278_v19  ;;  %v1473_v20 = vld [vmem:[#allocation5 + $0x820] sm:$0xff] }
 0x24c   :  { %2823 = vmatprep.subr.bf16.mxu0 %v3153_v0  ;;  %2805 = vmatprep.subr.bf16.mxu1 %v3153_v0  ;;  %v2809_v25 = vpack.c.bf16 %v905_v24, %v904_v23  ;;  %v1281_v23 = vld [vmem:[#allocation5 + $0x628] sm:$0xff] }
 0x24e   :  { %2807 = vmatpush3.bf16.msra.mxu1 %v2806_v22  ;;  %v1280_v22 = vld [vmem:[#allocation5 + $0x620] sm:$0xff] }
 0x24f   :  { %2825 = vmatpush3.bf16.msra.mxu0 %v2824_v27  ;;  %2808 = vmatprep.subr.bf16.mxu1 %v3153_v0  ;;  %v907_v27 = vld [vmem:[#allocation5 + $0x7d8] sm:$0xff]  ;;  %v2899_v24 = vpack.c.bf16 %v1281_v23, %v1280_v22  ;;  %v1491_v22 = vld [vmem:[#allocation5 + $0x8b0] sm:$0xff] }
 0x250   :  { %2826 = vmatprep.subr.bf16.mxu0 %v3153_v0  ;;  %v2812_v28 = vpack.c.bf16 %v907_v27, %v906_v26  ;;  %v1283_v26 = vld [vmem:[#allocation5 + $0x638] sm:$0xff] }
 0x252   :  { %2810 = vmatpush3.bf16.msra.mxu1 %v2809_v25  ;;  %v1282_v25 = vld [vmem:[#allocation5 + $0x630] sm:$0xff] }
 0x253   :  { %2828 = vmatpush3.bf16.msra.mxu0 %v2827_v30  ;;  %2811 = vmatprep.subr.bf16.mxu1 %v3153_v0  ;;  %v909_v30 = vld [vmem:[#allocation5 + $0x7e8] sm:$0xff]  ;;  %v2902_v27 = vpack.c.bf16 %v1283_v26, %v1282_v25  ;;  %v1390_v25 = vld [vmem:[#allocation5 + $0x460] sm:$0xff] }
 0x254   :  { %2829 = vmatprep.subr.bf16.mxu0 %v3153_v0  ;;  %v2815_v31 = vpack.c.bf16 %v909_v30, %v908_v29  ;;  %v1285_v29 = vld [vmem:[#allocation5 + $0x648] sm:$0xff] }
 0x255   :  { %v1391_v26 = vld [vmem:[#allocation5 + $0x468] sm:$0xff] }
 0x256   :  { %2813 = vmatpush3.bf16.msra.mxu1 %v2812_v28  ;;  %v1284_v28 = vld [vmem:[#allocation5 + $0x640] sm:$0xff] }
 0x257   :  { %2831 = vmatpush3.bf16.msra.mxu0 %v2830_v33  ;;  %2814 = vmatprep.subr.bf16.mxu1 %v3153_v0  ;;  %v911_v33 = vld [vmem:[#allocation5 + $0x7f8] sm:$0xff]  ;;  %v2905_v30 = vpack.c.bf16 %v1285_v29, %v1284_v28  ;;  %v1475_v29 = vld [vmem:[#allocation5 + $0x830] sm:$0xff] }
 0x258   :  { %2832 = vmatprep.subr.bf16.mxu0 %v3153_v0  ;;  %v2818_v6 = vpack.c.bf16 %v911_v33, %v910_v32  ;;  %v1287_v32 = vld [vmem:[#allocation5 + $0x658] sm:$0xff]  ;;  %v1378_v33 = vld [vmem:[#allocation5 + $0x400] sm:$0xff] }
 0x25a   :  { %2816 = vmatpush3.bf16.msra.mxu1 %v2815_v31  ;;  %v1286_v31 = vld [vmem:[#allocation5 + $0x650] sm:$0xff] }
 0x25b   :  { %2834 = vmatpush3.bf16.msra.mxu0 %v2833_v35  ;;  %2817 = vmatprep.subr.bf16.mxu1 %v3153_v0 }
 0x25c   :  { %2835 = vmatprep.subr.bf16.mxu0 %v3153_v0 }
 0x25e   :  { %2819 = vmatpush3.bf16.msra.mxu1 %v2818_v6  ;;  %v1379_v6 = vld [vmem:[#allocation5 + $0x408] sm:$0xff] }
 0x25f   :  { %2837 = vmatpush3.bf16.msra.mxu0 %v2836_v38  ;;  %2844 = vmatprep.subr.bf16.mxu1 %v3153_v0 }
 0x260   :  { %2838 = vmatprep.subr.bf16.mxu0 %v3153_v0 }
 0x263   :  { %2840 = vmatpush3.bf16.msra.mxu0 %v2839_v41  ;;  %v1094_v41 = vld [vmem:[#allocation5 + $0x288] sm:$0xff] }
 0x264   :  { %2841 = vmatprep.subr.bf16.mxu0 %v3153_v0  ;;  %v2845_v43 = vpack.c.bf16 %v1094_v41, %v1093_v40  ;;  %v1289_v40 = vld [vmem:[#allocation5 + $0x668] sm:$0xff]  ;;  %v1382_v41 = vld [vmem:[#allocation5 + $0x420] sm:$0xff] }
 0x267   :  { %2843 = vmatpush3.bf16.msra.mxu0 %v2842_v45  ;;  %v1095_v45 = vld [vmem:[#allocation5 + $0x290] sm:$0xff] }
 0x268   :  { %2868 = vmatprep.subr.bf16.mxu0 %v3153_v0  ;;  %v2848_v47 = vpack.c.bf16 %v1096_v46, %v1095_v45  ;;  %v1291_v46 = vld [vmem:[#allocation5 + $0x678] sm:$0xff] }
 0x26a   :  { %2395 = vmatmul.mubr.f32.vlgmr.msra.gmra.mrb[8].mxu0 %v3338_v50 }
 0x26b   :  { %2870 = vmatpush3.bf16.msra.mxu0 %v2869_v49  ;;  %2464 = vmatprep.mubr.msk.f32.mxu0 %vm3154_vm0, %v3155_v1  ;;  %v1098_v49 = vld [vmem:[#allocation5 + $0x2a8] sm:$0xff] }
 0x26c   :  { %2871 = vmatprep.subr.bf16.mxu0 %v3153_v0  ;;  %v2851_v51 = vpack.c.bf16 %v1098_v49, %v1097_v48  ;;  %v1385_v48 = vld [vmem:[#allocation5 + $0x438] sm:$0xff]  ;;  %v1719_v49 = vld [vmem:[#allocation7 + $0xa] ss:$0 sm:$0xff] }
 0x26f   :  { %2873 = vmatpush3.bf16.msra.mxu0 %v2872_v53  ;;  %v1100_v53 = vld [vmem:[#allocation5 + $0x2b8] sm:$0xff] }
 0x270   :  { %2874 = vmatprep.subr.bf16.mxu0 %v3153_v0  ;;  %v2854_v60 = vpack.c.bf16 %v1100_v53, %v1099_v52  ;;  %v1486_v52 = vld [vmem:[#allocation5 + $0x888] sm:$0xff] }
 0x273   :  { %2876 = vmatpush3.bf16.msra.mxu0 %v2875_v55  ;;  %v1102_v55 = vld [vmem:[#allocation5 + $0x2c8] sm:$0xff] }
 0x274   :  { %2877 = vmatprep.subr.bf16.mxu0 %v3153_v0  ;;  %v2857_v56 = vpack.c.bf16 %v1102_v55, %v1101_v54 }
 0x277   :  { %2879 = vmatpush3.bf16.msra.mxu0 %v2878_v14  ;;  %v1104_v14 = vld [vmem:[#allocation5 + $0x2d8] sm:$0xff] }
 0x278   :  { %2880 = vmatprep.subr.bf16.mxu0 %v3153_v0  ;;  %v2860_v58 = vpack.c.bf16 %v1104_v14, %v1103_v57  ;;  %v1469_v14 = vld [vmem:[#allocation5 + $0x800] sm:$0xff] }
 0x27b   :  { %2882 = vmatpush3.bf16.msra.mxu0 %v2881_v59  ;;  %v1105_v59 = vld [vmem:[#allocation5 + $0x2e0] sm:$0xff] }
 0x27c   :  { %2883 = vmatprep.subr.bf16.mxu0 %v3153_v0 }
 0x27f   :  { %2885 = vmatpush3.bf16.msra.mxu0 %v2884_v63  ;;  %v2863_v63 = vpack.c.bf16 %v1106_v61, %v1105_v59  ;;  %v1488_v59 = vld [vmem:[#allocation5 + $0x898] sm:$0xff]  ;;  %v1386_v61 = vld [vmem:[#allocation5 + $0x440] sm:$0xff] }
 0x280   :  { %2886 = vmatprep.subr.bf16.mxu0 %v3153_v0 }
 0x283   :  { %2888 = vmatpush3.bf16.msra.mxu0 %v2887_v4  ;;  %v1108_v4 = vld [vmem:[#allocation5 + $0x2f8] sm:$0xff] }
 0x284   :  { %2889 = vmatprep.subr.bf16.mxu0 %v3153_v0  ;;  %v2866_v10 = vpack.c.bf16 %v1108_v4, %v1107_v3 }
 0x287   :  { %2891 = vmatpush3.bf16.msra.mxu0 %v2890_v13  ;;  %v1277_v13 = vld [vmem:[#allocation5 + $0x608] sm:$0xff] }
 0x288   :  { %2916 = vmatprep.subr.bf16.mxu0 %v3153_v0  ;;  %v2893_v17 = vpack.c.bf16 %v1277_v13, %v1276_v12  ;;  %v1388_v12 = vld [vmem:[#allocation5 + $0x450] sm:$0xff]  ;;  %v1389_v13 = vld [vmem:[#allocation5 + $0x458] sm:$0xff] }
 0x289   :  { %v2932_v23 = vpack.c.bf16 %v1389_v13, %v1388_v12  ;;  %v1585_v13 = vld [vmem:[#allocation5 + $0x940] sm:$0xff] }
 0x28a   :  { %2465 = vmatmul.mubr.f32.vlgmr.msra.gmra.mrb[10].mxu0 %v3338_v50 }
 0x28b   :  { %2534 = vmatprep.mubr.msk.f32.mxu0 %vm3154_vm0, %v3155_v1 }
 0x2fd   :  { %v691_v34 = vpop.f32.mrb[4].mxu0 }
 0x2fe   :  { %v2291_v35 = vpop.f32.mrb[5].mxu0  ;;  %v3374_v11 = vadd.f32 %v1713_v5, %v691_v34  ;;  %v1380_v34 = vld [vmem:[#allocation5 + $0x410] sm:$0xff] }
 0x2ff   :  { %v2917_v35 = vpack.c.bf16 %v1379_v6, %v1378_v33  ;;  %v1471_v5 = vld [vmem:[#allocation5 + $0x810] sm:$0xff]  ;;  %v1477_v6 = vld [vmem:[#allocation5 + $0x840] sm:$0xff] }
 0x300   :  { %v696_v18 = vmax.f32 %v3374_v11, 0.0  ;;  %v1476_v11 = vld [vmem:[#allocation5 + $0x838] sm:$0xff] }
 0x301   :  { %2918 = vmatpush3.bf16.msra.mxu0 %v2917_v35  ;;  %v1495_v35 = vld [vmem:[#allocation5 + $0x8d0] sm:$0xff] }
 0x302   :  { %2919 = vmatprep.subr.bf16.mxu0 %v3153_v0 }
 0x31d   :  { %v1890_v36 = vpop.f32.mrb[6].mxu0 }
 0x31e   :  { %v1891_v38 = vpop.f32.mrb[7].mxu0 }
 0x31f   :  { %v1892_v39 = vadd.f32 %v1891_v38, %v1890_v36  ;;  %v1381_v36 = vld [vmem:[#allocation5 + $0x418] sm:$0xff]  ;;  %v1288_v38 = vld [vmem:[#allocation5 + $0x660] sm:$0xff] }
 0x321   :  { %v892_v42 = vadd.f32 %v1892_v39, %v1716_v37  ;;  %v2908_v37 = vpack.c.bf16 %v1287_v32, %v1286_v31  ;;  %v2920_v39 = vpack.c.bf16 %v1381_v36, %v1380_v34  ;;  %v1494_v31 = vld [vmem:[#allocation5 + $0x8c8] sm:$0xff]  ;;  %v2954_v32 = vpack.c.bf16 %v1476_v11, %v1475_v29  ;;  %v1496_v36 = vld [vmem:[#allocation5 + $0x8d8] sm:$0xff] }
 0x322   :  { %v1478_v34 = vld [vmem:[#allocation5 + $0x848] sm:$0xff] }
 0x323   :  { %v895_v44 = vmax.f32 %v892_v42, 0.0  ;;  %v1383_v42 = vld [vmem:[#allocation5 + $0x428] sm:$0xff]  ;;  %2921 = vmatpush3.bf16.msra.mxu0 %v2920_v39  ;;  %v1479_v39 = vld [vmem:[#allocation5 + $0x850] sm:$0xff] }
 0x324   :  { %v2923_v45 = vpack.c.bf16 %v1383_v42, %v1382_v41  ;;  %2922 = vmatprep.subr.bf16.mxu0 %v3153_v0  ;;  %v1497_v41 = vld [vmem:[#allocation5 + $0x8e0] sm:$0xff]  ;;  %v1498_v42 = vld [vmem:[#allocation5 + $0x8e8] sm:$0xff] }
 0x325   :  { %2360 = vmatmul.mubr.f32.vlgmr.msra.gmra.mrb[6].mxu1 %v895_v44  ;;  %v1290_v44 = vld [vmem:[#allocation5 + $0x670] sm:$0xff] }
 0x326   :  { %2846 = vmatpush3.bf16.msra.mxu1 %v2845_v43  ;;  %2429 = vmatprep.mubr.msk.f32.mxu1 %vm3154_vm0, %v3155_v1  ;;  %v2911_v43 = vpack.c.bf16 %v1289_v40, %v1288_v38  ;;  %v2914_v54 = vpack.c.bf16 %v1291_v46, %v1290_v44  ;;  %v2960_v38 = vpack.c.bf16 %v1496_v36, %v1495_v35  ;;  %v1480_v40 = vld [vmem:[#allocation5 + $0x858] sm:$0xff]  ;;  %v1482_v46 = vld [vmem:[#allocation5 + $0x868] sm:$0xff] }
 0x327   :  { %2847 = vmatprep.subr.bf16.mxu1 %v3153_v0  ;;  %2924 = vmatpush3.bf16.msra.mxu0 %v2923_v45  ;;  %v2964_v44 = vpack.c.bf16 %v1498_v42, %v1497_v41  ;;  %v1481_v45 = vld [vmem:[#allocation5 + $0x860] sm:$0xff]  ;;  %v1720_v42 = vld [vmem:[#allocation7 + $0x8] ss:$0 sm:$0xff] }
 0x328   :  { %2925 = vmatprep.subr.bf16.mxu0 %v3153_v0 }
 0x32a   :  { %2849 = vmatpush3.bf16.msra.mxu1 %v2848_v47  ;;  %v1384_v47 = vld [vmem:[#allocation5 + $0x430] sm:$0xff] }
 0x32b   :  { %2850 = vmatprep.subr.bf16.mxu1 %v3153_v0  ;;  %v2926_v55 = vpack.c.bf16 %v1385_v48, %v1384_v47  ;;  %v1499_v47 = vld [vmem:[#allocation5 + $0x8f0] sm:$0xff]  ;;  %v1500_v48 = vld [vmem:[#allocation5 + $0x8f8] sm:$0xff] }
 0x32d   :  { %2927 = vmatpush3.bf16.msra.mxu0 %v2926_v55  ;;  %v1484_v55 = vld [vmem:[#allocation5 + $0x878] sm:$0xff] }
 0x32e   :  { %2852 = vmatpush3.bf16.msra.mxu1 %v2851_v51  ;;  %v1485_v51 = vld [vmem:[#allocation5 + $0x880] sm:$0xff]  ;;  %2928 = vmatprep.subr.bf16.mxu0 %v3153_v0 }
 0x32f   :  { %2853 = vmatprep.subr.bf16.mxu1 %v3153_v0  ;;  %v2940_v57 = vpack.c.bf16 %v1486_v52, %v1485_v51  ;;  %v1393_v51 = vld [vmem:[#allocation5 + $0x478] sm:$0xff] }
 0x332   :  { %2855 = vmatpush3.bf16.msra.mxu1 %v2854_v60 }
 0x333   :  { %2856 = vmatprep.subr.bf16.mxu1 %v3153_v0 }
 0x336   :  { %2858 = vmatpush3.bf16.msra.mxu1 %v2857_v56 }
 0x337   :  { %2859 = vmatprep.subr.bf16.mxu1 %v3153_v0 }
 0x33a   :  { %2861 = vmatpush3.bf16.msra.mxu1 %v2860_v58  ;;  %v1487_v58 = vld [vmem:[#allocation5 + $0x890] sm:$0xff] }
 0x33b   :  { %2862 = vmatprep.subr.bf16.mxu1 %v3153_v0  ;;  %v2944_v4 = vpack.c.bf16 %v1488_v59, %v1487_v58 }
 0x33d   :  { %v1074_v7 = vpop.f32.mrb[8].mxu0 }
 0x33e   :  { %v1075_v8 = vadd.f32 %v1717_v2, %v1074_v7  ;;  %2864 = vmatpush3.bf16.msra.mxu1 %v2863_v63  ;;  %v2396_v9 = vpop.f32.mrb[9].mxu0  ;;  %v1387_v63 = vld [vmem:[#allocation5 + $0x448] sm:$0xff]  ;;  %v2942_v2 = vpack.c.bf16 %v1470_v16, %v1469_v14  ;;  %v1472_v7 = vld [vmem:[#allocation5 + $0x818] sm:$0xff]  ;;  %v1577_v14 = vld [vmem:[#allocation5 + $0x900] sm:$0xff] }
 0x33f   :  { %2865 = vmatprep.subr.bf16.mxu1 %v3153_v0  ;;  %v2929_v9 = vpack.c.bf16 %v1387_v63, %v1386_v61  ;;  %v1578_v16 = vld [vmem:[#allocation5 + $0x908] sm:$0xff] }
 0x340   :  { %1078 = vst [vmem:[#allocation8] sm:$0xff] %v1075_v8  ;;  %v3379_v15 = vsel %vm986_vm1, %v1075_v8, -1e+30  ;;  %v1489_v8 = vld [vmem:[#allocation5 + $0x8a0] sm:$0xff]  ;;  %v2973_v63 = vpack.c.bf16 %v1578_v16, %v1577_v14 }
 0x341   :  { %1080 = vmax.xlane.f32.xlu0 %v3379_v15  ;;  %2930 = vmatpush3.bf16.msra.mxu0 %v2929_v9  ;;  %v1583_v9 = vld [vmem:[#allocation5 + $0x930] sm:$0xff] }
 0x342   :  { %2867 = vmatpush3.bf16.msra.mxu1 %v2866_v10  ;;  %v1490_v10 = vld [vmem:[#allocation5 + $0x8a8] sm:$0xff]  ;;  %2931 = vmatprep.subr.bf16.mxu0 %v3153_v0 }
 0x343   :  { %2892 = vmatprep.subr.bf16.mxu1 %v3153_v0  ;;  %v2948_v19 = vpack.c.bf16 %v1490_v10, %v1489_v8  ;;  %v1584_v10 = vld [vmem:[#allocation5 + $0x938] sm:$0xff] }
 0x344   :  { %v2982_v12 = vpack.c.bf16 %v1584_v10, %v1583_v9 }
 0x345   :  { %2430 = vmatmul.mubr.f32.vlgmr.msra.gmra.mrb[8].mxu1 %v696_v18  ;;  %2933 = vmatpush3.bf16.msra.mxu0 %v2932_v23  ;;  %v1590_v23 = vld [vmem:[#allocation5 + $0x968] sm:$0xff] }
 0x346   :  { %2894 = vmatpush3.bf16.msra.mxu1 %v2893_v17  ;;  %2499 = vmatprep.mubr.msk.f32.mxu1 %vm3154_vm0, %v3155_v1  ;;  %v2946_v17 = vpack.c.bf16 %v1472_v7, %v1471_v5  ;;  %v1581_v7 = vld [vmem:[#allocation5 + $0x920] sm:$0xff] }
 0x347   :  { %2895 = vmatprep.subr.bf16.mxu1 %v3153_v0  ;;  %2934 = vmatprep.subr.bf16.mxu0 %v3153_v0 }
 0x34a   :  { %2897 = vmatpush3.bf16.msra.mxu1 %v2896_v21  ;;  %v1474_v21 = vld [vmem:[#allocation5 + $0x828] sm:$0xff] }
 0x34b   :  { %2898 = vmatprep.subr.bf16.mxu1 %v3153_v0 }
 0x34e   :  { %2900 = vmatpush3.bf16.msra.mxu1 %v2899_v24  ;;  %v1492_v24 = vld [vmem:[#allocation5 + $0x8b8] sm:$0xff] }
 0x34f   :  { %2901 = vmatprep.subr.bf16.mxu1 %v3153_v0  ;;  %v2952_v28 = vpack.c.bf16 %v1492_v24, %v1491_v22  ;;  %v1589_v22 = vld [vmem:[#allocation5 + $0x960] sm:$0xff] }
 0x350   :  { %v2991_v24 = vpack.c.bf16 %v1590_v23, %v1589_v22 }
 0x352   :  { %2903 = vmatpush3.bf16.msra.mxu1 %v2902_v27  ;;  %v2950_v27 = vpack.c.bf16 %v1474_v21, %v1473_v20  ;;  %v1588_v20 = vld [vmem:[#allocation5 + $0x958] sm:$0xff] }
 0x353   :  { %2904 = vmatprep.subr.bf16.mxu1 %v3153_v0 }
 0x356   :  { %2906 = vmatpush3.bf16.msra.mxu1 %v2905_v30  ;;  %v1493_v30 = vld [vmem:[#allocation5 + $0x8c0] sm:$0xff] }
 0x357   :  { %2907 = vmatprep.subr.bf16.mxu1 %v3153_v0  ;;  %v2956_v33 = vpack.c.bf16 %v1494_v31, %v1493_v30 }
 0x35a   :  { %2909 = vmatpush3.bf16.msra.mxu1 %v2908_v37  ;;  %v2958_v37 = vpack.c.bf16 %v1478_v34, %v1477_v6 }
 0x35b   :  { %2910 = vmatprep.subr.bf16.mxu1 %v3153_v0 }
 0x35d   :  { %v1271_v53 = vpop.f32.mrb[10].mxu0 }
 0x35e   :  { %2912 = vmatpush3.bf16.msra.mxu1 %v2911_v43  ;;  %v2466_v60 = vpop.f32.mrb[11].mxu0  ;;  %v1272_v56 = vadd.f32 %v1719_v49, %v1271_v53  ;;  %v2962_v43 = vpack.c.bf16 %v1480_v40, %v1479_v39  ;;  %v1392_v49 = vld [vmem:[#allocation5 + $0x470] sm:$0xff]  ;;  %v2966_v53 = vpack.c.bf16 %v1482_v46, %v1481_v45 }
 0x35f   :  { %2913 = vmatprep.subr.bf16.mxu1 %v3153_v0  ;;  %v2938_v52 = vpack.c.bf16 %v1393_v51, %v1392_v49  ;;  %v2968_v60 = vpack.c.bf16 %v1500_v48, %v1499_v47 }
 0x360   :  { %v1275_v3 = vmax.f32 %v1272_v56, 0.0 }
 0x362   :  { %2915 = vmatpush3.bf16.msra.mxu1 %v2914_v54  ;;  %v1483_v54 = vld [vmem:[#allocation5 + $0x870] sm:$0xff] }
 0x363   :  { %2941 = vmatprep.subr.bf16.mxu1 %v2940_v57  ;;  %v2970_v56 = vpack.c.bf16 %v1484_v55, %v1483_v54  ;;  %v1715_v57 = vld [vmem:[#allocation7 + $0x7] ss:$0 sm:$0xff] }
 0x365   :  { %2500 = vmatmul.mubr.f32.vlgmr.msra.gmra.mrb[8].mxu1 %v1275_v3  ;;  %v1579_v3 = vld [vmem:[#allocation5 + $0x910] sm:$0xff] }
 0x366   :  { %2943 = vmatpush3.bf16.msra.mxu1 %v2942_v2  ;;  %1570 = vmatprep.mubr.f32.mxu1 %v696_v18  ;;  %v2935_v18 = vpack.c.bf16 %v1391_v26, %v1390_v25  ;;  %v1591_v25 = vld [vmem:[#allocation5 + $0x970] sm:$0xff]  ;;  %v1592_v26 = vld [vmem:[#allocation5 + $0x978] sm:$0xff] }
 0x367   :  { %2945 = vmatprep.subr.bf16.mxu1 %v2944_v4  ;;  %v1580_v4 = vld [vmem:[#allocation5 + $0x918] sm:$0xff] }
 0x368   :  { %2936 = vmatpush3.bf16.msra.mxu0 %v2935_v18  ;;  %v2976_v5 = vpack.c.bf16 %v1580_v4, %v1579_v3 }
 0x369   :  { %2937 = vmatprep.subr.bf16.mxu0 %v3153_v0 }
 0x36a   :  { %2947 = vmatpush3.bf16.msra.mxu1 %v2946_v17  ;;  %v1586_v17 = vld [vmem:[#allocation5 + $0x948] sm:$0xff] }
 0x36b   :  { %2949 = vmatprep.subr.bf16.mxu1 %v2948_v19  ;;  %v2985_v19 = vpack.c.bf16 %v1586_v17, %v1585_v13 }
 0x36c   :  { %2939 = vmatpush3.bf16.msra.mxu0 %v2938_v52 }
 0x36d   :  { %2972 = vmatprep.subr.bf16.mxu0 %v3153_v0 }
 0x36e   :  { %2951 = vmatpush3.bf16.msra.mxu1 %v2950_v27  ;;  %v2994_v27 = vpack.c.bf16 %v1592_v26, %v1591_v25 }
 0x36f   :  { %2953 = vmatprep.subr.bf16.mxu1 %v2952_v28  ;;  %v1718_v28 = vld [vmem:[#allocation7 + $0x5] ss:$0 sm:$0xff] }
 0x372   :  { %2955 = vmatpush3.bf16.msra.mxu1 %v2954_v32  ;;  %v1721_v32 = vld [vmem:[#allocation7 + $0xc] ss:$0 sm:$0xff] }
 0x373   :  { %2957 = vmatprep.subr.bf16.mxu1 %v2956_v33 }
 0x376   :  { %2959 = vmatpush3.bf16.msra.mxu1 %v2958_v37 }
 0x377   :  { %2961 = vmatprep.subr.bf16.mxu1 %v2960_v38 }
 0x37a   :  { %2963 = vmatpush3.bf16.msra.mxu1 %v2962_v43 }
 0x37b   :  { %2965 = vmatprep.subr.bf16.mxu1 %v2964_v44 }
 0x37e   :  { %2967 = vmatpush3.bf16.msra.mxu1 %v2966_v53 }
 0x37f   :  { %2969 = vmatprep.subr.bf16.mxu1 %v2968_v60 }
 0x382   :  { %2971 = vmatpush3.bf16.msra.mxu1 %v2970_v56 }
 0x385   :  { %1571 = vmatmul.mubr.f32.vlgmr.msra.gmra.mrb[10].mxu1 %v3338_v50  ;;  %v1582_v50 = vld [vmem:[#allocation5 + $0x928] sm:$0xff] }
 0x386   :  { %v2979_v8 = vpack.c.bf16 %v1582_v50, %v1581_v7 }
 0x3ce   :  { %v1081_v36 = vpop.xlane.xlu0 %1080 }
 0x3cf   :  { %v1082_v40 = vsub.f32 %v3379_v15, %v1081_v36 }
 0x3d1   :  { %v1083_v41 = vmul.f32 1.442695, %v1082_v40 }
 0x3f8   :  { %v978_v58 = vpop.f32.mrb[6].mxu1 }
 0x3f9   :  { %v2997_v59 = vadd.f32 %v1715_v57, %v978_v58  ;;  %v2361_v61 = vpop.f32.mrb[7].mxu1 }
 0x3fb   :  { %v983_v2 = vmax.f32 %v2997_v59, 0.0 }
 0x3fd   :  { %2535 = vmatmul.mubr.f32.vlgmr.msra.gmra.mrb[12].mxu0 %v983_v2 }
 0x3fe   :  { %2974 = vmatpush3.bf16.msra.mxu0 %v2973_v63  ;;  %2569 = vmatprep.mubr.msk.f32.mxu0 %vm3154_vm0, %v3155_v1  ;;  %v1587_v1 = vld [vmem:[#allocation5 + $0x950] sm:$0xff] }
 0x3ff   :  { %2975 = vmatprep.subr.bf16.mxu0 %v3153_v0  ;;  %v2988_v21 = vpack.c.bf16 %v1588_v20, %v1587_v1 }
 0x402   :  { %2977 = vmatpush3.bf16.msra.mxu0 %v2976_v5 }
 0x403   :  { %2978 = vmatprep.subr.bf16.mxu0 %v3153_v0 }
 0x406   :  { %2980 = vmatpush3.bf16.msra.mxu0 %v2979_v8 }
 0x407   :  { %2981 = vmatprep.subr.bf16.mxu0 %v3153_v0 }
 0x40a   :  { %2983 = vmatpush3.bf16.msra.mxu0 %v2982_v12 }
 0x40b   :  { %2984 = vmatprep.subr.bf16.mxu0 %v3153_v0 }
 0x40e   :  { %2986 = vmatpush3.bf16.msra.mxu0 %v2985_v19 }
 0x40f   :  { %2987 = vmatprep.subr.bf16.mxu0 %v3153_v0 }
 0x412   :  { %2989 = vmatpush3.bf16.msra.mxu0 %v2988_v21 }
 0x413   :  { %2990 = vmatprep.subr.bf16.mxu0 %v3153_v0 }
 0x416   :  { %2992 = vmatpush3.bf16.msra.mxu0 %v2991_v24 }
 0x417   :  { %2993 = vmatprep.subr.bf16.mxu0 %v3153_v0 }
 0x41a   :  { %2995 = vmatpush3.bf16.msra.mxu0 %v2994_v27 }
 0x438   :  { %v1358_v29 = vpop.f32.mrb[8].mxu1 }
 0x439   :  { %v2998_v11 = vadd.f32 %v1718_v28, %v1358_v29  ;;  %v2501_v18 = vpop.f32.mrb[9].mxu1 }
 0x43b   :  { %1363 = vst [vmem:[#allocation8 + $0x8] sm:$0xff] %v2998_v11  ;;  %v1364_v30 = vsel %vm986_vm1, %v2998_v11, -1e+30 }
 0x43c   :  { %1365 = vmax.xlane.f32.xlu0 %v1364_v30 }
 0x458   :  { %v2027_v31 = vpop.f32.mrb[10].mxu1 }
 0x459   :  { %v2028_v33 = vpop.f32.mrb[11].mxu1 }
 0x45a   :  { %v2029_v6 = vadd.f32 %v2028_v33, %v2027_v31 }
 0x45c   :  { %v1573_v34 = vadd.f32 %v2029_v6, %v1721_v32 }
 0x45e   :  { %v1576_v35 = vmax.f32 %v1573_v34, 0.0 }
 0x460   :  { %2570 = vmatmul.mubr.f32.vlgmr.msra.gmra.mrb[12].mxu0 %v1576_v35 }
 0x4c9   :  { %v1366_v37 = vpop.xlane.xlu0 %1365 }
 0x4ca   :  { %v1367_v0 = vsub.f32 %v1364_v30, %v1366_v37 }
 0x4cc   :  { %v1368_v38 = vmul.f32 1.442695, %v1367_v0 }
 0x4ce   :  { %3018 = vpow2.f32 %v1368_v38 }
 0x4cf   :  { %3020 = vpow2.f32 %v1083_v41 }
 0x4d8   :  { %v3019_v39 = vpop.eup %3018 }
 0x4d9   :  { %1370 = vadd.xlane.f32.xlu0 %v3019_v39  ;;  %v3021_v47 = vpop.eup %3020 }
 0x533   :  { %v1659_v43 = vpop.f32.mrb[12].mxu0 }
 0x534   :  { %v2999_v44 = vadd.f32 %v1720_v42, %v1659_v43  ;;  %v2571_v45 = vpop.f32.mrb[13].mxu0 }
 0x536   :  { %1664 = vst [vmem:[#allocation8 + $0x10] sm:$0xff] %v2999_v44  ;;  %v1665_v46 = vsel %vm986_vm1, %v2999_v44, -1e+30 }
 0x537   :  { %1666 = vmax.xlane.f32.xlu1 %v1665_v46 }
 0x53b   :  { %1085 = vadd.xlane.f32.xlu1 %v3021_v47 }
 0x566   :  { %v1371_v48 = vpop.xlane.xlu0 %1370 }
 0x567   :  { %3022 = vrcp.f32 %v1371_v48 }
 0x571   :  { %v3023_v49 = vpop.eup %3022 }
 0x572   :  { %v1373_v51 = vmul.f32 %v3023_v49, %v1371_v48 }
 0x574   :  { %v1374_v52 = vsub.f32 2.0, %v1373_v51 }
 0x576   :  { %v1375_v53 = vmul.f32 %v3023_v49, %v1374_v52 }
 0x578   :  { %v1376_v15 = vmul.f32 %v3019_v39, %v1375_v53 }
 0x57a   :  { %1377 = vst [vmem:[#allocation9 + $0x8] sm:$0xff] %v1376_v15 }
 0x5c4   :  { %v1667_v60 = vpop.xlane.xlu1 %1666 }
 0x5c5   :  { %v1668_v54 = vsub.f32 %v1665_v46, %v1667_v60 }
 0x5c7   :  { %v1669_v55 = vmul.f32 1.442695, %v1668_v54 }
 0x5c8   :  { %v1086_v56 = vpop.xlane.xlu1 %1085 }
 0x5c9   :  { %3024 = vpow2.f32 %v1669_v55 }
 0x5ca   :  { %3026 = vrcp.f32 %v1086_v56 }
 0x5d3   :  { %v3025_v57 = vpop.eup %3024 }
 0x5d4   :  { %v3027_v62 = vpop.eup %3026  ;;  %1671 = vadd.xlane.f32.xlu1 %v3025_v57 }
 0x5d5   :  { %v1088_v14 = vmul.f32 %v3027_v62, %v1086_v56 }
 0x5d7   :  { %v1089_v16 = vsub.f32 2.0, %v1088_v14 }
 0x5d9   :  { %v1090_v58 = vmul.f32 %v3027_v62, %v1089_v16 }
 0x5db   :  { %v1091_v59 = vmul.f32 %v3021_v47, %v1090_v58 }
 0x5dd   :  { %1092 = vst [vmem:[#allocation9] sm:$0xff] %v1091_v59 }
 0x5de   :  { %3107 = shalt.err (!%p3104_p0)
}
 0x5df   :  { %s3108_s29 = scalar_lea.hbm %s3447_s3, 384 }
 0x5e0   :  { %p3109_p1 = scmp.ne.s32.totalorder %s3447_s3, %s3108_s29  ;;  %p3112_p2 = scmp.lt.u32.totalorder %s3108_s29, %s3447_s3 }
 0x5e2   :  { %p3114_p3 = pnand %p3112_p2, %p3109_p1 }
 0x5e4   :  { %3117 = shalt.err (!%p3114_p3)
}
 0x5e5   :  { %1688 = dma.vmem_to_hbm [thread:$0]  %s1686_s25, 384, %s3447_s3, [#allocation4]  }
 0x5e6   :  { %s3157_s10 = smov [#allocation9]  }
 0x5e7   :  { %s1695_s11 = sshll.u32 %s3157_s10, 4  ;;  %s1696_s11 = int_to_ptr.vmem [resolvable:$true] %s1695_s11 }
 0x5e8   :  { %s3118_s12 = scalar_lea.vmem %s1696_s11, 384  ;;  %p3123_p5 = scmp.lt.s32.totalorder %s1696_s11, %s1696_s11 }
 0x5e9   :  { %p3119_p4 = scmp.ne.s32.totalorder %s1696_s11, %s3118_s12  ;;  %p3124_p6 = scmp.lt.s32.totalorder %s3118_s12, %s3118_s12 }
 0x5eb   :  { %p3125_p7 = por %p3124_p6, %p3123_p5 }
 0x5ed   :  { %p3126_p8 = pnand %p3125_p7, %p3119_p4 }
 0x661   :  { %v1672_v61 = vpop.xlane.xlu1 %1671 }
 0x662   :  { %3028 = vrcp.f32 %v1672_v61 }
 0x66c   :  { %v3029_v63 = vpop.eup %3028 }
 0x66d   :  { %v1674_v2 = vmul.f32 %v3029_v63, %v1672_v61 }
 0x66f   :  { %v1675_v3 = vsub.f32 2.0, %v1674_v2 }
 0x671   :  { %v1676_v4 = vmul.f32 %v3029_v63, %v1675_v3 }
 0x673   :  { %v1677_v5 = vmul.f32 %v3025_v57, %v1676_v4 }
 0x675   :  { %1678 = vst [vmem:[#allocation9 + $0x10] sm:$0xff] %v1677_v5 }
 0x676   :  { %3129 = shalt.err (!%p3126_p8)
}
 0x677   :  { %s3130_s1 = scalar_lea.hbm %s3448_s4, 384 }
 0x678   :  { %p3131_p9 = scmp.ne.s32.totalorder %s3448_s4, %s3130_s1  ;;  %p3134_p10 = scmp.lt.u32.totalorder %s3130_s1, %s3448_s4 }
 0x67a   :  { %p3136_p11 = pnand %p3134_p10, %p3131_p9 }
 0x67c   :  { %3139 = shalt.err (!%p3136_p11)
}
 0x67d   :  { %1698 = dma.vmem_to_hbm [thread:$0]  %s1696_s11, 384, %s3448_s4, [#allocation10]  }
 0x67e   :  { %3144 = dma.done.wait [#allocation4], 384  }
 0x67f   :  { %3145 = vsyncadd [#allocation4], 4294966912 }
 0x680   :  { %3146 = dma.done.wait [#allocation10], 384  }
 0x681   :  { %3147 = vsyncadd [#allocation10], 4294966912 }
 0x682   :  { %1705 = vsyncpa [#allocation3], 1 }
 0x683   :  { %1706 = vsyncpa [#allocation6], 1 }
 0x684   :  { %1707 = vsyncpa [#allocation4], 1 }
 0x685   :  { %1708 = vsyncpa [#allocation10], 1 }

// kernel: tpu_custom_call.1
= control target key start
LH: loop header
LB: loop body
LE: loop exit
PB: predicated region body
PF: predicated region fallthrough
CT: control target
= control target key end

     0   :  { %10 = vsyncpa [#allocation3], 0  ;;  %s3444_s0 = inlined_call_operand.hbm [shape: f32[8,128], index: 0, kind: input, shape index: {}]   ;;  %s3445_s1 = inlined_call_operand.hbm [shape: f32[2432,128], index: 1, kind: input, shape index: {}]   ;;  %s3446_s2 = inlined_call_operand.hbm [shape: f32[13,128], index: 2, kind: input, shape index: {}]   ;;  %s3447_s3 = inlined_call_operand.hbm [shape: f32[8,384], index: 3, kind: output, shape index: {0}]   ;;  %s3448_s4 = inlined_call_operand.hbm [shape: f32[8,384], index: 4, kind: output, shape index: {1}]  }
   0x1   :  { %11 = vsyncpa [#allocation6], 0 }
   0x2   :  { %12 = vsyncpa [#allocation4], 0 }
   0x3   :  { %13 = vsyncpa [#allocation10], 0  ;;  %s3148_s15 = smov [#allocation5]   ;;  %s3030_s19 = scalar_lea.hbm %s3445_s1, 38912 }
   0x4   :  { %s29_s16 = sshll.u32 %s3148_s15, 4  ;;  %p3031_p0 = scmp.ne.s32.totalorder %s3445_s1, %s3030_s19  ;;  %s30_s16 = int_to_ptr.vmem [resolvable:$true] %s29_s16 }
   0x5   :  { %p3034_p1 = scmp.lt.u32.totalorder %s3030_s19, %s3445_s1 }
   0x7   :  { %p3036_p2 = pnand %p3034_p1, %p3031_p0 }
   0x9   :  { %3039 = shalt.err (!%p3036_p2)
}
   0xa   :  { %s3040_s24 = scalar_lea.vmem %s30_s16, 38912  ;;  %p3045_p4 = scmp.lt.s32.totalorder %s30_s16, %s30_s16 }
   0xb   :  { %p3041_p3 = scmp.ne.s32.totalorder %s30_s16, %s3040_s24  ;;  %p3046_p5 = scmp.lt.s32.totalorder %s3040_s24, %s3040_s24 }
   0xd   :  { %p3047_p6 = por %p3046_p5, %p3045_p4 }
   0xf   :  { %p3048_p7 = pnand %p3047_p6, %p3041_p3 }
  0x11   :  { %3051 = shalt.err (!%p3048_p7)
}
  0x12   :  { %s3149_s25 = smov 128   ;;  %s3150_s26 = smov 8  }
  0x13   :  { %35 = dma.hbm_to_vmem [thread:$0]  %s3445_s1, 38912, %s30_s16, [#allocation6], %s3149_s25, %s3149_s25, %s3150_s26  }
  0x14   :  { %s3151_s29 = smov [#allocation2]   ;;  %s3152_s5 = smov [#allocation7]  }
  0x15   :  { %s20_s30 = sshll.u32 %s3151_s29, 4  ;;  %s41_s6 = sshll.u32 %s3152_s5, 4  ;;  %s21_s30 = int_to_ptr.vmem [resolvable:$true] %s20_s30  ;;  %s42_s6 = int_to_ptr.vmem [resolvable:$true] %s41_s6 }
  0x16   :  { %s3052_s9 = scalar_lea.hbm %s3444_s0, 128 }
  0x17   :  { %p3053_p8 = scmp.ne.s32.totalorder %s3444_s0, %s3052_s9  ;;  %p3056_p9 = scmp.lt.u32.totalorder %s3052_s9, %s3444_s0 }
  0x19   :  { %p3058_p10 = pnand %p3056_p9, %p3053_p8 }
  0x1b   :  { %3061 = shalt.err (!%p3058_p10)
}
  0x1c   :  { %s3062_s1 = scalar_lea.vmem %s21_s30, 128  ;;  %p3067_p12 = scmp.lt.s32.totalorder %s21_s30, %s21_s30 }
  0x1d   :  { %p3063_p11 = scmp.ne.s32.totalorder %s21_s30, %s3062_s1  ;;  %p3068_p13 = scmp.lt.s32.totalorder %s3062_s1, %s3062_s1 }
  0x1f   :  { %p3069_p0 = por %p3068_p13, %p3067_p12 }
  0x21   :  { %p3070_p1 = pnand %p3069_p0, %p3063_p11 }
  0x23   :  { %3073 = shalt.err (!%p3070_p1)
}
  0x24   :  { %23 = dma.hbm_to_vmem [thread:$0]  %s3444_s0, 128, %s21_s30, [#allocation3]  }
  0x25   :  { %s3074_s18 = scalar_lea.hbm %s3446_s2, 256 }
  0x26   :  { %p3075_p2 = scmp.ne.s32.totalorder %s3446_s2, %s3074_s18  ;;  %p3078_p3 = scmp.lt.u32.totalorder %s3074_s18, %s3446_s2 }
  0x28   :  { %p3080_p4 = pnand %p3078_p3, %p3075_p2 }
  0x2a   :  { %3083 = shalt.err (!%p3080_p4)
}
  0x2b   :  { %s3084_s23 = scalar_lea.vmem %s42_s6, 256  ;;  %p3089_p6 = scmp.lt.s32.totalorder %s42_s6, %s42_s6 }
  0x2c   :  { %p3085_p5 = scmp.ne.s32.totalorder %s42_s6, %s3084_s23  ;;  %p3090_p7 = scmp.lt.s32.totalorder %s3084_s23, %s3084_s23 }
  0x2e   :  { %p3091_p8 = por %p3090_p7, %p3089_p6 }
  0x30   :  { %p3092_p9 = pnand %p3091_p8, %p3085_p5 }
  0x32   :  { %3095 = shalt.err (!%p3092_p9)
}
  0x33   :  { %47 = dma.hbm_to_vmem [thread:$0]  %s3446_s2, 256, %s42_s6, [#allocation6], %s3149_s25, %s3149_s25, %s3150_s26  }
  0x34   :  { %3140 = dma.done.wait [#allocation3], 128  }
  0x35   :  { %3141 = vsyncadd [#allocation3], 4294967168 }
  0x36   :  { %3142 = dma.done.wait [#allocation6], 39168  }
  0x37   :  { %3143 = vsyncadd [#allocation6], 4294928128  ;;  %v3153_v0 = vmov 0.0|0.0   ;;  %vm3154_vm0 = vmmov 0   ;;  %v3155_v1 = vmov 0.0   ;;  %v58_v2 = vld [vmem:[#allocation5] sm:$0xff] }
  0x38   :  { %2572 = vmatprep.subr.bf16.mxu0 %v3153_v0  ;;  %2079 = vmatprep.mubr.msk.f32.mxu0 %vm3154_vm0, %v3155_v1  ;;  %v59_v3 = vld [vmem:[#allocation5 + $0x8] sm:$0xff]  ;;  %v60_v4 = vld [vmem:[#allocation5 + $0x10] sm:$0xff]  ;;  %v61_v6 = vld [vmem:[#allocation5 + $0x18] sm:$0xff]  ;;  %s3156_s2 = smov [#allocation8]  }
  0x39   :  { %2596 = vmatprep.subr.bf16.mxu1 %v3153_v0  ;;  %2114 = vmatprep.mubr.msk.f32.mxu1 %vm3154_vm0, %v3155_v1  ;;  %v2573_v5 = vpack.c.bf16 %v59_v3, %v58_v2  ;;  %v2576_v7 = vpack.c.bf16 %v61_v6, %v60_v4  ;;  %v62_v8 = vld [vmem:[#allocation5 + $0x20] sm:$0xff]  ;;  %v63_v9 = vld [vmem:[#allocation5 + $0x28] sm:$0xff]  ;;  %v152_v12 = vld [vmem:[#allocation5 + $0x190] sm:$0xff]  ;;  %s1685_s25 = sshll.u32 %s3156_s2, 4  ;;  %s1686_s25 = int_to_ptr.vmem [resolvable:$true] %s1685_s25 }
  0x3a   :  { %v150_v10 = vld [vmem:[#allocation5 + $0x180] sm:$0xff]  ;;  %v151_v11 = vld [vmem:[#allocation5 + $0x188] sm:$0xff]  ;;  %v153_v13 = vld [vmem:[#allocation5 + $0x198] sm:$0xff]  ;;  %v2579_v14 = vpack.c.bf16 %v63_v9, %v62_v8  ;;  %s3096_s26 = scalar_lea.vmem %s1686_s25, 384  ;;  %p3101_p11 = scmp.lt.s32.totalorder %s1686_s25, %s1686_s25 }
  0x3b   :  { %2574 = vmatpush3.bf16.msra.mxu0 %v2573_v5  ;;  %v2597_v15 = vpack.c.bf16 %v151_v11, %v150_v10  ;;  %v64_v16 = vld [vmem:[#allocation5 + $0x30] sm:$0xff]  ;;  %v65_v17 = vld [vmem:[#allocation5 + $0x38] sm:$0xff]  ;;  %v2600_v18 = vpack.c.bf16 %v153_v13, %v152_v12  ;;  %v154_v19 = vld [vmem:[#allocation5 + $0x1a0] sm:$0xff]  ;;  %p3097_p10 = scmp.ne.s32.totalorder %s1686_s25, %s3096_s26  ;;  %p3102_p12 = scmp.lt.s32.totalorder %s3096_s26, %s3096_s26 }
  0x3c   :  { %2575 = vmatprep.subr.bf16.mxu0 %v3153_v0  ;;  %v155_v20 = vld [vmem:[#allocation5 + $0x1a8] sm:$0xff]  ;;  %v2582_v21 = vpack.c.bf16 %v65_v17, %v64_v16  ;;  %v66_v22 = vld [vmem:[#allocation5 + $0x40] sm:$0xff]  ;;  %v156_v25 = vld [vmem:[#allocation5 + $0x1b0] sm:$0xff] }
  0x3d   :  { %2598 = vmatpush3.bf16.msra.mxu1 %v2597_v15  ;;  %v67_v23 = vld [vmem:[#allocation5 + $0x48] sm:$0xff]  ;;  %v2603_v24 = vpack.c.bf16 %v155_v20, %v154_v19  ;;  %v157_v26 = vld [vmem:[#allocation5 + $0x1b8] sm:$0xff]  ;;  %v68_v28 = vld [vmem:[#allocation5 + $0x50] sm:$0xff]  ;;  %p3103_p13 = por %p3102_p12, %p3101_p11 }
  0x3e   :  { %2599 = vmatprep.subr.bf16.mxu1 %v3153_v0  ;;  %v2585_v27 = vpack.c.bf16 %v67_v23, %v66_v22  ;;  %v69_v29 = vld [vmem:[#allocation5 + $0x58] sm:$0xff]  ;;  %v2606_v30 = vpack.c.bf16 %v157_v26, %v156_v25  ;;  %v158_v31 = vld [vmem:[#allocation5 + $0x1c0] sm:$0xff]  ;;  %v159_v32 = vld [vmem:[#allocation5 + $0x1c8] sm:$0xff] }
  0x3f   :  { %2577 = vmatpush3.bf16.msra.mxu0 %v2576_v7  ;;  %v2588_v33 = vpack.c.bf16 %v69_v29, %v68_v28  ;;  %v70_v34 = vld [vmem:[#allocation5 + $0x60] sm:$0xff]  ;;  %v71_v35 = vld [vmem:[#allocation5 + $0x68] sm:$0xff]  ;;  %v2609_v36 = vpack.c.bf16 %v159_v32, %v158_v31  ;;  %v160_v37 = vld [vmem:[#allocation5 + $0x1d0] sm:$0xff]  ;;  %p3104_p0 = pnand %p3103_p13, %p3097_p10 }
  0x40   :  { %2578 = vmatprep.subr.bf16.mxu0 %v3153_v0  ;;  %v161_v38 = vld [vmem:[#allocation5 + $0x1d8] sm:$0xff]  ;;  %v2591_v39 = vpack.c.bf16 %v71_v35, %v70_v34  ;;  %v72_v40 = vld [vmem:[#allocation5 + $0x70] sm:$0xff]  ;;  %v162_v43 = vld [vmem:[#allocation5 + $0x1e0] sm:$0xff] }
  0x41   :  { %2601 = vmatpush3.bf16.msra.mxu1 %v2600_v18  ;;  %v73_v41 = vld [vmem:[#allocation5 + $0x78] sm:$0xff]  ;;  %v2612_v42 = vpack.c.bf16 %v161_v38, %v160_v37  ;;  %v163_v44 = vld [vmem:[#allocation5 + $0x1e8] sm:$0xff]  ;;  %v164_v47 = vld [vmem:[#allocation5 + $0x1f0] sm:$0xff] }
  0x42   :  { %2602 = vmatprep.subr.bf16.mxu1 %v3153_v0  ;;  %v2594_v45 = vpack.c.bf16 %v73_v41, %v72_v40  ;;  %v2615_v46 = vpack.c.bf16 %v163_v44, %v162_v43  ;;  %v165_v48 = vld [vmem:[#allocation5 + $0x1f8] sm:$0xff]  ;;  %v334_v51 = vld [vmem:[#allocation5 + $0x80] sm:$0xff]  ;;  %v335_v52 = vld [vmem:[#allocation5 + $0x88] sm:$0xff] }
  0x43   :  { %2580 = vmatpush3.bf16.msra.mxu0 %v2579_v14  ;;  %v3244_v49 = vld [vmem:[#allocation2] sm:$0xff]  ;;  %v2618_v50 = vpack.c.bf16 %v165_v48, %v164_v47  ;;  %v2645_v53 = vpack.c.bf16 %v335_v52, %v334_v51  ;;  %v336_v54 = vld [vmem:[#allocation5 + $0x90] sm:$0xff]  ;;  %v338_v57 = vld [vmem:[#allocation5 + $0xa0] sm:$0xff] }
  0x44   :  { %2581 = vmatprep.subr.bf16.mxu0 %v3153_v0  ;;  %v337_v55 = vld [vmem:[#allocation5 + $0x98] sm:$0xff]  ;;  %v339_v58 = vld [vmem:[#allocation5 + $0xa8] sm:$0xff]  ;;  %v340_v60 = vld [vmem:[#allocation5 + $0xb0] sm:$0xff] }
  0x45   :  { %2604 = vmatpush3.bf16.msra.mxu1 %v2603_v24  ;;  %v2648_v56 = vpack.c.bf16 %v337_v55, %v336_v54  ;;  %v2651_v59 = vpack.c.bf16 %v339_v58, %v338_v57  ;;  %v341_v61 = vld [vmem:[#allocation5 + $0xb8] sm:$0xff]  ;;  %v342_v63 = vld [vmem:[#allocation5 + $0xc0] sm:$0xff]  ;;  %v343_v2 = vld [vmem:[#allocation5 + $0xc8] sm:$0xff] }
  0x46   :  { %2605 = vmatprep.subr.bf16.mxu1 %v3153_v0  ;;  %v2654_v62 = vpack.c.bf16 %v341_v61, %v340_v60  ;;  %v2657_v3 = vpack.c.bf16 %v343_v2, %v342_v63  ;;  %v344_v4 = vld [vmem:[#allocation5 + $0xd0] sm:$0xff]  ;;  %v345_v5 = vld [vmem:[#allocation5 + $0xd8] sm:$0xff]  ;;  %v346_v7 = vld [vmem:[#allocation5 + $0xe0] sm:$0xff] }
  0x47   :  { %2583 = vmatpush3.bf16.msra.mxu0 %v2582_v21  ;;  %v2660_v6 = vpack.c.bf16 %v345_v5, %v344_v4  ;;  %v347_v8 = vld [vmem:[#allocation5 + $0xe8] sm:$0xff]  ;;  %v348_v10 = vld [vmem:[#allocation5 + $0xf0] sm:$0xff]  ;;  %v349_v11 = vld [vmem:[#allocation5 + $0xf8] sm:$0xff] }
  0x48   :  { %2584 = vmatprep.subr.bf16.mxu0 %v3153_v0  ;;  %v2663_v9 = vpack.c.bf16 %v347_v8, %v346_v7  ;;  %v2666_v12 = vpack.c.bf16 %v349_v11, %v348_v10  ;;  %v242_v13 = vld [vmem:[#allocation5 + $0x300] sm:$0xff]  ;;  %v243_v14 = vld [vmem:[#allocation5 + $0x308] sm:$0xff]  ;;  %v244_v15 = vld [vmem:[#allocation5 + $0x310] sm:$0xff] }
  0x49   :  { %2607 = vmatpush3.bf16.msra.mxu1 %v2606_v30  ;;  %v2621_v16 = vpack.c.bf16 %v243_v14, %v242_v13  ;;  %v245_v17 = vld [vmem:[#allocation5 + $0x318] sm:$0xff]  ;;  %v246_v19 = vld [vmem:[#allocation5 + $0x320] sm:$0xff]  ;;  %v247_v20 = vld [vmem:[#allocation5 + $0x328] sm:$0xff] }
  0x4a   :  { %2608 = vmatprep.subr.bf16.mxu1 %v3153_v0  ;;  %v2624_v18 = vpack.c.bf16 %v245_v17, %v244_v15  ;;  %v2627_v21 = vpack.c.bf16 %v247_v20, %v246_v19  ;;  %v248_v22 = vld [vmem:[#allocation5 + $0x330] sm:$0xff]  ;;  %v249_v23 = vld [vmem:[#allocation5 + $0x338] sm:$0xff]  ;;  %v250_v25 = vld [vmem:[#allocation5 + $0x340] sm:$0xff] }
  0x4b   :  { %2586 = vmatpush3.bf16.msra.mxu0 %v2585_v27  ;;  %v2630_v24 = vpack.c.bf16 %v249_v23, %v248_v22  ;;  %v251_v26 = vld [vmem:[#allocation5 + $0x348] sm:$0xff]  ;;  %v252_v28 = vld [vmem:[#allocation5 + $0x350] sm:$0xff]  ;;  %v253_v29 = vld [vmem:[#allocation5 + $0x358] sm:$0xff] }
  0x4c   :  { %2587 = vmatprep.subr.bf16.mxu0 %v3153_v0  ;;  %v2633_v27 = vpack.c.bf16 %v251_v26, %v250_v25  ;;  %v2636_v30 = vpack.c.bf16 %v253_v29, %v252_v28  ;;  %v254_v31 = vld [vmem:[#allocation5 + $0x360] sm:$0xff]  ;;  %v255_v32 = vld [vmem:[#allocation5 + $0x368] sm:$0xff]  ;;  %v256_v34 = vld [vmem:[#allocation5 + $0x370] sm:$0xff] }
  0x4d   :  { %2610 = vmatpush3.bf16.msra.mxu1 %v2609_v36  ;;  %v257_v35 = vld [vmem:[#allocation5 + $0x378] sm:$0xff]  ;;  %v426_v37 = vld [vmem:[#allocation5 + $0x200] sm:$0xff]  ;;  %v427_v38 = vld [vmem:[#allocation5 + $0x208] sm:$0xff] }
  0x4e   :  { %2611 = vmatprep.subr.bf16.mxu1 %v3153_v0  ;;  %v2642_v36 = vpack.c.bf16 %v257_v35, %v256_v34  ;;  %v428_v40 = vld [vmem:[#allocation5 + $0x210] sm:$0xff]  ;;  %v429_v41 = vld [vmem:[#allocation5 + $0x218] sm:$0xff]  ;;  %v430_v43 = vld [vmem:[#allocation5 + $0x220] sm:$0xff] }
  0x4f   :  { %2589 = vmatpush3.bf16.msra.mxu0 %v2588_v33  ;;  %v2639_v33 = vpack.c.bf16 %v255_v32, %v254_v31  ;;  %v431_v44 = vld [vmem:[#allocation5 + $0x228] sm:$0xff]  ;;  %v433_v47 = vld [vmem:[#allocation5 + $0x238] sm:$0xff]  ;;  %v436_v52 = vld [vmem:[#allocation5 + $0x250] sm:$0xff] }
  0x50   :  { %2590 = vmatprep.subr.bf16.mxu0 %v3153_v0  ;;  %v438_v55 = vld [vmem:[#allocation5 + $0x260] sm:$0xff]  ;;  %v440_v58 = vld [vmem:[#allocation5 + $0x270] sm:$0xff]  ;;  %v518_v63 = vld [vmem:[#allocation5 + $0x488] sm:$0xff] }
  0x51   :  { %2613 = vmatpush3.bf16.msra.mxu1 %v2612_v42  ;;  %v2672_v42 = vpack.c.bf16 %v429_v41, %v428_v40  ;;  %v1709_v61 = vld [vmem:[#allocation7] ss:$0 sm:$0xff]  ;;  %v519_v7 = vld [vmem:[#allocation5 + $0x490] sm:$0xff]  ;;  %v520_v8 = vld [vmem:[#allocation5 + $0x498] sm:$0xff] }
  0x52   :  { %2614 = vmatprep.subr.bf16.mxu1 %v3153_v0  ;;  %v2696_v10 = vpack.c.bf16 %v520_v8, %v519_v7  ;;  %v522_v13 = vld [vmem:[#allocation5 + $0x4a8] sm:$0xff]  ;;  %v524_v19 = vld [vmem:[#allocation5 + $0x4b8] sm:$0xff] }
  0x53   :  { %2592 = vmatpush3.bf16.msra.mxu0 %v2591_v39  ;;  %v2669_v39 = vpack.c.bf16 %v427_v38, %v426_v37  ;;  %v526_v22 = vld [vmem:[#allocation5 + $0x4c8] sm:$0xff]  ;;  %v528_v25 = vld [vmem:[#allocation5 + $0x4d8] sm:$0xff] }
  0x54   :  { %2593 = vmatprep.subr.bf16.mxu0 %v3153_v0  ;;  %v530_v28 = vld [vmem:[#allocation5 + $0x4e8] sm:$0xff]  ;;  %v532_v31 = vld [vmem:[#allocation5 + $0x4f8] sm:$0xff] }
  0x55   :  { %2616 = vmatpush3.bf16.msra.mxu1 %v2615_v46  ;;  %v432_v46 = vld [vmem:[#allocation5 + $0x230] sm:$0xff]  ;;  %v610_v34 = vld [vmem:[#allocation5 + $0x508] sm:$0xff]  ;;  %v612_v37 = vld [vmem:[#allocation5 + $0x518] sm:$0xff] }
  0x56   :  { %2617 = vmatprep.subr.bf16.mxu1 %v3153_v0  ;;  %v2678_v48 = vpack.c.bf16 %v433_v47, %v432_v46  ;;  %v614_v40 = vld [vmem:[#allocation5 + $0x528] sm:$0xff] }
  0x57   :  { %2595 = vmatpush3.bf16.msra.mxu0 %v2594_v45  ;;  %v2675_v45 = vpack.c.bf16 %v431_v44, %v430_v43  ;;  %v616_v43 = vld [vmem:[#allocation5 + $0x538] sm:$0xff]  ;;  %v618_v46 = vld [vmem:[#allocation5 + $0x548] sm:$0xff] }
  0x58   :  { %2620 = vmatprep.subr.bf16.mxu0 %v3153_v0 }
  0x59   :  { %2619 = vmatpush3.bf16.msra.mxu1 %v2618_v50  ;;  %v435_v50 = vld [vmem:[#allocation5 + $0x248] sm:$0xff] }
  0x5a   :  { %2080 = vmatmul.mubr.f32.vlgmr.msra.gmra.mrb[0].mxu0 %v3244_v49  ;;  %2644 = vmatprep.subr.bf16.mxu1 %v3153_v0 }
  0x5b   :  { %2149 = vmatprep.mubr.msk.f32.mxu0 %vm3154_vm0, %v3155_v1  ;;  %2622 = vmatpush3.bf16.msra.mxu0 %v2621_v16 }
  0x5c   :  { %2115 = vmatmul.mubr.f32.vlgmr.msra.gmra.mrb[0].mxu1 %v3244_v49  ;;  %2623 = vmatprep.subr.bf16.mxu0 %v3153_v0 }
  0x5d   :  { %2646 = vmatpush3.bf16.msra.mxu1 %v2645_v53  ;;  %2184 = vmatprep.mubr.msk.f32.mxu1 %vm3154_vm0, %v3155_v1  ;;  %v437_v53 = vld [vmem:[#allocation5 + $0x258] sm:$0xff] }
  0x5e   :  { %2647 = vmatprep.subr.bf16.mxu1 %v3153_v0  ;;  %v2684_v54 = vpack.c.bf16 %v437_v53, %v436_v52  ;;  %v622_v52 = vld [vmem:[#allocation5 + $0x568] sm:$0xff] }
  0x5f   :  { %2625 = vmatpush3.bf16.msra.mxu0 %v2624_v18  ;;  %v523_v18 = vld [vmem:[#allocation5 + $0x4b0] sm:$0xff] }
  0x60   :  { %2626 = vmatprep.subr.bf16.mxu0 %v3153_v0  ;;  %v2702_v20 = vpack.c.bf16 %v524_v19, %v523_v18  ;;  %v706_v18 = vld [vmem:[#allocation5 + $0x3c8] sm:$0xff] }
  0x61   :  { %2649 = vmatpush3.bf16.msra.mxu1 %v2648_v56  ;;  %v439_v56 = vld [vmem:[#allocation5 + $0x268] sm:$0xff] }
  0x62   :  { %2650 = vmatprep.subr.bf16.mxu1 %v3153_v0  ;;  %v2687_v57 = vpack.c.bf16 %v439_v56, %v438_v55  ;;  %v624_v55 = vld [vmem:[#allocation5 + $0x578] sm:$0xff] }
  0x63   :  { %2628 = vmatpush3.bf16.msra.mxu0 %v2627_v21  ;;  %v525_v21 = vld [vmem:[#allocation5 + $0x4c0] sm:$0xff] }
  0x64   :  { %2629 = vmatprep.subr.bf16.mxu0 %v3153_v0  ;;  %v2705_v23 = vpack.c.bf16 %v526_v22, %v525_v21  ;;  %v708_v21 = vld [vmem:[#allocation5 + $0x3d8] sm:$0xff] }
  0x65   :  { %2652 = vmatpush3.bf16.msra.mxu1 %v2651_v59  ;;  %v441_v59 = vld [vmem:[#allocation5 + $0x278] sm:$0xff] }
  0x66   :  { %2653 = vmatprep.subr.bf16.mxu1 %v3153_v0  ;;  %v2690_v60 = vpack.c.bf16 %v441_v59, %v440_v58  ;;  %v805_v58 = vld [vmem:[#allocation5 + $0x708] sm:$0xff] }
  0x67   :  { %2631 = vmatpush3.bf16.msra.mxu0 %v2630_v24  ;;  %v527_v24 = vld [vmem:[#allocation5 + $0x4d0] sm:$0xff] }
  0x68   :  { %2632 = vmatprep.subr.bf16.mxu0 %v3153_v0  ;;  %v2708_v26 = vpack.c.bf16 %v528_v25, %v527_v24  ;;  %v710_v24 = vld [vmem:[#allocation5 + $0x3e8] sm:$0xff] }
  0x69   :  { %2655 = vmatpush3.bf16.msra.mxu1 %v2654_v62  ;;  %v517_v62 = vld [vmem:[#allocation5 + $0x480] sm:$0xff] }
  0x6a   :  { %2656 = vmatprep.subr.bf16.mxu1 %v3153_v0  ;;  %v2693_v5 = vpack.c.bf16 %v518_v63, %v517_v62  ;;  %v697_v62 = vld [vmem:[#allocation5 + $0x380] sm:$0xff]  ;;  %v698_v63 = vld [vmem:[#allocation5 + $0x388] sm:$0xff] }
  0x6b   :  { %2634 = vmatpush3.bf16.msra.mxu0 %v2633_v27  ;;  %v529_v27 = vld [vmem:[#allocation5 + $0x4e0] sm:$0xff] }
  0x6c   :  { %2635 = vmatprep.subr.bf16.mxu0 %v3153_v0  ;;  %v2711_v29 = vpack.c.bf16 %v530_v28, %v529_v27  ;;  %v711_v27 = vld [vmem:[#allocation5 + $0x3f0] sm:$0xff]  ;;  %v712_v28 = vld [vmem:[#allocation5 + $0x3f8] sm:$0xff] }
  0x6d   :  { %2658 = vmatpush3.bf16.msra.mxu1 %v2657_v3 }
  0x6e   :  { %2659 = vmatprep.subr.bf16.mxu1 %v3153_v0 }
  0x6f   :  { %2637 = vmatpush3.bf16.msra.mxu0 %v2636_v30  ;;  %v531_v30 = vld [vmem:[#allocation5 + $0x4f0] sm:$0xff] }
  0x70   :  { %2638 = vmatprep.subr.bf16.mxu0 %v3153_v0  ;;  %v2714_v32 = vpack.c.bf16 %v532_v31, %v531_v30  ;;  %v788_v30 = vld [vmem:[#allocation5 + $0x680] sm:$0xff]  ;;  %v789_v31 = vld [vmem:[#allocation5 + $0x688] sm:$0xff] }
  0x71   :  { %2661 = vmatpush3.bf16.msra.mxu1 %v2660_v6 }
  0x72   :  { %2662 = vmatprep.subr.bf16.mxu1 %v3153_v0 }
  0x73   :  { %2640 = vmatpush3.bf16.msra.mxu0 %v2639_v33  ;;  %v609_v33 = vld [vmem:[#allocation5 + $0x500] sm:$0xff] }
  0x74   :  { %2641 = vmatprep.subr.bf16.mxu0 %v3153_v0  ;;  %v2717_v35 = vpack.c.bf16 %v610_v34, %v609_v33  ;;  %v806_v34 = vld [vmem:[#allocation5 + $0x710] sm:$0xff] }
  0x75   :  { %2664 = vmatpush3.bf16.msra.mxu1 %v2663_v9  ;;  %v1710_v9 = vld [vmem:[#allocation7 + $0x3] ss:$0 sm:$0xff] }
  0x76   :  { %2665 = vmatprep.subr.bf16.mxu1 %v3153_v0 }
  0x77   :  { %2643 = vmatpush3.bf16.msra.mxu0 %v2642_v36  ;;  %v611_v36 = vld [vmem:[#allocation5 + $0x510] sm:$0xff] }
  0x78   :  { %2668 = vmatprep.subr.bf16.mxu0 %v3153_v0  ;;  %v2720_v38 = vpack.c.bf16 %v612_v37, %v611_v36  ;;  %v2762_v36 = vpack.c.bf16 %v712_v28, %v711_v27  ;;  %v991_v28 = vld [vmem:[#allocation5 + $0x120] sm:$0xff] }
  0x79   :  { %2667 = vmatpush3.bf16.msra.mxu1 %v2666_v12  ;;  %v521_v12 = vld [vmem:[#allocation5 + $0x4a0] sm:$0xff] }
  0x7a   :  { %2692 = vmatprep.subr.bf16.mxu1 %v3153_v0  ;;  %2150 = vmatmul.mubr.f32.vlgmr.msra.gmra.mrb[2].mxu0 %v3244_v49  ;;  %v434_v49 = vld [vmem:[#allocation5 + $0x240] sm:$0xff]  ;;  %v2699_v17 = vpack.c.bf16 %v522_v13, %v521_v12  ;;  %v703_v12 = vld [vmem:[#allocation5 + $0x3b0] sm:$0xff]  ;;  %v704_v13 = vld [vmem:[#allocation5 + $0x3b8] sm:$0xff] }
  0x7b   :  { %2670 = vmatpush3.bf16.msra.mxu0 %v2669_v39  ;;  %2219 = vmatprep.mubr.msk.f32.mxu0 %vm3154_vm0, %v3155_v1  ;;  %v2681_v51 = vpack.c.bf16 %v435_v50, %v434_v49  ;;  %v613_v39 = vld [vmem:[#allocation5 + $0x520] sm:$0xff]  ;;  %v620_v49 = vld [vmem:[#allocation5 + $0x558] sm:$0xff] }
  0x7c   :  { %2671 = vmatprep.subr.bf16.mxu0 %v3153_v0  ;;  %v2723_v41 = vpack.c.bf16 %v614_v40, %v613_v39  ;;  %v2766_v39 = vpack.c.bf16 %v789_v31, %v788_v30  ;;  %v993_v31 = vld [vmem:[#allocation5 + $0x130] sm:$0xff] }
  0x7f   :  { %2673 = vmatpush3.bf16.msra.mxu0 %v2672_v42  ;;  %v615_v42 = vld [vmem:[#allocation5 + $0x530] sm:$0xff] }
  0x80   :  { %2674 = vmatprep.subr.bf16.mxu0 %v3153_v0  ;;  %v2726_v44 = vpack.c.bf16 %v616_v43, %v615_v42  ;;  %v790_v42 = vld [vmem:[#allocation5 + $0x690] sm:$0xff]  ;;  %v791_v43 = vld [vmem:[#allocation5 + $0x698] sm:$0xff] }
  0x83   :  { %2676 = vmatpush3.bf16.msra.mxu0 %v2675_v45  ;;  %v617_v45 = vld [vmem:[#allocation5 + $0x540] sm:$0xff] }
  0x84   :  { %2677 = vmatprep.subr.bf16.mxu0 %v3153_v0  ;;  %v2729_v47 = vpack.c.bf16 %v618_v46, %v617_v45  ;;  %v808_v45 = vld [vmem:[#allocation5 + $0x720] sm:$0xff]  ;;  %v809_v46 = vld [vmem:[#allocation5 + $0x728] sm:$0xff] }
  0x87   :  { %2679 = vmatpush3.bf16.msra.mxu0 %v2678_v48  ;;  %v619_v48 = vld [vmem:[#allocation5 + $0x550] sm:$0xff] }
  0x88   :  { %2680 = vmatprep.subr.bf16.mxu0 %v3153_v0  ;;  %v2732_v50 = vpack.c.bf16 %v620_v49, %v619_v48  ;;  %v2772_v48 = vpack.c.bf16 %v809_v46, %v808_v45  ;;  %v792_v49 = vld [vmem:[#allocation5 + $0x6a0] sm:$0xff] }
  0x8b   :  { %2682 = vmatpush3.bf16.msra.mxu0 %v2681_v51  ;;  %v621_v51 = vld [vmem:[#allocation5 + $0x560] sm:$0xff] }
  0x8c   :  { %2683 = vmatprep.subr.bf16.mxu0 %v3153_v0  ;;  %v2735_v53 = vpack.c.bf16 %v622_v52, %v621_v51  ;;  %v810_v51 = vld [vmem:[#allocation5 + $0x730] sm:$0xff]  ;;  %v811_v52 = vld [vmem:[#allocation5 + $0x738] sm:$0xff] }
  0x8f   :  { %2685 = vmatpush3.bf16.msra.mxu0 %v2684_v54  ;;  %v623_v54 = vld [vmem:[#allocation5 + $0x570] sm:$0xff] }
  0x90   :  { %2686 = vmatprep.subr.bf16.mxu0 %v3153_v0  ;;  %v2738_v56 = vpack.c.bf16 %v624_v55, %v623_v54  ;;  %v2776_v54 = vpack.c.bf16 %v811_v52, %v810_v51  ;;  %v794_v55 = vld [vmem:[#allocation5 + $0x6b0] sm:$0xff]  ;;  %v1187_v52 = vld [vmem:[#allocation5 + $0x598] sm:$0xff] }
  0x91   :  { %v1186_v51 = vld [vmem:[#allocation5 + $0x590] sm:$0xff] }
  0x93   :  { %2688 = vmatpush3.bf16.msra.mxu0 %v2687_v57  ;;  %v804_v57 = vld [vmem:[#allocation5 + $0x700] sm:$0xff] }
  0x94   :  { %2689 = vmatprep.subr.bf16.mxu0 %v3153_v0  ;;  %v2764_v59 = vpack.c.bf16 %v805_v58, %v804_v57  ;;  %v812_v57 = vld [vmem:[#allocation5 + $0x740] sm:$0xff] }
  0x97   :  { %2691 = vmatpush3.bf16.msra.mxu0 %v2690_v60 }
  0x98   :  { %2716 = vmatprep.subr.bf16.mxu0 %v3153_v0 }
 0x12d   :  { %v145_v2 = vpop.f32.mrb[0].mxu0 }
 0x12e   :  { %v146_v3 = vadd.f32 %v1709_v61, %v145_v2  ;;  %v2081_v4 = vpop.f32.mrb[1].mxu0  ;;  %v699_v2 = vld [vmem:[#allocation5 + $0x390] sm:$0xff] }
 0x12f   :  { %v237_v11 = vpop.f32.mrb[0].mxu1  ;;  %v2741_v4 = vpack.c.bf16 %v698_v63, %v697_v62  ;;  %v814_v62 = vld [vmem:[#allocation5 + $0x750] sm:$0xff]  ;;  %v815_v63 = vld [vmem:[#allocation5 + $0x758] sm:$0xff] }
 0x130   :  { %v3282_v6 = vmax.f32 %v146_v3, 0.0  ;;  %v3288_v14 = vadd.f32 %v1710_v9, %v237_v11  ;;  %v2116_v15 = vpop.f32.mrb[1].mxu1  ;;  %v701_v9 = vld [vmem:[#allocation5 + $0x3a0] sm:$0xff] }
 0x131   :  { %v2750_v15 = vpack.c.bf16 %v704_v13, %v703_v12  ;;  %v801_v12 = vld [vmem:[#allocation5 + $0x6e8] sm:$0xff]  ;;  %v818_v13 = vld [vmem:[#allocation5 + $0x770] sm:$0xff] }
 0x132   :  { %2185 = vmatmul.mubr.f32.vlgmr.msra.gmra.mrb[2].mxu1 %v3282_v6  ;;  %v241_v16 = vmax.f32 %v3288_v14, 0.0  ;;  %v813_v14 = vld [vmem:[#allocation5 + $0x748] sm:$0xff] }
 0x133   :  { %2694 = vmatpush3.bf16.msra.mxu1 %v2693_v5  ;;  %2254 = vmatprep.mubr.msk.f32.mxu1 %vm3154_vm0, %v3155_v1  ;;  %v700_v5 = vld [vmem:[#allocation5 + $0x398] sm:$0xff]  ;;  %v2780_v58 = vpack.c.bf16 %v813_v14, %v812_v57 }
 0x134   :  { %2695 = vmatprep.subr.bf16.mxu1 %v3153_v0  ;;  %2220 = vmatmul.mubr.f32.vlgmr.msra.gmra.mrb[4].mxu0 %v241_v16  ;;  %v2744_v8 = vpack.c.bf16 %v700_v5, %v699_v2  ;;  %v799_v5 = vld [vmem:[#allocation5 + $0x6d8] sm:$0xff] }
 0x135   :  { %2289 = vmatprep.mubr.msk.f32.mxu0 %vm3154_vm0, %v3155_v1  ;;  %2718 = vmatpush3.bf16.msra.mxu0 %v2717_v35  ;;  %v807_v35 = vld [vmem:[#allocation5 + $0x718] sm:$0xff] }
 0x136   :  { %2719 = vmatprep.subr.bf16.mxu0 %v3153_v0  ;;  %v1191_v57 = vld [vmem:[#allocation5 + $0x5b8] sm:$0xff] }
 0x137   :  { %2697 = vmatpush3.bf16.msra.mxu1 %v2696_v10  ;;  %v702_v10 = vld [vmem:[#allocation5 + $0x3a8] sm:$0xff] }
 0x138   :  { %2698 = vmatprep.subr.bf16.mxu1 %v3153_v0  ;;  %v2747_v11 = vpack.c.bf16 %v702_v10, %v701_v9 }
 0x139   :  { %2721 = vmatpush3.bf16.msra.mxu0 %v2720_v38 }
 0x13a   :  { %2722 = vmatprep.subr.bf16.mxu0 %v3153_v0 }
 0x13b   :  { %2700 = vmatpush3.bf16.msra.mxu1 %v2699_v17  ;;  %v705_v17 = vld [vmem:[#allocation5 + $0x3c0] sm:$0xff] }
 0x13c   :  { %2701 = vmatprep.subr.bf16.mxu1 %v3153_v0  ;;  %v2753_v19 = vpack.c.bf16 %v706_v18, %v705_v17 }
 0x13d   :  { %2724 = vmatpush3.bf16.msra.mxu0 %v2723_v41  ;;  %v2768_v41 = vpack.c.bf16 %v807_v35, %v806_v34  ;;  %v996_v34 = vld [vmem:[#allocation5 + $0x148] sm:$0xff] }
 0x13e   :  { %2725 = vmatprep.subr.bf16.mxu0 %v3153_v0 }
 0x13f   :  { %2703 = vmatpush3.bf16.msra.mxu1 %v2702_v20  ;;  %v707_v20 = vld [vmem:[#allocation5 + $0x3d0] sm:$0xff] }
 0x140   :  { %2704 = vmatprep.subr.bf16.mxu1 %v3153_v0  ;;  %v2756_v22 = vpack.c.bf16 %v708_v21, %v707_v20  ;;  %v803_v20 = vld [vmem:[#allocation5 + $0x6f8] sm:$0xff] }
 0x141   :  { %2727 = vmatpush3.bf16.msra.mxu0 %v2726_v44 }
 0x142   :  { %2728 = vmatprep.subr.bf16.mxu0 %v3153_v0 }
 0x143   :  { %2706 = vmatpush3.bf16.msra.mxu1 %v2705_v23  ;;  %v709_v23 = vld [vmem:[#allocation5 + $0x3e0] sm:$0xff] }
 0x144   :  { %2707 = vmatprep.subr.bf16.mxu1 %v3153_v0  ;;  %v2759_v25 = vpack.c.bf16 %v710_v24, %v709_v23  ;;  %v988_v23 = vld [vmem:[#allocation5 + $0x108] sm:$0xff] }
 0x145   :  { %2730 = vmatpush3.bf16.msra.mxu0 %v2729_v47  ;;  %v2770_v47 = vpack.c.bf16 %v791_v43, %v790_v42  ;;  %v1001_v42 = vld [vmem:[#allocation5 + $0x170] sm:$0xff]  ;;  %v1002_v43 = vld [vmem:[#allocation5 + $0x178] sm:$0xff] }
 0x146   :  { %2731 = vmatprep.subr.bf16.mxu0 %v3153_v0  ;;  %v2842_v45 = vpack.c.bf16 %v1002_v43, %v1001_v42 }
 0x147   :  { %2709 = vmatpush3.bf16.msra.mxu1 %v2708_v26  ;;  %v1711_v26 = vld [vmem:[#allocation7 + $0x6] ss:$0 sm:$0xff] }
 0x148   :  { %2710 = vmatprep.subr.bf16.mxu1 %v3153_v0 }
 0x149   :  { %2733 = vmatpush3.bf16.msra.mxu0 %v2732_v50  ;;  %v793_v50 = vld [vmem:[#allocation5 + $0x6a8] sm:$0xff] }
 0x14a   :  { %2734 = vmatprep.subr.bf16.mxu0 %v3153_v0 }
 0x14b   :  { %2712 = vmatpush3.bf16.msra.mxu1 %v2711_v29  ;;  %v1714_v29 = vld [vmem:[#allocation7 + $0x9] ss:$0 sm:$0xff] }
 0x14c   :  { %2713 = vmatprep.subr.bf16.mxu1 %v3153_v0 }
 0x14d   :  { %2736 = vmatpush3.bf16.msra.mxu0 %v2735_v53  ;;  %v329_v3 = vpop.f32.mrb[2].mxu0  ;;  %v2774_v53 = vpack.c.bf16 %v793_v50, %v792_v49 }
 0x14e   :  { %2737 = vmatprep.subr.bf16.mxu0 %v3153_v0  ;;  %v2151_v7 = vpop.f32.mrb[3].mxu0 }
 0x14f   :  { %2715 = vmatpush3.bf16.msra.mxu1 %v2714_v32  ;;  %v330_v32 = vadd.f32 %v1711_v26, %v329_v3  ;;  %v2784_v3 = vpack.c.bf16 %v815_v63, %v814_v62  ;;  %v816_v7 = vld [vmem:[#allocation5 + $0x760] sm:$0xff]  ;;  %v990_v26 = vld [vmem:[#allocation5 + $0x118] sm:$0xff] }
 0x150   :  { %2740 = vmatprep.subr.bf16.mxu1 %v3153_v0  ;;  %v1195_v62 = vld [vmem:[#allocation5 + $0x5d8] sm:$0xff] }
 0x151   :  { %2739 = vmatpush3.bf16.msra.mxu0 %v2738_v56  ;;  %v333_v44 = vmax.f32 %v330_v32, 0.0  ;;  %v795_v56 = vld [vmem:[#allocation5 + $0x6b8] sm:$0xff] }
 0x152   :  { %2255 = vmatmul.mubr.f32.vlgmr.msra.gmra.mrb[4].mxu1 %v3282_v6  ;;  %2765 = vmatprep.subr.bf16.mxu0 %v2764_v59  ;;  %v796_v59 = vld [vmem:[#allocation5 + $0x6c0] sm:$0xff]  ;;  %v994_v32 = vld [vmem:[#allocation5 + $0x138] sm:$0xff] }
 0x153   :  { %2324 = vmatprep.mubr.msk.f32.mxu1 %vm3154_vm0, %v3155_v1  ;;  %2742 = vmatpush3.bf16.msra.mxu1 %v2741_v4  ;;  %v798_v4 = vld [vmem:[#allocation5 + $0x6d0] sm:$0xff] }
 0x154   :  { %2743 = vmatprep.subr.bf16.mxu1 %v3153_v0  ;;  %v2786_v9 = vpack.c.bf16 %v799_v5, %v798_v4  ;;  %v1198_v5 = vld [vmem:[#allocation5 + $0x5f0] sm:$0xff] }
 0x157   :  { %2745 = vmatpush3.bf16.msra.mxu1 %v2744_v8  ;;  %v817_v8 = vld [vmem:[#allocation5 + $0x768] sm:$0xff] }
 0x158   :  { %2746 = vmatprep.subr.bf16.mxu1 %v3153_v0  ;;  %v2788_v10 = vpack.c.bf16 %v817_v8, %v816_v7  ;;  %v1199_v7 = vld [vmem:[#allocation5 + $0x5f8] sm:$0xff]  ;;  %v896_v8 = vld [vmem:[#allocation5 + $0x780] sm:$0xff] }
 0x15b   :  { %2748 = vmatpush3.bf16.msra.mxu1 %v2747_v11  ;;  %v800_v11 = vld [vmem:[#allocation5 + $0x6e0] sm:$0xff] }
 0x15c   :  { %2749 = vmatprep.subr.bf16.mxu1 %v3153_v0  ;;  %v2790_v17 = vpack.c.bf16 %v801_v12, %v800_v11  ;;  %v899_v12 = vld [vmem:[#allocation5 + $0x798] sm:$0xff] }
 0x15f   :  { %2751 = vmatpush3.bf16.msra.mxu1 %v2750_v15  ;;  %v819_v15 = vld [vmem:[#allocation5 + $0x778] sm:$0xff] }
 0x160   :  { %2752 = vmatprep.subr.bf16.mxu1 %v3153_v0  ;;  %v2792_v18 = vpack.c.bf16 %v819_v15, %v818_v13  ;;  %v2890_v13 = vpack.c.bf16 %v1199_v7, %v1198_v5  ;;  %v1713_v5 = vld [vmem:[#allocation7 + $0x4] ss:$0 sm:$0xff] }
 0x163   :  { %2754 = vmatpush3.bf16.msra.mxu1 %v2753_v19  ;;  %v802_v19 = vld [vmem:[#allocation5 + $0x6f0] sm:$0xff] }
 0x164   :  { %2755 = vmatprep.subr.bf16.mxu1 %v3153_v0  ;;  %v2794_v21 = vpack.c.bf16 %v803_v20, %v802_v19  ;;  %v902_v20 = vld [vmem:[#allocation5 + $0x7b0] sm:$0xff] }
 0x167   :  { %2757 = vmatpush3.bf16.msra.mxu1 %v2756_v22  ;;  %v987_v22 = vld [vmem:[#allocation5 + $0x100] sm:$0xff] }
 0x168   :  { %2758 = vmatprep.subr.bf16.mxu1 %v3153_v0  ;;  %v2821_v24 = vpack.c.bf16 %v988_v23, %v987_v22  ;;  %v904_v23 = vld [vmem:[#allocation5 + $0x7c0] sm:$0xff] }
 0x16b   :  { %2760 = vmatpush3.bf16.msra.mxu1 %v2759_v25  ;;  %v989_v25 = vld [vmem:[#allocation5 + $0x110] sm:$0xff] }
 0x16c   :  { %2761 = vmatprep.subr.bf16.mxu1 %v3153_v0  ;;  %v2824_v27 = vpack.c.bf16 %v990_v26, %v989_v25  ;;  %v906_v26 = vld [vmem:[#allocation5 + $0x7d0] sm:$0xff] }
 0x16f   :  { %2763 = vmatpush3.bf16.msra.mxu1 %v2762_v36  ;;  %v997_v36 = vld [vmem:[#allocation5 + $0x150] sm:$0xff] }
 0x170   :  { %2796 = vmatprep.subr.bf16.mxu1 %v3153_v0 }
 0x172   :  { %2325 = vmatmul.mubr.f32.vlgmr.msra.gmra.mrb[6].mxu1 %v333_v44  ;;  %v1712_v44 = vld [vmem:[#allocation7 + $0x1] ss:$0 sm:$0xff] }
 0x173   :  { %2359 = vmatprep.mubr.msk.f32.mxu1 %vm3154_vm0, %v3155_v1 }
 0x205   :  { %v3312_v60 = vpop.f32.mrb[2].mxu1 }
 0x206   :  { %v2186_v61 = vpop.f32.mrb[3].mxu1  ;;  %v422_v46 = vadd.f32 %v1712_v44, %v3312_v60  ;;  %v1188_v60 = vld [vmem:[#allocation5 + $0x5a0] sm:$0xff] }
 0x207   :  { %v797_v61 = vld [vmem:[#allocation5 + $0x6c8] sm:$0xff] }
 0x208   :  { %v2782_v2 = vpack.c.bf16 %v797_v61, %v796_v59  ;;  %v3338_v50 = vmax.f32 %v422_v46, 0.0  ;;  %v1194_v61 = vld [vmem:[#allocation5 + $0x5d0] sm:$0xff]  ;;  %v1096_v46 = vld [vmem:[#allocation5 + $0x298] sm:$0xff] }
 0x209   :  { %v2884_v63 = vpack.c.bf16 %v1195_v62, %v1194_v61  ;;  %v1106_v61 = vld [vmem:[#allocation5 + $0x2e8] sm:$0xff] }
 0x225   :  { %v604_v33 = vpop.f32.mrb[4].mxu1 }
 0x226   :  { %v605_v37 = vadd.f32 %v1714_v29, %v604_v33  ;;  %v2256_v38 = vpop.f32.mrb[5].mxu1  ;;  %v992_v29 = vld [vmem:[#allocation5 + $0x128] sm:$0xff]  ;;  %v2830_v33 = vpack.c.bf16 %v994_v32, %v993_v31  ;;  %v910_v32 = vld [vmem:[#allocation5 + $0x7f0] sm:$0xff] }
 0x227   :  { %v2827_v30 = vpack.c.bf16 %v992_v29, %v991_v28  ;;  %v908_v29 = vld [vmem:[#allocation5 + $0x7e0] sm:$0xff] }
 0x228   :  { %v608_v40 = vmax.f32 %v605_v37, 0.0  ;;  %v998_v37 = vld [vmem:[#allocation5 + $0x158] sm:$0xff] }
 0x229   :  { %v2836_v38 = vpack.c.bf16 %v998_v37, %v997_v36  ;;  %v1716_v37 = vld [vmem:[#allocation7 + $0xb] ss:$0 sm:$0xff] }
 0x22a   :  { %2290 = vmatmul.mubr.f32.vlgmr.msra.gmra.mrb[4].mxu0 %v608_v40  ;;  %v1000_v40 = vld [vmem:[#allocation5 + $0x168] sm:$0xff] }
 0x22b   :  { %2767 = vmatpush3.bf16.msra.mxu0 %v2766_v39  ;;  %889 = vmatprep.mubr.f32.mxu0 %v241_v16  ;;  %v2778_v16 = vpack.c.bf16 %v795_v56, %v794_v55  ;;  %v999_v39 = vld [vmem:[#allocation5 + $0x160] sm:$0xff]  ;;  %v1190_v56 = vld [vmem:[#allocation5 + $0x5b0] sm:$0xff] }
 0x22c   :  { %2769 = vmatprep.subr.bf16.mxu0 %v2768_v41  ;;  %v2839_v41 = vpack.c.bf16 %v1000_v40, %v999_v39  ;;  %v2878_v14 = vpack.c.bf16 %v1191_v57, %v1190_v56  ;;  %v1093_v40 = vld [vmem:[#allocation5 + $0x280] sm:$0xff]  ;;  %v1103_v57 = vld [vmem:[#allocation5 + $0x2d0] sm:$0xff] }
 0x22f   :  { %2771 = vmatpush3.bf16.msra.mxu0 %v2770_v47  ;;  %v1184_v47 = vld [vmem:[#allocation5 + $0x580] sm:$0xff] }
 0x230   :  { %2773 = vmatprep.subr.bf16.mxu0 %v2772_v48  ;;  %v1185_v48 = vld [vmem:[#allocation5 + $0x588] sm:$0xff] }
 0x231   :  { %v2869_v49 = vpack.c.bf16 %v1185_v48, %v1184_v47  ;;  %v1097_v48 = vld [vmem:[#allocation5 + $0x2a0] sm:$0xff] }
 0x233   :  { %2775 = vmatpush3.bf16.msra.mxu0 %v2774_v53  ;;  %v2872_v53 = vpack.c.bf16 %v1187_v52, %v1186_v51  ;;  %v1099_v52 = vld [vmem:[#allocation5 + $0x2b0] sm:$0xff] }
 0x234   :  { %2777 = vmatprep.subr.bf16.mxu0 %v2776_v54  ;;  %v1189_v54 = vld [vmem:[#allocation5 + $0x5a8] sm:$0xff] }
 0x235   :  { %v2875_v55 = vpack.c.bf16 %v1189_v54, %v1188_v60  ;;  %v1101_v54 = vld [vmem:[#allocation5 + $0x2c0] sm:$0xff] }
 0x237   :  { %2779 = vmatpush3.bf16.msra.mxu0 %v2778_v16  ;;  %v1192_v16 = vld [vmem:[#allocation5 + $0x5c0] sm:$0xff] }
 0x238   :  { %2781 = vmatprep.subr.bf16.mxu0 %v2780_v58  ;;  %v1193_v58 = vld [vmem:[#allocation5 + $0x5c8] sm:$0xff] }
 0x239   :  { %v2881_v59 = vpack.c.bf16 %v1193_v58, %v1192_v16  ;;  %v984_v16 = vlaneseq }
 0x23b   :  { %2783 = vmatpush3.bf16.msra.mxu0 %v2782_v2  ;;  %v1196_v2 = vld [vmem:[#allocation5 + $0x5e0] sm:$0xff]  ;;  %v3370_v62 = vand.u32 127, %v984_v16  ;;  %v1470_v16 = vld [vmem:[#allocation5 + $0x808] sm:$0xff] }
 0x23c   :  { %2785 = vmatprep.subr.bf16.mxu0 %v2784_v3  ;;  %v1197_v3 = vld [vmem:[#allocation5 + $0x5e8] sm:$0xff] }
 0x23d   :  { %v2887_v4 = vpack.c.bf16 %v1197_v3, %v1196_v2  ;;  %v1717_v2 = vld [vmem:[#allocation7 + $0x2] ss:$0 sm:$0xff]  ;;  %v1107_v3 = vld [vmem:[#allocation5 + $0x2f0] sm:$0xff]  ;;  %vm986_vm1 = vcmp.lt.s32.totalorder %v3370_v62, 2 }
 0x23f   :  { %2787 = vmatpush3.bf16.msra.mxu0 %v2786_v9  ;;  %v897_v9 = vld [vmem:[#allocation5 + $0x788] sm:$0xff] }
 0x240   :  { %2789 = vmatprep.subr.bf16.mxu0 %v2788_v10  ;;  %v898_v10 = vld [vmem:[#allocation5 + $0x790] sm:$0xff]  ;;  %v2797_v11 = vpack.c.bf16 %v897_v9, %v896_v8 }
 0x241   :  { %v2800_v15 = vpack.c.bf16 %v899_v12, %v898_v10  ;;  %v1276_v12 = vld [vmem:[#allocation5 + $0x600] sm:$0xff] }
 0x242   :  { %2798 = vmatpush3.bf16.msra.mxu1 %v2797_v11 }
 0x243   :  { %2791 = vmatpush3.bf16.msra.mxu0 %v2790_v17  ;;  %2799 = vmatprep.subr.bf16.mxu1 %v3153_v0  ;;  %v900_v17 = vld [vmem:[#allocation5 + $0x7a0] sm:$0xff] }
 0x244   :  { %2793 = vmatprep.subr.bf16.mxu0 %v2792_v18  ;;  %v901_v18 = vld [vmem:[#allocation5 + $0x7a8] sm:$0xff] }
 0x245   :  { %v2803_v19 = vpack.c.bf16 %v901_v18, %v900_v17 }
 0x246   :  { %2801 = vmatpush3.bf16.msra.mxu1 %v2800_v15 }
 0x247   :  { %2795 = vmatpush3.bf16.msra.mxu0 %v2794_v21  ;;  %2802 = vmatprep.subr.bf16.mxu1 %v3153_v0  ;;  %v903_v21 = vld [vmem:[#allocation5 + $0x7b8] sm:$0xff] }
 0x248   :  { %2820 = vmatprep.subr.bf16.mxu0 %v3153_v0  ;;  %v2806_v22 = vpack.c.bf16 %v903_v21, %v902_v20  ;;  %v1279_v20 = vld [vmem:[#allocation5 + $0x618] sm:$0xff] }
 0x24a   :  { %890 = vmatmul.mubr.f32.vlgmr.msra.gmra.mrb[6].mxu0 %v3282_v6  ;;  %v995_v6 = vld [vmem:[#allocation5 + $0x140] sm:$0xff]  ;;  %2804 = vmatpush3.bf16.msra.mxu1 %v2803_v19  ;;  %v1278_v19 = vld [vmem:[#allocation5 + $0x610] sm:$0xff] }
 0x24b   :  { %2822 = vmatpush3.bf16.msra.mxu0 %v2821_v24  ;;  %2394 = vmatprep.mubr.msk.f32.mxu0 %vm3154_vm0, %v3155_v1  ;;  %v2833_v35 = vpack.c.bf16 %v996_v34, %v995_v6  ;;  %v905_v24 = vld [vmem:[#allocation5 + $0x7c8] sm:$0xff]  ;;  %v2896_v21 = vpack.c.bf16 %v1279_v20, %v1278_v19  ;;  %v1473_v20 = vld [vmem:[#allocation5 + $0x820] sm:$0xff] }
 0x24c   :  { %2823 = vmatprep.subr.bf16.mxu0 %v3153_v0  ;;  %2805 = vmatprep.subr.bf16.mxu1 %v3153_v0  ;;  %v2809_v25 = vpack.c.bf16 %v905_v24, %v904_v23  ;;  %v1281_v23 = vld [vmem:[#allocation5 + $0x628] sm:$0xff] }
 0x24e   :  { %2807 = vmatpush3.bf16.msra.mxu1 %v2806_v22  ;;  %v1280_v22 = vld [vmem:[#allocation5 + $0x620] sm:$0xff] }
 0x24f   :  { %2825 = vmatpush3.bf16.msra.mxu0 %v2824_v27  ;;  %2808 = vmatprep.subr.bf16.mxu1 %v3153_v0  ;;  %v907_v27 = vld [vmem:[#allocation5 + $0x7d8] sm:$0xff]  ;;  %v2899_v24 = vpack.c.bf16 %v1281_v23, %v1280_v22  ;;  %v1491_v22 = vld [vmem:[#allocation5 + $0x8b0] sm:$0xff] }
 0x250   :  { %2826 = vmatprep.subr.bf16.mxu0 %v3153_v0  ;;  %v2812_v28 = vpack.c.bf16 %v907_v27, %v906_v26  ;;  %v1283_v26 = vld [vmem:[#allocation5 + $0x638] sm:$0xff] }
 0x252   :  { %2810 = vmatpush3.bf16.msra.mxu1 %v2809_v25  ;;  %v1282_v25 = vld [vmem:[#allocation5 + $0x630] sm:$0xff] }
 0x253   :  { %2828 = vmatpush3.bf16.msra.mxu0 %v2827_v30  ;;  %2811 = vmatprep.subr.bf16.mxu1 %v3153_v0  ;;  %v909_v30 = vld [vmem:[#allocation5 + $0x7e8] sm:$0xff]  ;;  %v2902_v27 = vpack.c.bf16 %v1283_v26, %v1282_v25  ;;  %v1390_v25 = vld [vmem:[#allocation5 + $0x460] sm:$0xff] }
 0x254   :  { %2829 = vmatprep.subr.bf16.mxu0 %v3153_v0  ;;  %v2815_v31 = vpack.c.bf16 %v909_v30, %v908_v29  ;;  %v1285_v29 = vld [vmem:[#allocation5 + $0x648] sm:$0xff] }
 0x255   :  { %v1391_v26 = vld [vmem:[#allocation5 + $0x468] sm:$0xff] }
 0x256   :  { %2813 = vmatpush3.bf16.msra.mxu1 %v2812_v28  ;;  %v1284_v28 = vld [vmem:[#allocation5 + $0x640] sm:$0xff] }
 0x257   :  { %2831 = vmatpush3.bf16.msra.mxu0 %v2830_v33  ;;  %2814 = vmatprep.subr.bf16.mxu1 %v3153_v0  ;;  %v911_v33 = vld [vmem:[#allocation5 + $0x7f8] sm:$0xff]  ;;  %v2905_v30 = vpack.c.bf16 %v1285_v29, %v1284_v28  ;;  %v1475_v29 = vld [vmem:[#allocation5 + $0x830] sm:$0xff] }
 0x258   :  { %2832 = vmatprep.subr.bf16.mxu0 %v3153_v0  ;;  %v2818_v6 = vpack.c.bf16 %v911_v33, %v910_v32  ;;  %v1287_v32 = vld [vmem:[#allocation5 + $0x658] sm:$0xff]  ;;  %v1378_v33 = vld [vmem:[#allocation5 + $0x400] sm:$0xff] }
 0x25a   :  { %2816 = vmatpush3.bf16.msra.mxu1 %v2815_v31  ;;  %v1286_v31 = vld [vmem:[#allocation5 + $0x650] sm:$0xff] }
 0x25b   :  { %2834 = vmatpush3.bf16.msra.mxu0 %v2833_v35  ;;  %2817 = vmatprep.subr.bf16.mxu1 %v3153_v0 }
 0x25c   :  { %2835 = vmatprep.subr.bf16.mxu0 %v3153_v0 }
 0x25e   :  { %2819 = vmatpush3.bf16.msra.mxu1 %v2818_v6  ;;  %v1379_v6 = vld [vmem:[#allocation5 + $0x408] sm:$0xff] }
 0x25f   :  { %2837 = vmatpush3.bf16.msra.mxu0 %v2836_v38  ;;  %2844 = vmatprep.subr.bf16.mxu1 %v3153_v0 }
 0x260   :  { %2838 = vmatprep.subr.bf16.mxu0 %v3153_v0 }
 0x263   :  { %2840 = vmatpush3.bf16.msra.mxu0 %v2839_v41  ;;  %v1094_v41 = vld [vmem:[#allocation5 + $0x288] sm:$0xff] }
 0x264   :  { %2841 = vmatprep.subr.bf16.mxu0 %v3153_v0  ;;  %v2845_v43 = vpack.c.bf16 %v1094_v41, %v1093_v40  ;;  %v1289_v40 = vld [vmem:[#allocation5 + $0x668] sm:$0xff]  ;;  %v1382_v41 = vld [vmem:[#allocation5 + $0x420] sm:$0xff] }
 0x267   :  { %2843 = vmatpush3.bf16.msra.mxu0 %v2842_v45  ;;  %v1095_v45 = vld [vmem:[#allocation5 + $0x290] sm:$0xff] }
 0x268   :  { %2868 = vmatprep.subr.bf16.mxu0 %v3153_v0  ;;  %v2848_v47 = vpack.c.bf16 %v1096_v46, %v1095_v45  ;;  %v1291_v46 = vld [vmem:[#allocation5 + $0x678] sm:$0xff] }
 0x26a   :  { %2395 = vmatmul.mubr.f32.vlgmr.msra.gmra.mrb[8].mxu0 %v3338_v50 }
 0x26b   :  { %2870 = vmatpush3.bf16.msra.mxu0 %v2869_v49  ;;  %2464 = vmatprep.mubr.msk.f32.mxu0 %vm3154_vm0, %v3155_v1  ;;  %v1098_v49 = vld [vmem:[#allocation5 + $0x2a8] sm:$0xff] }
 0x26c   :  { %2871 = vmatprep.subr.bf16.mxu0 %v3153_v0  ;;  %v2851_v51 = vpack.c.bf16 %v1098_v49, %v1097_v48  ;;  %v1385_v48 = vld [vmem:[#allocation5 + $0x438] sm:$0xff]  ;;  %v1719_v49 = vld [vmem:[#allocation7 + $0xa] ss:$0 sm:$0xff] }
 0x26f   :  { %2873 = vmatpush3.bf16.msra.mxu0 %v2872_v53  ;;  %v1100_v53 = vld [vmem:[#allocation5 + $0x2b8] sm:$0xff] }
 0x270   :  { %2874 = vmatprep.subr.bf16.mxu0 %v3153_v0  ;;  %v2854_v60 = vpack.c.bf16 %v1100_v53, %v1099_v52  ;;  %v1486_v52 = vld [vmem:[#allocation5 + $0x888] sm:$0xff] }
 0x273   :  { %2876 = vmatpush3.bf16.msra.mxu0 %v2875_v55  ;;  %v1102_v55 = vld [vmem:[#allocation5 + $0x2c8] sm:$0xff] }
 0x274   :  { %2877 = vmatprep.subr.bf16.mxu0 %v3153_v0  ;;  %v2857_v56 = vpack.c.bf16 %v1102_v55, %v1101_v54 }
 0x277   :  { %2879 = vmatpush3.bf16.msra.mxu0 %v2878_v14  ;;  %v1104_v14 = vld [vmem:[#allocation5 + $0x2d8] sm:$0xff] }
 0x278   :  { %2880 = vmatprep.subr.bf16.mxu0 %v3153_v0  ;;  %v2860_v58 = vpack.c.bf16 %v1104_v14, %v1103_v57  ;;  %v1469_v14 = vld [vmem:[#allocation5 + $0x800] sm:$0xff] }
 0x27b   :  { %2882 = vmatpush3.bf16.msra.mxu0 %v2881_v59  ;;  %v1105_v59 = vld [vmem:[#allocation5 + $0x2e0] sm:$0xff] }
 0x27c   :  { %2883 = vmatprep.subr.bf16.mxu0 %v3153_v0 }
 0x27f   :  { %2885 = vmatpush3.bf16.msra.mxu0 %v2884_v63  ;;  %v2863_v63 = vpack.c.bf16 %v1106_v61, %v1105_v59  ;;  %v1488_v59 = vld [vmem:[#allocation5 + $0x898] sm:$0xff]  ;;  %v1386_v61 = vld [vmem:[#allocation5 + $0x440] sm:$0xff] }
 0x280   :  { %2886 = vmatprep.subr.bf16.mxu0 %v3153_v0 }
 0x283   :  { %2888 = vmatpush3.bf16.msra.mxu0 %v2887_v4  ;;  %v1108_v4 = vld [vmem:[#allocation5 + $0x2f8] sm:$0xff] }
 0x284   :  { %2889 = vmatprep.subr.bf16.mxu0 %v3153_v0  ;;  %v2866_v10 = vpack.c.bf16 %v1108_v4, %v1107_v3 }
 0x287   :  { %2891 = vmatpush3.bf16.msra.mxu0 %v2890_v13  ;;  %v1277_v13 = vld [vmem:[#allocation5 + $0x608] sm:$0xff] }
 0x288   :  { %2916 = vmatprep.subr.bf16.mxu0 %v3153_v0  ;;  %v2893_v17 = vpack.c.bf16 %v1277_v13, %v1276_v12  ;;  %v1388_v12 = vld [vmem:[#allocation5 + $0x450] sm:$0xff]  ;;  %v1389_v13 = vld [vmem:[#allocation5 + $0x458] sm:$0xff] }
 0x289   :  { %v2932_v23 = vpack.c.bf16 %v1389_v13, %v1388_v12  ;;  %v1585_v13 = vld [vmem:[#allocation5 + $0x940] sm:$0xff] }
 0x28a   :  { %2465 = vmatmul.mubr.f32.vlgmr.msra.gmra.mrb[10].mxu0 %v3338_v50 }
 0x28b   :  { %2534 = vmatprep.mubr.msk.f32.mxu0 %vm3154_vm0, %v3155_v1 }
 0x2fd   :  { %v691_v34 = vpop.f32.mrb[4].mxu0 }
 0x2fe   :  { %v2291_v35 = vpop.f32.mrb[5].mxu0  ;;  %v3374_v11 = vadd.f32 %v1713_v5, %v691_v34  ;;  %v1380_v34 = vld [vmem:[#allocation5 + $0x410] sm:$0xff] }
 0x2ff   :  { %v2917_v35 = vpack.c.bf16 %v1379_v6, %v1378_v33  ;;  %v1471_v5 = vld [vmem:[#allocation5 + $0x810] sm:$0xff]  ;;  %v1477_v6 = vld [vmem:[#allocation5 + $0x840] sm:$0xff] }
 0x300   :  { %v696_v18 = vmax.f32 %v3374_v11, 0.0  ;;  %v1476_v11 = vld [vmem:[#allocation5 + $0x838] sm:$0xff] }
 0x301   :  { %2918 = vmatpush3.bf16.msra.mxu0 %v2917_v35  ;;  %v1495_v35 = vld [vmem:[#allocation5 + $0x8d0] sm:$0xff] }
 0x302   :  { %2919 = vmatprep.subr.bf16.mxu0 %v3153_v0 }
 0x31d   :  { %v1890_v36 = vpop.f32.mrb[6].mxu0 }
 0x31e   :  { %v1891_v38 = vpop.f32.mrb[7].mxu0 }
 0x31f   :  { %v1892_v39 = vadd.f32 %v1891_v38, %v1890_v36  ;;  %v1381_v36 = vld [vmem:[#allocation5 + $0x418] sm:$0xff]  ;;  %v1288_v38 = vld [vmem:[#allocation5 + $0x660] sm:$0xff] }
 0x321   :  { %v892_v42 = vadd.f32 %v1892_v39, %v1716_v37  ;;  %v2908_v37 = vpack.c.bf16 %v1287_v32, %v1286_v31  ;;  %v2920_v39 = vpack.c.bf16 %v1381_v36, %v1380_v34  ;;  %v1494_v31 = vld [vmem:[#allocation5 + $0x8c8] sm:$0xff]  ;;  %v2954_v32 = vpack.c.bf16 %v1476_v11, %v1475_v29  ;;  %v1496_v36 = vld [vmem:[#allocation5 + $0x8d8] sm:$0xff] }
 0x322   :  { %v1478_v34 = vld [vmem:[#allocation5 + $0x848] sm:$0xff] }
 0x323   :  { %v895_v44 = vmax.f32 %v892_v42, 0.0  ;;  %v1383_v42 = vld [vmem:[#allocation5 + $0x428] sm:$0xff]  ;;  %2921 = vmatpush3.bf16.msra.mxu0 %v2920_v39  ;;  %v1479_v39 = vld [vmem:[#allocation5 + $0x850] sm:$0xff] }
 0x324   :  { %v2923_v45 = vpack.c.bf16 %v1383_v42, %v1382_v41  ;;  %2922 = vmatprep.subr.bf16.mxu0 %v3153_v0  ;;  %v1497_v41 = vld [vmem:[#allocation5 + $0x8e0] sm:$0xff]  ;;  %v1498_v42 = vld [vmem:[#allocation5 + $0x8e8] sm:$0xff] }
 0x325   :  { %2360 = vmatmul.mubr.f32.vlgmr.msra.gmra.mrb[6].mxu1 %v895_v44  ;;  %v1290_v44 = vld [vmem:[#allocation5 + $0x670] sm:$0xff] }
 0x326   :  { %2846 = vmatpush3.bf16.msra.mxu1 %v2845_v43  ;;  %2429 = vmatprep.mubr.msk.f32.mxu1 %vm3154_vm0, %v3155_v1  ;;  %v2911_v43 = vpack.c.bf16 %v1289_v40, %v1288_v38  ;;  %v2914_v54 = vpack.c.bf16 %v1291_v46, %v1290_v44  ;;  %v2960_v38 = vpack.c.bf16 %v1496_v36, %v1495_v35  ;;  %v1480_v40 = vld [vmem:[#allocation5 + $0x858] sm:$0xff]  ;;  %v1482_v46 = vld [vmem:[#allocation5 + $0x868] sm:$0xff] }
 0x327   :  { %2847 = vmatprep.subr.bf16.mxu1 %v3153_v0  ;;  %2924 = vmatpush3.bf16.msra.mxu0 %v2923_v45  ;;  %v2964_v44 = vpack.c.bf16 %v1498_v42, %v1497_v41  ;;  %v1481_v45 = vld [vmem:[#allocation5 + $0x860] sm:$0xff]  ;;  %v1720_v42 = vld [vmem:[#allocation7 + $0x8] ss:$0 sm:$0xff] }
 0x328   :  { %2925 = vmatprep.subr.bf16.mxu0 %v3153_v0 }
 0x32a   :  { %2849 = vmatpush3.bf16.msra.mxu1 %v2848_v47  ;;  %v1384_v47 = vld [vmem:[#allocation5 + $0x430] sm:$0xff] }
 0x32b   :  { %2850 = vmatprep.subr.bf16.mxu1 %v3153_v0  ;;  %v2926_v55 = vpack.c.bf16 %v1385_v48, %v1384_v47  ;;  %v1499_v47 = vld [vmem:[#allocation5 + $0x8f0] sm:$0xff]  ;;  %v1500_v48 = vld [vmem:[#allocation5 + $0x8f8] sm:$0xff] }
 0x32d   :  { %2927 = vmatpush3.bf16.msra.mxu0 %v2926_v55  ;;  %v1484_v55 = vld [vmem:[#allocation5 + $0x878] sm:$0xff] }
 0x32e   :  { %2852 = vmatpush3.bf16.msra.mxu1 %v2851_v51  ;;  %v1485_v51 = vld [vmem:[#allocation5 + $0x880] sm:$0xff]  ;;  %2928 = vmatprep.subr.bf16.mxu0 %v3153_v0 }
 0x32f   :  { %2853 = vmatprep.subr.bf16.mxu1 %v3153_v0  ;;  %v2940_v57 = vpack.c.bf16 %v1486_v52, %v1485_v51  ;;  %v1393_v51 = vld [vmem:[#allocation5 + $0x478] sm:$0xff] }
 0x332   :  { %2855 = vmatpush3.bf16.msra.mxu1 %v2854_v60 }
 0x333   :  { %2856 = vmatprep.subr.bf16.mxu1 %v3153_v0 }
 0x336   :  { %2858 = vmatpush3.bf16.msra.mxu1 %v2857_v56 }
 0x337   :  { %2859 = vmatprep.subr.bf16.mxu1 %v3153_v0 }
 0x33a   :  { %2861 = vmatpush3.bf16.msra.mxu1 %v2860_v58  ;;  %v1487_v58 = vld [vmem:[#allocation5 + $0x890] sm:$0xff] }
 0x33b   :  { %2862 = vmatprep.subr.bf16.mxu1 %v3153_v0  ;;  %v2944_v4 = vpack.c.bf16 %v1488_v59, %v1487_v58 }
 0x33d   :  { %v1074_v7 = vpop.f32.mrb[8].mxu0 }
 0x33e   :  { %v1075_v8 = vadd.f32 %v1717_v2, %v1074_v7  ;;  %2864 = vmatpush3.bf16.msra.mxu1 %v2863_v63  ;;  %v2396_v9 = vpop.f32.mrb[9].mxu0  ;;  %v1387_v63 = vld [vmem:[#allocation5 + $0x448] sm:$0xff]  ;;  %v2942_v2 = vpack.c.bf16 %v1470_v16, %v1469_v14  ;;  %v1472_v7 = vld [vmem:[#allocation5 + $0x818] sm:$0xff]  ;;  %v1577_v14 = vld [vmem:[#allocation5 + $0x900] sm:$0xff] }
 0x33f   :  { %2865 = vmatprep.subr.bf16.mxu1 %v3153_v0  ;;  %v2929_v9 = vpack.c.bf16 %v1387_v63, %v1386_v61  ;;  %v1578_v16 = vld [vmem:[#allocation5 + $0x908] sm:$0xff] }
 0x340   :  { %1078 = vst [vmem:[#allocation8] sm:$0xff] %v1075_v8  ;;  %v3379_v15 = vsel %vm986_vm1, %v1075_v8, -1e+30  ;;  %v1489_v8 = vld [vmem:[#allocation5 + $0x8a0] sm:$0xff]  ;;  %v2973_v63 = vpack.c.bf16 %v1578_v16, %v1577_v14 }
 0x341   :  { %1080 = vmax.xlane.f32.xlu0 %v3379_v15  ;;  %2930 = vmatpush3.bf16.msra.mxu0 %v2929_v9  ;;  %v1583_v9 = vld [vmem:[#allocation5 + $0x930] sm:$0xff] }
 0x342   :  { %2867 = vmatpush3.bf16.msra.mxu1 %v2866_v10  ;;  %v1490_v10 = vld [vmem:[#allocation5 + $0x8a8] sm:$0xff]  ;;  %2931 = vmatprep.subr.bf16.mxu0 %v3153_v0 }
 0x343   :  { %2892 = vmatprep.subr.bf16.mxu1 %v3153_v0  ;;  %v2948_v19 = vpack.c.bf16 %v1490_v10, %v1489_v8  ;;  %v1584_v10 = vld [vmem:[#allocation5 + $0x938] sm:$0xff] }
 0x344   :  { %v2982_v12 = vpack.c.bf16 %v1584_v10, %v1583_v9 }
 0x345   :  { %2430 = vmatmul.mubr.f32.vlgmr.msra.gmra.mrb[8].mxu1 %v696_v18  ;;  %2933 = vmatpush3.bf16.msra.mxu0 %v2932_v23  ;;  %v1590_v23 = vld [vmem:[#allocation5 + $0x968] sm:$0xff] }
 0x346   :  { %2894 = vmatpush3.bf16.msra.mxu1 %v2893_v17  ;;  %2499 = vmatprep.mubr.msk.f32.mxu1 %vm3154_vm0, %v3155_v1  ;;  %v2946_v17 = vpack.c.bf16 %v1472_v7, %v1471_v5  ;;  %v1581_v7 = vld [vmem:[#allocation5 + $0x920] sm:$0xff] }
 0x347   :  { %2895 = vmatprep.subr.bf16.mxu1 %v3153_v0  ;;  %2934 = vmatprep.subr.bf16.mxu0 %v3153_v0 }
 0x34a   :  { %2897 = vmatpush3.bf16.msra.mxu1 %v2896_v21  ;;  %v1474_v21 = vld [vmem:[#allocation5 + $0x828] sm:$0xff] }
 0x34b   :  { %2898 = vmatprep.subr.bf16.mxu1 %v3153_v0 }
 0x34e   :  { %2900 = vmatpush3.bf16.msra.mxu1 %v2899_v24  ;;  %v1492_v24 = vld [vmem:[#allocation5 + $0x8b8] sm:$0xff] }
 0x34f   :  { %2901 = vmatprep.subr.bf16.mxu1 %v3153_v0  ;;  %v2952_v28 = vpack.c.bf16 %v1492_v24, %v1491_v22  ;;  %v1589_v22 = vld [vmem:[#allocation5 + $0x960] sm:$0xff] }
 0x350   :  { %v2991_v24 = vpack.c.bf16 %v1590_v23, %v1589_v22 }
 0x352   :  { %2903 = vmatpush3.bf16.msra.mxu1 %v2902_v27  ;;  %v2950_v27 = vpack.c.bf16 %v1474_v21, %v1473_v20  ;;  %v1588_v20 = vld [vmem:[#allocation5 + $0x958] sm:$0xff] }
 0x353   :  { %2904 = vmatprep.subr.bf16.mxu1 %v3153_v0 }
 0x356   :  { %2906 = vmatpush3.bf16.msra.mxu1 %v2905_v30  ;;  %v1493_v30 = vld [vmem:[#allocation5 + $0x8c0] sm:$0xff] }
 0x357   :  { %2907 = vmatprep.subr.bf16.mxu1 %v3153_v0  ;;  %v2956_v33 = vpack.c.bf16 %v1494_v31, %v1493_v30 }
 0x35a   :  { %2909 = vmatpush3.bf16.msra.mxu1 %v2908_v37  ;;  %v2958_v37 = vpack.c.bf16 %v1478_v34, %v1477_v6 }
 0x35b   :  { %2910 = vmatprep.subr.bf16.mxu1 %v3153_v0 }
 0x35d   :  { %v1271_v53 = vpop.f32.mrb[10].mxu0 }
 0x35e   :  { %2912 = vmatpush3.bf16.msra.mxu1 %v2911_v43  ;;  %v2466_v60 = vpop.f32.mrb[11].mxu0  ;;  %v1272_v56 = vadd.f32 %v1719_v49, %v1271_v53  ;;  %v2962_v43 = vpack.c.bf16 %v1480_v40, %v1479_v39  ;;  %v1392_v49 = vld [vmem:[#allocation5 + $0x470] sm:$0xff]  ;;  %v2966_v53 = vpack.c.bf16 %v1482_v46, %v1481_v45 }
 0x35f   :  { %2913 = vmatprep.subr.bf16.mxu1 %v3153_v0  ;;  %v2938_v52 = vpack.c.bf16 %v1393_v51, %v1392_v49  ;;  %v2968_v60 = vpack.c.bf16 %v1500_v48, %v1499_v47 }
 0x360   :  { %v1275_v3 = vmax.f32 %v1272_v56, 0.0 }
 0x362   :  { %2915 = vmatpush3.bf16.msra.mxu1 %v2914_v54  ;;  %v1483_v54 = vld [vmem:[#allocation5 + $0x870] sm:$0xff] }
 0x363   :  { %2941 = vmatprep.subr.bf16.mxu1 %v2940_v57  ;;  %v2970_v56 = vpack.c.bf16 %v1484_v55, %v1483_v54  ;;  %v1715_v57 = vld [vmem:[#allocation7 + $0x7] ss:$0 sm:$0xff] }
 0x365   :  { %2500 = vmatmul.mubr.f32.vlgmr.msra.gmra.mrb[8].mxu1 %v1275_v3  ;;  %v1579_v3 = vld [vmem:[#allocation5 + $0x910] sm:$0xff] }
 0x366   :  { %2943 = vmatpush3.bf16.msra.mxu1 %v2942_v2  ;;  %1570 = vmatprep.mubr.f32.mxu1 %v696_v18  ;;  %v2935_v18 = vpack.c.bf16 %v1391_v26, %v1390_v25  ;;  %v1591_v25 = vld [vmem:[#allocation5 + $0x970] sm:$0xff]  ;;  %v1592_v26 = vld [vmem:[#allocation5 + $0x978] sm:$0xff] }
 0x367   :  { %2945 = vmatprep.subr.bf16.mxu1 %v2944_v4  ;;  %v1580_v4 = vld [vmem:[#allocation5 + $0x918] sm:$0xff] }
 0x368   :  { %2936 = vmatpush3.bf16.msra.mxu0 %v2935_v18  ;;  %v2976_v5 = vpack.c.bf16 %v1580_v4, %v1579_v3 }
 0x369   :  { %2937 = vmatprep.subr.bf16.mxu0 %v3153_v0 }
 0x36a   :  { %2947 = vmatpush3.bf16.msra.mxu1 %v2946_v17  ;;  %v1586_v17 = vld [vmem:[#allocation5 + $0x948] sm:$0xff] }
 0x36b   :  { %2949 = vmatprep.subr.bf16.mxu1 %v2948_v19  ;;  %v2985_v19 = vpack.c.bf16 %v1586_v17, %v1585_v13 }
 0x36c   :  { %2939 = vmatpush3.bf16.msra.mxu0 %v2938_v52 }
 0x36d   :  { %2972 = vmatprep.subr.bf16.mxu0 %v3153_v0 }
 0x36e   :  { %2951 = vmatpush3.bf16.msra.mxu1 %v2950_v27  ;;  %v2994_v27 = vpack.c.bf16 %v1592_v26, %v1591_v25 }
 0x36f   :  { %2953 = vmatprep.subr.bf16.mxu1 %v2952_v28  ;;  %v1718_v28 = vld [vmem:[#allocation7 + $0x5] ss:$0 sm:$0xff] }
 0x372   :  { %2955 = vmatpush3.bf16.msra.mxu1 %v2954_v32  ;;  %v1721_v32 = vld [vmem:[#allocation7 + $0xc] ss:$0 sm:$0xff] }
 0x373   :  { %2957 = vmatprep.subr.bf16.mxu1 %v2956_v33 }
 0x376   :  { %2959 = vmatpush3.bf16.msra.mxu1 %v2958_v37 }
 0x377   :  { %2961 = vmatprep.subr.bf16.mxu1 %v2960_v38 }
 0x37a   :  { %2963 = vmatpush3.bf16.msra.mxu1 %v2962_v43 }
 0x37b   :  { %2965 = vmatprep.subr.bf16.mxu1 %v2964_v44 }
 0x37e   :  { %2967 = vmatpush3.bf16.msra.mxu1 %v2966_v53 }
 0x37f   :  { %2969 = vmatprep.subr.bf16.mxu1 %v2968_v60 }
 0x382   :  { %2971 = vmatpush3.bf16.msra.mxu1 %v2970_v56 }
 0x385   :  { %1571 = vmatmul.mubr.f32.vlgmr.msra.gmra.mrb[10].mxu1 %v3338_v50  ;;  %v1582_v50 = vld [vmem:[#allocation5 + $0x928] sm:$0xff] }
 0x386   :  { %v2979_v8 = vpack.c.bf16 %v1582_v50, %v1581_v7 }
 0x3ce   :  { %v1081_v36 = vpop.xlane.xlu0 %1080 }
 0x3cf   :  { %v1082_v40 = vsub.f32 %v3379_v15, %v1081_v36 }
 0x3d1   :  { %v1083_v41 = vmul.f32 1.442695, %v1082_v40 }
 0x3f8   :  { %v978_v58 = vpop.f32.mrb[6].mxu1 }
 0x3f9   :  { %v2997_v59 = vadd.f32 %v1715_v57, %v978_v58  ;;  %v2361_v61 = vpop.f32.mrb[7].mxu1 }
 0x3fb   :  { %v983_v2 = vmax.f32 %v2997_v59, 0.0 }
 0x3fd   :  { %2535 = vmatmul.mubr.f32.vlgmr.msra.gmra.mrb[12].mxu0 %v983_v2 }
 0x3fe   :  { %2974 = vmatpush3.bf16.msra.mxu0 %v2973_v63  ;;  %2569 = vmatprep.mubr.msk.f32.mxu0 %vm3154_vm0, %v3155_v1  ;;  %v1587_v1 = vld [vmem:[#allocation5 + $0x950] sm:$0xff] }
 0x3ff   :  { %2975 = vmatprep.subr.bf16.mxu0 %v3153_v0  ;;  %v2988_v21 = vpack.c.bf16 %v1588_v20, %v1587_v1 }
 0x402   :  { %2977 = vmatpush3.bf16.msra.mxu0 %v2976_v5 }
 0x403   :  { %2978 = vmatprep.subr.bf16.mxu0 %v3153_v0 }
 0x406   :  { %2980 = vmatpush3.bf16.msra.mxu0 %v2979_v8 }
 0x407   :  { %2981 = vmatprep.subr.bf16.mxu0 %v3153_v0 }
 0x40a   :  { %2983 = vmatpush3.bf16.msra.mxu0 %v2982_v12 }
 0x40b   :  { %2984 = vmatprep.subr.bf16.mxu0 %v3153_v0 }
 0x40e   :  { %2986 = vmatpush3.bf16.msra.mxu0 %v2985_v19 }
 0x40f   :  { %2987 = vmatprep.subr.bf16.mxu0 %v3153_v0 }
 0x412   :  { %2989 = vmatpush3.bf16.msra.mxu0 %v2988_v21 }
 0x413   :  { %2990 = vmatprep.subr.bf16.mxu0 %v3153_v0 }
 0x416   :  { %2992 = vmatpush3.bf16.msra.mxu0 %v2991_v24 }
 0x417   :  { %2993 = vmatprep.subr.bf16.mxu0 %v3153_v0 }
 0x41a   :  { %2995 = vmatpush3.bf16.msra.mxu0 %v2994_v27 }
 0x438   :  { %v1358_v29 = vpop.f32.mrb[8].mxu1 }
 0x439   :  { %v2998_v11 = vadd.f32 %v1718_v28, %v1358_v29  ;;  %v2501_v18 = vpop.f32.mrb[9].mxu1 }
 0x43b   :  { %1363 = vst [vmem:[#allocation8 + $0x8] sm:$0xff] %v2998_v11  ;;  %v1364_v30 = vsel %vm986_vm1, %v2998_v11, -1e+30 }
 0x43c   :  { %1365 = vmax.xlane.f32.xlu0 %v1364_v30 }
 0x458   :  { %v2027_v31 = vpop.f32.mrb[10].mxu1 }
 0x459   :  { %v2028_v33 = vpop.f32.mrb[11].mxu1 }
 0x45a   :  { %v2029_v6 = vadd.f32 %v2028_v33, %v2027_v31 }
 0x45c   :  { %v1573_v34 = vadd.f32 %v2029_v6, %v1721_v32 }
 0x45e   :  { %v1576_v35 = vmax.f32 %v1573_v34, 0.0 }
 0x460   :  { %2570 = vmatmul.mubr.f32.vlgmr.msra.gmra.mrb[12].mxu0 %v1576_v35 }
 0x4c9   :  { %v1366_v37 = vpop.xlane.xlu0 %1365 }
 0x4ca   :  { %v1367_v0 = vsub.f32 %v1364_v30, %v1366_v37 }
 0x4cc   :  { %v1368_v38 = vmul.f32 1.442695, %v1367_v0 }
 0x4ce   :  { %3018 = vpow2.f32 %v1368_v38 }
 0x4cf   :  { %3020 = vpow2.f32 %v1083_v41 }
 0x4d8   :  { %v3019_v39 = vpop.eup %3018 }
 0x4d9   :  { %1370 = vadd.xlane.f32.xlu0 %v3019_v39  ;;  %v3021_v47 = vpop.eup %3020 }
 0x533   :  { %v1659_v43 = vpop.f32.mrb[12].mxu0 }
 0x534   :  { %v2999_v44 = vadd.f32 %v1720_v42, %v1659_v43  ;;  %v2571_v45 = vpop.f32.mrb[13].mxu0 }
 0x536   :  { %1664 = vst [vmem:[#allocation8 + $0x10] sm:$0xff] %v2999_v44  ;;  %v1665_v46 = vsel %vm986_vm1, %v2999_v44, -1e+30 }
 0x537   :  { %1666 = vmax.xlane.f32.xlu1 %v1665_v46 }
 0x53b   :  { %1085 = vadd.xlane.f32.xlu1 %v3021_v47 }
 0x566   :  { %v1371_v48 = vpop.xlane.xlu0 %1370 }
 0x567   :  { %3022 = vrcp.f32 %v1371_v48 }
 0x571   :  { %v3023_v49 = vpop.eup %3022 }
 0x572   :  { %v1373_v51 = vmul.f32 %v3023_v49, %v1371_v48 }
 0x574   :  { %v1374_v52 = vsub.f32 2.0, %v1373_v51 }
 0x576   :  { %v1375_v53 = vmul.f32 %v3023_v49, %v1374_v52 }
 0x578   :  { %v1376_v15 = vmul.f32 %v3019_v39, %v1375_v53 }
 0x57a   :  { %1377 = vst [vmem:[#allocation9 + $0x8] sm:$0xff] %v1376_v15 }
 0x5c4   :  { %v1667_v60 = vpop.xlane.xlu1 %1666 }
 0x5c5   :  { %v1668_v54 = vsub.f32 %v1665_v46, %v1667_v60 }
 0x5c7   :  { %v1669_v55 = vmul.f32 1.442695, %v1668_v54 }
 0x5c8   :  { %v1086_v56 = vpop.xlane.xlu1 %1085 }
 0x5c9   :  { %3024 = vpow2.f32 %v1669_v55 }
 0x5ca   :  { %3026 = vrcp.f32 %v1086_v56 }
 0x5d3   :  { %v3025_v57 = vpop.eup %3024 }
 0x5d4   :  { %v3027_v62 = vpop.eup %3026  ;;  %1671 = vadd.xlane.f32.xlu1 %v3025_v57 }
 0x5d5   :  { %v1088_v14 = vmul.f32 %v3027_v62, %v1086_v56 }
 0x5d7   :  { %v1089_v16 = vsub.f32 2.0, %v1088_v14 }
 0x5d9   :  { %v1090_v58 = vmul.f32 %v3027_v62, %v1089_v16 }
 0x5db   :  { %v1091_v59 = vmul.f32 %v3021_v47, %v1090_v58 }
 0x5dd   :  { %1092 = vst [vmem:[#allocation9] sm:$0xff] %v1091_v59 }
 0x5de   :  { %3107 = shalt.err (!%p3104_p0)
}
 0x5df   :  { %s3108_s29 = scalar_lea.hbm %s3447_s3, 384 }
 0x5e0   :  { %p3109_p1 = scmp.ne.s32.totalorder %s3447_s3, %s3108_s29  ;;  %p3112_p2 = scmp.lt.u32.totalorder %s3108_s29, %s3447_s3 }
 0x5e2   :  { %p3114_p3 = pnand %p3112_p2, %p3109_p1 }
 0x5e4   :  { %3117 = shalt.err (!%p3114_p3)
}
 0x5e5   :  { %1688 = dma.vmem_to_hbm [thread:$0]  %s1686_s25, 384, %s3447_s3, [#allocation4]  }
 0x5e6   :  { %s3157_s10 = smov [#allocation9]  }
 0x5e7   :  { %s1695_s11 = sshll.u32 %s3157_s10, 4  ;;  %s1696_s11 = int_to_ptr.vmem [resolvable:$true] %s1695_s11 }
 0x5e8   :  { %s3118_s12 = scalar_lea.vmem %s1696_s11, 384  ;;  %p3123_p5 = scmp.lt.s32.totalorder %s1696_s11, %s1696_s11 }
 0x5e9   :  { %p3119_p4 = scmp.ne.s32.totalorder %s1696_s11, %s3118_s12  ;;  %p3124_p6 = scmp.lt.s32.totalorder %s3118_s12, %s3118_s12 }
 0x5eb   :  { %p3125_p7 = por %p3124_p6, %p3123_p5 }
 0x5ed   :  { %p3126_p8 = pnand %p3125_p7, %p3119_p4 }
 0x661   :  { %v1672_v61 = vpop.xlane.xlu1 %1671 }
 0x662   :  { %3028 = vrcp.f32 %v1672_v61 }
 0x66c   :  { %v3029_v63 = vpop.eup %3028 }
 0x66d   :  { %v1674_v2 = vmul.f32 %v3029_v63, %v1672_v61 }
 0x66f   :  { %v1675_v3 = vsub.f32 2.0, %v1674_v2 }
 0x671   :  { %v1676_v4 = vmul.f32 %v3029_v63, %v1675_v3 }
 0x673   :  { %v1677_v5 = vmul.f32 %v3025_v57, %v1676_v4 }
 0x675   :  { %1678 = vst [vmem:[#allocation9 + $0x10] sm:$0xff] %v1677_v5 }
 0x676   :  { %3129 = shalt.err (!%p3126_p8)
}
 0x677   :  { %s3130_s1 = scalar_lea.hbm %s3448_s4, 384 }
 0x678   :  { %p3131_p9 = scmp.ne.s32.totalorder %s3448_s4, %s3130_s1  ;;  %p3134_p10 = scmp.lt.u32.totalorder %s3130_s1, %s3448_s4 }
 0x67a   :  { %p3136_p11 = pnand %p3134_p10, %p3131_p9 }
 0x67c   :  { %3139 = shalt.err (!%p3136_p11)
}
 0x67d   :  { %1698 = dma.vmem_to_hbm [thread:$0]  %s1696_s11, 384, %s3448_s4, [#allocation10]  }
 0x67e   :  { %3144 = dma.done.wait [#allocation4], 384  }
 0x67f   :  { %3145 = vsyncadd [#allocation4], 4294966912 }
 0x680   :  { %3146 = dma.done.wait [#allocation10], 384  }
 0x681   :  { %3147 = vsyncadd [#allocation10], 4294966912 }
 0x682   :  { %1705 = vsyncpa [#allocation3], 1 }
 0x683   :  { %1706 = vsyncpa [#allocation6], 1 }
 0x684   :  { %1707 = vsyncpa [#allocation4], 1 }
 0x685   :  { %1708 = vsyncpa [#allocation10], 1 }

</bundles_post_ra>
